<compile_context>
chip_gen: v6e
topology: v6e:2x2x1
jax: 0.10.0
libtpu: 0.0.40
codegen_flags: <defaults>
</compile_context>

<pallas_src>
import jax
import jax.numpy as jnp
from jax.experimental import pallas as pl
from jax.experimental.pallas import tpu as pltpu


LANE = 128  # TPU lane width; K and N are zero-padded to multiples of this.


# ----------------------------- Pallas kernels ------------------------------

def conv_pool_kernel(p00_ref, p01_ref, p10_ref, p11_ref, w_ref, b_ref, o_ref):
    """Fused conv (as im2col matmul) + bias + ReLU + 2x2 max-pool.

    p{dy}{dx}_ref : (tm, Kp)  im2col rows for pool-window offset (dy, dx)
    w_ref         : (Kp, Np)  weights, K/N zero-padded to lane multiples
    b_ref         : (1,  Np)  bias (zero-padded)
    o_ref         : (tm, Np)  pooled activations (one row per pooled pixel)
    """
    w = w_ref[...]
    b = b_ref[...]

    def act(p_ref):
        acc = jnp.dot(p_ref[...], w, preferred_element_type=jnp.float32)
        return jnp.maximum(acc + b, 0.0)

    out = act(p00_ref)
    out = jnp.maximum(out, act(p01_ref))
    out = jnp.maximum(out, act(p10_ref))
    out = jnp.maximum(out, act(p11_ref))
    o_ref[...] = out


def mlp_kernel(x_ref, w1_ref, b1_ref, w2_ref, b2_ref, w3_ref, b3_ref, o_ref):
    """Fused fc1(ReLU) -> fc2(ReLU) -> fc3; all weights resident in VMEM."""
    h = jnp.dot(x_ref[...], w1_ref[...], preferred_element_type=jnp.float32)
    h = jnp.maximum(h + b1_ref[...], 0.0)
    h = jnp.dot(h, w2_ref[...], preferred_element_type=jnp.float32)
    h = jnp.maximum(h + b2_ref[...], 0.0)
    h = jnp.dot(h, w3_ref[...], preferred_element_type=jnp.float32)
    o_ref[...] = h + b3_ref[...]


# ----------------------------- kernel wrappers ------------------------------

def conv_pool(x_nhwc, w_pad, b_pad, k, tm=128):
    """VALID kxk conv + bias + ReLU + 2x2/2 max-pool in a single pallas_call.

    Returns (B*OHp*OWp, Np) pooled rows, row order (b, oh_pool, ow_pool),
    channel dim zero-padded to Np = 128 lanes.
    """
    B, H, W, C = x_nhwc.shape
    OH, OW = H - k + 1, W - k + 1
    assert OH % 2 == 0 and OW % 2 == 0
    OHp, OWp = OH // 2, OW // 2
    K = k * k * C
    Kp, Np = w_pad.shape

    # im2col (feature order (kh, kw, c) matches prepare_params) with the K
    # zero-padding folded into the concatenate -> one fused copy under jit.
    cols = [x_nhwc[:, i:i + OH, j:j + OW, :] for i in range(k) for j in range(k)]
    if Kp > K:
        cols.append(jnp.zeros((B, OH, OW, Kp - K), x_nhwc.dtype))
    patches = jnp.concatenate(cols, axis=-1)                  # (B, OH, OW, Kp)

    # Split into the 4 pool-window quadrants so the 2x2 max becomes a pure
    # elementwise max of four matmul results inside the kernel.
    quads = [patches[:, dy:2 * OHp:2, dx:2 * OWp:2, :].reshape(B * OHp * OWp, Kp)
             for dy in (0, 1) for dx in (0, 1)]

    M = B * OHp * OWp
    tm_eff = M if M <= tm else tm                 # full-dim block when small
    grid = (pl.cdiv(M, tm_eff),)
    p_spec = pl.BlockSpec((tm_eff, Kp), lambda i: (i, 0))

    return pl.pallas_call(
        conv_pool_kernel,
        out_shape=jax.ShapeDtypeStruct((M, Np), jnp.float32),
        grid=grid,
        in_specs=[p_spec, p_spec, p_spec, p_spec,
                  pl.BlockSpec((Kp, Np), lambda i: (0, 0)),
                  pl.BlockSpec((1, Np), lambda i: (0, 0))],
        out_specs=pl.BlockSpec((tm_eff, Np), lambda i: (i, 0)),
        compiler_params=pltpu.CompilerParams(
            dimension_semantics=("parallel",)),
    )(*quads, w_pad, b_pad)


def mlp(x, w1, b1, w2, b2, w3, b3, tb=128):
    """Fused 3-layer MLP head, tiled over the batch dimension."""
    B, K = x.shape
    tb_eff = B if B <= tb else tb
    grid = (pl.cdiv(B, tb_eff),)

    def full(a):
        return pl.BlockSpec(a.shape, lambda i: (0, 0))

    return pl.pallas_call(
        mlp_kernel,
        out_shape=jax.ShapeDtypeStruct((B, w3.shape[1]), jnp.float32),
        grid=grid,
        in_specs=[pl.BlockSpec((tb_eff, K), lambda i: (i, 0)),
                  full(w1), full(b1), full(w2), full(b2), full(w3), full(b3)],
        out_specs=pl.BlockSpec((tb_eff, w3.shape[1]), lambda i: (i, 0)),
        compiler_params=pltpu.CompilerParams(
            dimension_semantics=("parallel",)),
    )(x, w1, b1, w2, b2, w3, b3)


# ----------------------------- params & layout prep --------------------------

def init_params(key):
    ks = jax.random.split(key, 10)

    def u(k, shape, fan_in):
        bound = 1.0 / jnp.sqrt(fan_in)
        return jax.random.uniform(k, shape, jnp.float32, -bound, bound)

    p = {}
    p["conv1_w"] = u(ks[0], (10, 1, 5, 5), 1 * 5 * 5)
    p["conv1_b"] = u(ks[1], (10,), 1 * 5 * 5)
    p["conv2_w"] = u(ks[2], (32, 10, 5, 5), 10 * 5 * 5)
    p["conv2_b"] = u(ks[3], (32,), 10 * 5 * 5)
    p["fc1_w"] = u(ks[4], (128, 32 * 9 * 9), 32 * 9 * 9)   # torch (out, in)
    p["fc1_b"] = u(ks[5], (128,), 32 * 9 * 9)
    p["fc2_w"] = u(ks[6], (64, 128), 128)
    p["fc2_b"] = u(ks[7], (64,), 128)
    p["fc3_w"] = u(ks[8], (7, 64), 64)
    p["fc3_b"] = u(ks[9], (7,), 64)
    return p


def _round_up(n, m):
    return ((n + m - 1) // m) * m


def prepare_params(p):
    """One-time layout prep: transpose weights to (in, out) and zero-pad K/N to
    lane multiples so every kernel operand is lane-dense."""
    def conv_w(w_oihw):
        cout, cin, kh, kw = w_oihw.shape
        m = jnp.transpose(w_oihw, (2, 3, 1, 0)).reshape(kh * kw * cin, cout)
        kp = _round_up(m.shape[0], LANE)
        return jnp.pad(m, ((0, kp - m.shape[0]), (0, LANE - cout)))

    def bias(b):
        return jnp.pad(b.reshape(1, -1), ((0, 0), (0, LANE - b.shape[0])))

    pp = {}
    pp["w1"], pp["b1"] = conv_w(p["conv1_w"]), bias(p["conv1_b"])     # (128,128)
    pp["w2"], pp["b2"] = conv_w(p["conv2_w"]), bias(p["conv2_b"])     # (256,128)

    kf = _round_up(p["fc1_w"].shape[1], LANE)                          # 2592->2688
    pp["wf1"] = jnp.pad(p["fc1_w"].T,
                        ((0, kf - p["fc1_w"].shape[1]), (0, 0)))       # (2688,128)
    pp["bf1"] = bias(p["fc1_b"])                                       # (1,128)
    pp["wf2"] = jnp.pad(p["fc2_w"].T, ((0, 0), (0, LANE - 64)))        # (128,128)
    pp["bf2"] = bias(p["fc2_b"])
    pp["wf3"] = jnp.pad(p["fc3_w"].T, ((0, LANE - 64), (0, LANE - 7)))  # (128,128)
    pp["bf3"] = bias(p["fc3_b"])
    return pp


# --------------------------------- forward -----------------------------------

def cnn_forward(pp, x_nchw):
    B = x_nchw.shape[0]
    x = jnp.transpose(x_nchw, (0, 2, 3, 1))                  # NCHW -> NHWC

    # conv1 + ReLU + 2x2 pool (one fused kernel) -> (B,22,22,10)
    y = conv_pool(x, pp["w1"], pp["b1"], k=5)
    y = y.reshape(B, 22, 22, LANE)[..., :10]

    # conv2 + ReLU + 2x2 pool (one fused kernel) -> (B,81,32)
    y = conv_pool(y, pp["w2"], pp["b2"], k=5)
    y = y.reshape(B, 9 * 9, LANE)[..., :32]

    # torch-style (C,H,W) flatten, then zero-pad K to match the padded fc1 rows
    feat = jnp.transpose(y, (0, 2, 1)).reshape(B, 32 * 81)   # (B, 2592)
    feat = jnp.pad(feat, ((0, 0), (0, pp["wf1"].shape[0] - feat.shape[1])))

    out = mlp(feat, pp["wf1"], pp["bf1"], pp["wf2"], pp["bf2"],
              pp["wf3"], pp["bf3"])                          # (B, 128) lane-dense
    return out[:, :7]


# ----------------------------- reference (XLA) -------------------------------

def cnn_reference(params, x_nchw):
    def conv(x, w, b):
        y = jax.lax.conv_general_dilated(
            x, w, window_strides=(1, 1), padding="VALID",
            dimension_numbers=("NCHW", "OIHW", "NCHW"))
        return jax.nn.relu(y + b.reshape(1, -1, 1, 1))

    def pool(x):
        return jax.lax.reduce_window(
            x, -jnp.inf, jax.lax.max, (1, 1, 2, 2), (1, 1, 2, 2), "VALID")

    x = pool(conv(x_nchw, params["conv1_w"], params["conv1_b"]))
    x = pool(conv(x, params["conv2_w"], params["conv2_b"]))
    x = x.reshape(x.shape[0], -1)
    x = jax.nn.relu(x @ params["fc1_w"].T + params["fc1_b"])
    x = jax.nn.relu(x @ params["fc2_w"].T + params["fc2_b"])
    return x @ params["fc3_w"].T + params["fc3_b"]


# --------------------------------- main --------------------------------------

if __name__ == "__main__":
    key = jax.random.PRNGKey(0)
    pkey, xkey = jax.random.split(key)
    params = init_params(pkey)
    prepped = prepare_params(params)   # one-time weight transpose/padding

    # Input spatial size implied by fc1 (32*9*9): 48x48, 1 channel.
    x = jax.random.normal(xkey, (2, 1, 48, 48), jnp.float32)

    fwd = jax.jit(cnn_forward)
    out = jax.block_until_ready(fwd(prepped, x))
    assert out.shape == (2, 7), out.shape

    ref = jax.block_until_ready(cnn_reference(params, x))
    assert jnp.allclose(out, ref, atol=1e-4, rtol=1e-4), (
        "mismatch vs XLA reference")

    print("KERNEL_OK")
</pallas_src>

<mosaic_0001>
module attributes {stable_mosaic.version = 11 : i64} {
  func.func @conv_pool_kernel(%arg0: i32, %arg1: memref<128x128xf32, #tpu.memory_space<vmem>>, %arg2: memref<128x128xf32, #tpu.memory_space<vmem>>, %arg3: memref<128x128xf32, #tpu.memory_space<vmem>>, %arg4: memref<128x128xf32, #tpu.memory_space<vmem>>, %arg5: memref<128x128xf32, #tpu.memory_space<vmem>>, %arg6: memref<1x128xf32, #tpu.memory_space<vmem>>, %arg7: memref<128x128xf32, #tpu.memory_space<vmem>>) attributes {dimension_semantics = [#tpu.dimension_semantics<parallel>], iteration_bounds = array<i64: 8>, scalar_prefetch = 0 : i64, scratch_operands = 0 : i64, tpu.core_type = #tpu.core_type<tc>, window_params = [{transform_indices = @transform_0, window_bounds = array<i64: 128, 128>}, {transform_indices = @transform_1, window_bounds = array<i64: 128, 128>}, {transform_indices = @transform_2, window_bounds = array<i64: 128, 128>}, {transform_indices = @transform_3, window_bounds = array<i64: 128, 128>}, {pipeline_mode = #tpu.pipeline_mode<synchronous>, transform_indices = @transform_4, window_bounds = array<i64: 128, 128>}, {pipeline_mode = #tpu.pipeline_mode<synchronous>, transform_indices = @transform_5, window_bounds = array<i64: 1, 128>}, {transform_indices = @transform_6, window_bounds = array<i64: 128, 128>}]} {
    %c0 = arith.constant 0 : index
    %c0_0 = arith.constant 0 : index
    %0 = vector.load %arg5[%c0, %c0_0] : memref<128x128xf32, #tpu.memory_space<vmem>>, vector<128x128xf32>
    %c0_1 = arith.constant 0 : index
    %c0_2 = arith.constant 0 : index
    %1 = vector.load %arg6[%c0_1, %c0_2] : memref<1x128xf32, #tpu.memory_space<vmem>>, vector<1x128xf32>
    %c0_3 = arith.constant 0 : index
    %c0_4 = arith.constant 0 : index
    %2 = vector.load %arg1[%c0_3, %c0_4] : memref<128x128xf32, #tpu.memory_space<vmem>>, vector<128x128xf32>
    %cst = arith.constant dense<0.000000e+00> : vector<128x128xf32>
    %3 = tpu.matmul %2, %0, %cst {dimension_numbers = #tpu.dot_dimension_numbers<[1], [0], [0], [1], [0, 0, 1, 1], [], []>} : vector<128x128xf32>, vector<128x128xf32>, vector<128x128xf32> -> vector<128x128xf32>
    %4 = vector.broadcast %1 : vector<1x128xf32> to vector<128x128xf32>
    %5 = arith.addf %3, %4 : vector<128x128xf32>
    %cst_5 = arith.constant 0.000000e+00 : f32
    %6 = vector.broadcast %cst_5 : f32 to vector<128x128xf32>
    %7 = arith.maximumf %5, %6 : vector<128x128xf32>
    %c0_6 = arith.constant 0 : index
    %c0_7 = arith.constant 0 : index
    %8 = vector.load %arg2[%c0_6, %c0_7] : memref<128x128xf32, #tpu.memory_space<vmem>>, vector<128x128xf32>
    %cst_8 = arith.constant dense<0.000000e+00> : vector<128x128xf32>
    %9 = tpu.matmul %8, %0, %cst_8 {dimension_numbers = #tpu.dot_dimension_numbers<[1], [0], [0], [1], [0, 0, 1, 1], [], []>} : vector<128x128xf32>, vector<128x128xf32>, vector<128x128xf32> -> vector<128x128xf32>
    %10 = vector.broadcast %1 : vector<1x128xf32> to vector<128x128xf32>
    %11 = arith.addf %9, %10 : vector<128x128xf32>
    %cst_9 = arith.constant 0.000000e+00 : f32
    %12 = vector.broadcast %cst_9 : f32 to vector<128x128xf32>
    %13 = arith.maximumf %11, %12 : vector<128x128xf32>
    %14 = arith.maximumf %7, %13 : vector<128x128xf32>
    %c0_10 = arith.constant 0 : index
    %c0_11 = arith.constant 0 : index
    %15 = vector.load %arg3[%c0_10, %c0_11] : memref<128x128xf32, #tpu.memory_space<vmem>>, vector<128x128xf32>
    %cst_12 = arith.constant dense<0.000000e+00> : vector<128x128xf32>
    %16 = tpu.matmul %15, %0, %cst_12 {dimension_numbers = #tpu.dot_dimension_numbers<[1], [0], [0], [1], [0, 0, 1, 1], [], []>} : vector<128x128xf32>, vector<128x128xf32>, vector<128x128xf32> -> vector<128x128xf32>
    %17 = vector.broadcast %1 : vector<1x128xf32> to vector<128x128xf32>
    %18 = arith.addf %16, %17 : vector<128x128xf32>
    %cst_13 = arith.constant 0.000000e+00 : f32
    %19 = vector.broadcast %cst_13 : f32 to vector<128x128xf32>
    %20 = arith.maximumf %18, %19 : vector<128x128xf32>
    %21 = arith.maximumf %14, %20 : vector<128x128xf32>
    %c0_14 = arith.constant 0 : index
    %c0_15 = arith.constant 0 : index
    %22 = vector.load %arg4[%c0_14, %c0_15] : memref<128x128xf32, #tpu.memory_space<vmem>>, vector<128x128xf32>
    %cst_16 = arith.constant dense<0.000000e+00> : vector<128x128xf32>
    %23 = tpu.matmul %22, %0, %cst_16 {dimension_numbers = #tpu.dot_dimension_numbers<[1], [0], [0], [1], [0, 0, 1, 1], [], []>} : vector<128x128xf32>, vector<128x128xf32>, vector<128x128xf32> -> vector<128x128xf32>
    %24 = vector.broadcast %1 : vector<1x128xf32> to vector<128x128xf32>
    %25 = arith.addf %23, %24 : vector<128x128xf32>
    %cst_17 = arith.constant 0.000000e+00 : f32
    %26 = vector.broadcast %cst_17 : f32 to vector<128x128xf32>
    %27 = arith.maximumf %25, %26 : vector<128x128xf32>
    %28 = arith.maximumf %21, %27 : vector<128x128xf32>
    %c0_18 = arith.constant 0 : index
    %c0_19 = arith.constant 0 : index
    %29 = vector.load %arg7[%c0_18, %c0_19] : memref<128x128xf32, #tpu.memory_space<vmem>>, vector<128x128xf32>
    tpu.vector_store %arg7[%c0_18, %c0_19], %28 {strides = array<i32>} : memref<128x128xf32, #tpu.memory_space<vmem>>, vector<128x128xf32>,
    return
  }
  func.func @transform_0(%arg0: i32) -> (i32, i32) {
    %c0_i32 = arith.constant 0 : i32
    %c0_i32_0 = arith.constant 0 : i32
    return %arg0, %c0_i32 : i32, i32
  }
  func.func @transform_1(%arg0: i32) -> (i32, i32) {
    %c0_i32 = arith.constant 0 : i32
    %c0_i32_0 = arith.constant 0 : i32
    return %arg0, %c0_i32 : i32, i32
  }
  func.func @transform_2(%arg0: i32) -> (i32, i32) {
    %c0_i32 = arith.constant 0 : i32
    %c0_i32_0 = arith.constant 0 : i32
    return %arg0, %c0_i32 : i32, i32
  }
  func.func @transform_3(%arg0: i32) -> (i32, i32) {
    %c0_i32 = arith.constant 0 : i32
    %c0_i32_0 = arith.constant 0 : i32
    return %arg0, %c0_i32 : i32, i32
  }
  func.func @transform_4(%arg0: i32) -> (i32, i32) {
    %c0_i32 = arith.constant 0 : i32
    %c0_i32_0 = arith.constant 0 : i32
    %c0_i32_1 = arith.constant 0 : i32
    return %c0_i32, %c0_i32_0 : i32, i32
  }
  func.func @transform_5(%arg0: i32) -> (i32, i32) {
    %c0_i32 = arith.constant 0 : i32
    %c0_i32_0 = arith.constant 0 : i32
    %c0_i32_1 = arith.constant 0 : i32
    return %c0_i32, %c0_i32_0 : i32, i32
  }
  func.func @transform_6(%arg0: i32) -> (i32, i32) {
    %c0_i32 = arith.constant 0 : i32
    %c0_i32_0 = arith.constant 0 : i32
    return %arg0, %c0_i32 : i32, i32
  }
}

module attributes {stable_mosaic.version = 11 : i64} {
  func.func @conv_pool_kernel(%arg0: i32, %arg1: memref<128x256xf32, #tpu.memory_space<vmem>>, %arg2: memref<128x256xf32, #tpu.memory_space<vmem>>, %arg3: memref<128x256xf32, #tpu.memory_space<vmem>>, %arg4: memref<128x256xf32, #tpu.memory_space<vmem>>, %arg5: memref<256x128xf32, #tpu.memory_space<vmem>>, %arg6: memref<1x128xf32, #tpu.memory_space<vmem>>, %arg7: memref<128x128xf32, #tpu.memory_space<vmem>>) attributes {dimension_semantics = [#tpu.dimension_semantics<parallel>], iteration_bounds = array<i64: 2>, scalar_prefetch = 0 : i64, scratch_operands = 0 : i64, tpu.core_type = #tpu.core_type<tc>, window_params = [{transform_indices = @transform_0, window_bounds = array<i64: 128, 256>}, {transform_indices = @transform_1, window_bounds = array<i64: 128, 256>}, {transform_indices = @transform_2, window_bounds = array<i64: 128, 256>}, {transform_indices = @transform_3, window_bounds = array<i64: 128, 256>}, {pipeline_mode = #tpu.pipeline_mode<synchronous>, transform_indices = @transform_4, window_bounds = array<i64: 256, 128>}, {pipeline_mode = #tpu.pipeline_mode<synchronous>, transform_indices = @transform_5, window_bounds = array<i64: 1, 128>}, {transform_indices = @transform_6, window_bounds = array<i64: 128, 128>}]} {
    %c0 = arith.constant 0 : index
    %c0_0 = arith.constant 0 : index
    %0 = vector.load %arg5[%c0, %c0_0] : memref<256x128xf32, #tpu.memory_space<vmem>>, vector<256x128xf32>
    %c0_1 = arith.constant 0 : index
    %c0_2 = arith.constant 0 : index
    %1 = vector.load %arg6[%c0_1, %c0_2] : memref<1x128xf32, #tpu.memory_space<vmem>>, vector<1x128xf32>
    %c0_3 = arith.constant 0 : index
    %c0_4 = arith.constant 0 : index
    %2 = vector.load %arg1[%c0_3, %c0_4] : memref<128x256xf32, #tpu.memory_space<vmem>>, vector<128x256xf32>
    %cst = arith.constant dense<0.000000e+00> : vector<128x128xf32>
    %3 = tpu.matmul %2, %0, %cst {dimension_numbers = #tpu.dot_dimension_numbers<[1], [0], [0], [1], [0, 0, 1, 1], [], []>} : vector<128x256xf32>, vector<256x128xf32>, vector<128x128xf32> -> vector<128x128xf32>
    %4 = vector.broadcast %1 : vector<1x128xf32> to vector<128x128xf32>
    %5 = arith.addf %3, %4 : vector<128x128xf32>
    %cst_5 = arith.constant 0.000000e+00 : f32
    %6 = vector.broadcast %cst_5 : f32 to vector<128x128xf32>
    %7 = arith.maximumf %5, %6 : vector<128x128xf32>
    %c0_6 = arith.constant 0 : index
    %c0_7 = arith.constant 0 : index
    %8 = vector.load %arg2[%c0_6, %c0_7] : memref<128x256xf32, #tpu.memory_space<vmem>>, vector<128x256xf32>
    %cst_8 = arith.constant dense<0.000000e+00> : vector<128x128xf32>
    %9 = tpu.matmul %8, %0, %cst_8 {dimension_numbers = #tpu.dot_dimension_numbers<[1], [0], [0], [1], [0, 0, 1, 1], [], []>} : vector<128x256xf32>, vector<256x128xf32>, vector<128x128xf32> -> vector<128x128xf32>
    %10 = vector.broadcast %1 : vector<1x128xf32> to vector<128x128xf32>
    %11 = arith.addf %9, %10 : vector<128x128xf32>
    %cst_9 = arith.constant 0.000000e+00 : f32
    %12 = vector.broadcast %cst_9 : f32 to vector<128x128xf32>
    %13 = arith.maximumf %11, %12 : vector<128x128xf32>
    %14 = arith.maximumf %7, %13 : vector<128x128xf32>
    %c0_10 = arith.constant 0 : index
    %c0_11 = arith.constant 0 : index
    %15 = vector.load %arg3[%c0_10, %c0_11] : memref<128x256xf32, #tpu.memory_space<vmem>>, vector<128x256xf32>
    %cst_12 = arith.constant dense<0.000000e+00> : vector<128x128xf32>
    %16 = tpu.matmul %15, %0, %cst_12 {dimension_numbers = #tpu.dot_dimension_numbers<[1], [0], [0], [1], [0, 0, 1, 1], [], []>} : vector<128x256xf32>, vector<256x128xf32>, vector<128x128xf32> -> vector<128x128xf32>
    %17 = vector.broadcast %1 : vector<1x128xf32> to vector<128x128xf32>
    %18 = arith.addf %16, %17 : vector<128x128xf32>
    %cst_13 = arith.constant 0.000000e+00 : f32
    %19 = vector.broadcast %cst_13 : f32 to vector<128x128xf32>
    %20 = arith.maximumf %18, %19 : vector<128x128xf32>
    %21 = arith.maximumf %14, %20 : vector<128x128xf32>
    %c0_14 = arith.constant 0 : index
    %c0_15 = arith.constant 0 : index
    %22 = vector.load %arg4[%c0_14, %c0_15] : memref<128x256xf32, #tpu.memory_space<vmem>>, vector<128x256xf32>
    %cst_16 = arith.constant dense<0.000000e+00> : vector<128x128xf32>
    %23 = tpu.matmul %22, %0, %cst_16 {dimension_numbers = #tpu.dot_dimension_numbers<[1], [0], [0], [1], [0, 0, 1, 1], [], []>} : vector<128x256xf32>, vector<256x128xf32>, vector<128x128xf32> -> vector<128x128xf32>
    %24 = vector.broadcast %1 : vector<1x128xf32> to vector<128x128xf32>
    %25 = arith.addf %23, %24 : vector<128x128xf32>
    %cst_17 = arith.constant 0.000000e+00 : f32
    %26 = vector.broadcast %cst_17 : f32 to vector<128x128xf32>
    %27 = arith.maximumf %25, %26 : vector<128x128xf32>
    %28 = arith.maximumf %21, %27 : vector<128x128xf32>
    %c0_18 = arith.constant 0 : index
    %c0_19 = arith.constant 0 : index
    %29 = vector.load %arg7[%c0_18, %c0_19] : memref<128x128xf32, #tpu.memory_space<vmem>>, vector<128x128xf32>
    tpu.vector_store %arg7[%c0_18, %c0_19], %28 {strides = array<i32>} : memref<128x128xf32, #tpu.memory_space<vmem>>, vector<128x128xf32>,
    return
  }
  func.func @transform_0(%arg0: i32) -> (i32, i32) {
    %c0_i32 = arith.constant 0 : i32
    %c0_i32_0 = arith.constant 0 : i32
    return %arg0, %c0_i32 : i32, i32
  }
  func.func @transform_1(%arg0: i32) -> (i32, i32) {
    %c0_i32 = arith.constant 0 : i32
    %c0_i32_0 = arith.constant 0 : i32
    return %arg0, %c0_i32 : i32, i32
  }
  func.func @transform_2(%arg0: i32) -> (i32, i32) {
    %c0_i32 = arith.constant 0 : i32
    %c0_i32_0 = arith.constant 0 : i32
    return %arg0, %c0_i32 : i32, i32
  }
  func.func @transform_3(%arg0: i32) -> (i32, i32) {
    %c0_i32 = arith.constant 0 : i32
    %c0_i32_0 = arith.constant 0 : i32
    return %arg0, %c0_i32 : i32, i32
  }
  func.func @transform_4(%arg0: i32) -> (i32, i32) {
    %c0_i32 = arith.constant 0 : i32
    %c0_i32_0 = arith.constant 0 : i32
    %c0_i32_1 = arith.constant 0 : i32
    return %c0_i32, %c0_i32_0 : i32, i32
  }
  func.func @transform_5(%arg0: i32) -> (i32, i32) {
    %c0_i32 = arith.constant 0 : i32
    %c0_i32_0 = arith.constant 0 : i32
    %c0_i32_1 = arith.constant 0 : i32
    return %c0_i32, %c0_i32_0 : i32, i32
  }
  func.func @transform_6(%arg0: i32) -> (i32, i32) {
    %c0_i32 = arith.constant 0 : i32
    %c0_i32_0 = arith.constant 0 : i32
    return %arg0, %c0_i32 : i32, i32
  }
}

module attributes {stable_mosaic.version = 11 : i64} {
  func.func @mlp_kernel(%arg0: i32, %arg1: memref<2x2688xf32, #tpu.memory_space<vmem>>, %arg2: memref<2688x128xf32, #tpu.memory_space<vmem>>, %arg3: memref<1x128xf32, #tpu.memory_space<vmem>>, %arg4: memref<128x128xf32, #tpu.memory_space<vmem>>, %arg5: memref<1x128xf32, #tpu.memory_space<vmem>>, %arg6: memref<128x128xf32, #tpu.memory_space<vmem>>, %arg7: memref<1x128xf32, #tpu.memory_space<vmem>>, %arg8: memref<2x128xf32, #tpu.memory_space<vmem>>) attributes {dimension_semantics = [#tpu.dimension_semantics<parallel>], iteration_bounds = array<i64: 1>, scalar_prefetch = 0 : i64, scratch_operands = 0 : i64, tpu.core_type = #tpu.core_type<tc>, window_params = [{transform_indices = @transform_0, window_bounds = array<i64: 2, 2688>}, {pipeline_mode = #tpu.pipeline_mode<synchronous>, transform_indices = @transform_1, window_bounds = array<i64: 2688, 128>}, {pipeline_mode = #tpu.pipeline_mode<synchronous>, transform_indices = @transform_2, window_bounds = array<i64: 1, 128>}, {pipeline_mode = #tpu.pipeline_mode<synchronous>, transform_indices = @transform_3, window_bounds = array<i64: 128, 128>}, {pipeline_mode = #tpu.pipeline_mode<synchronous>, transform_indices = @transform_4, window_bounds = array<i64: 1, 128>}, {pipeline_mode = #tpu.pipeline_mode<synchronous>, transform_indices = @transform_5, window_bounds = array<i64: 128, 128>}, {pipeline_mode = #tpu.pipeline_mode<synchronous>, transform_indices = @transform_6, window_bounds = array<i64: 1, 128>}, {transform_indices = @transform_7, window_bounds = array<i64: 2, 128>}]} {
    %c0 = arith.constant 0 : index
    %c0_0 = arith.constant 0 : index
    %0 = vector.load %arg1[%c0, %c0_0] : memref<2x2688xf32, #tpu.memory_space<vmem>>, vector<2x2688xf32>
    %c0_1 = arith.constant 0 : index
    %c0_2 = arith.constant 0 : index
    %1 = vector.load %arg2[%c0_1, %c0_2] : memref<2688x128xf32, #tpu.memory_space<vmem>>, vector<2688x128xf32>
    %cst = arith.constant dense<0.000000e+00> : vector<2x128xf32>
    %2 = tpu.matmul %0, %1, %cst {dimension_numbers = #tpu.dot_dimension_numbers<[1], [0], [0], [1], [0, 0, 1, 1], [], []>} : vector<2x2688xf32>, vector<2688x128xf32>, vector<2x128xf32> -> vector<2x128xf32>
    %c0_3 = arith.constant 0 : index
    %c0_4 = arith.constant 0 : index
    %3 = vector.load %arg3[%c0_3, %c0_4] : memref<1x128xf32, #tpu.memory_space<vmem>>, vector<1x128xf32>
    %4 = vector.broadcast %3 : vector<1x128xf32> to vector<2x128xf32>
    %5 = arith.addf %2, %4 : vector<2x128xf32>
    %cst_5 = arith.constant 0.000000e+00 : f32
    %6 = vector.broadcast %cst_5 : f32 to vector<2x128xf32>
    %7 = arith.maximumf %5, %6 : vector<2x128xf32>
    %c0_6 = arith.constant 0 : index
    %c0_7 = arith.constant 0 : index
    %8 = vector.load %arg4[%c0_6, %c0_7] : memref<128x128xf32, #tpu.memory_space<vmem>>, vector<128x128xf32>
    %cst_8 = arith.constant dense<0.000000e+00> : vector<2x128xf32>
    %9 = tpu.matmul %7, %8, %cst_8 {dimension_numbers = #tpu.dot_dimension_numbers<[1], [0], [0], [1], [0, 0, 1, 1], [], []>} : vector<2x128xf32>, vector<128x128xf32>, vector<2x128xf32> -> vector<2x128xf32>
    %c0_9 = arith.constant 0 : index
    %c0_10 = arith.constant 0 : index
    %10 = vector.load %arg5[%c0_9, %c0_10] : memref<1x128xf32, #tpu.memory_space<vmem>>, vector<1x128xf32>
    %11 = vector.broadcast %10 : vector<1x128xf32> to vector<2x128xf32>
    %12 = arith.addf %9, %11 : vector<2x128xf32>
    %cst_11 = arith.constant 0.000000e+00 : f32
    %13 = vector.broadcast %cst_11 : f32 to vector<2x128xf32>
    %14 = arith.maximumf %12, %13 : vector<2x128xf32>
    %c0_12 = arith.constant 0 : index
    %c0_13 = arith.constant 0 : index
    %15 = vector.load %arg6[%c0_12, %c0_13] : memref<128x128xf32, #tpu.memory_space<vmem>>, vector<128x128xf32>
    %cst_14 = arith.constant dense<0.000000e+00> : vector<2x128xf32>
    %16 = tpu.matmul %14, %15, %cst_14 {dimension_numbers = #tpu.dot_dimension_numbers<[1], [0], [0], [1], [0, 0, 1, 1], [], []>} : vector<2x128xf32>, vector<128x128xf32>, vector<2x128xf32> -> vector<2x128xf32>
    %c0_15 = arith.constant 0 : index
    %c0_16 = arith.constant 0 : index
    %17 = vector.load %arg7[%c0_15, %c0_16] : memref<1x128xf32, #tpu.memory_space<vmem>>, vector<1x128xf32>
    %18 = vector.broadcast %17 : vector<1x128xf32> to vector<2x128xf32>
    %19 = arith.addf %16, %18 : vector<2x128xf32>
    %c0_17 = arith.constant 0 : index
    %c0_18 = arith.constant 0 : index
    %20 = vector.load %arg8[%c0_17, %c0_18] : memref<2x128xf32, #tpu.memory_space<vmem>>, vector<2x128xf32>
    tpu.vector_store %arg8[%c0_17, %c0_18], %19 {strides = array<i32>} : memref<2x128xf32, #tpu.memory_space<vmem>>, vector<2x128xf32>,
    return
  }
  func.func @transform_0(%arg0: i32) -> (i32, i32) {
    %c0_i32 = arith.constant 0 : i32
    %c0_i32_0 = arith.constant 0 : i32
    return %arg0, %c0_i32 : i32, i32
  }
  func.func @transform_1(%arg0: i32) -> (i32, i32) {
    %c0_i32 = arith.constant 0 : i32
    %c0_i32_0 = arith.constant 0 : i32
    %c0_i32_1 = arith.constant 0 : i32
    return %c0_i32, %c0_i32_0 : i32, i32
  }
  func.func @transform_2(%arg0: i32) -> (i32, i32) {
    %c0_i32 = arith.constant 0 : i32
    %c0_i32_0 = arith.constant 0 : i32
    %c0_i32_1 = arith.constant 0 : i32
    return %c0_i32, %c0_i32_0 : i32, i32
  }
  func.func @transform_3(%arg0: i32) -> (i32, i32) {
    %c0_i32 = arith.constant 0 : i32
    %c0_i32_0 = arith.constant 0 : i32
    %c0_i32_1 = arith.constant 0 : i32
    return %c0_i32, %c0_i32_0 : i32, i32
  }
  func.func @transform_4(%arg0: i32) -> (i32, i32) {
    %c0_i32 = arith.constant 0 : i32
    %c0_i32_0 = arith.constant 0 : i32
    %c0_i32_1 = arith.constant 0 : i32
    return %c0_i32, %c0_i32_0 : i32, i32
  }
  func.func @transform_5(%arg0: i32) -> (i32, i32) {
    %c0_i32 = arith.constant 0 : i32
    %c0_i32_0 = arith.constant 0 : i32
    %c0_i32_1 = arith.constant 0 : i32
    return %c0_i32, %c0_i32_0 : i32, i32
  }
  func.func @transform_6(%arg0: i32) -> (i32, i32) {
    %c0_i32 = arith.constant 0 : i32
    %c0_i32_0 = arith.constant 0 : i32
    %c0_i32_1 = arith.constant 0 : i32
    return %c0_i32, %c0_i32_0 : i32, i32
  }
  func.func @transform_7(%arg0: i32) -> (i32, i32) {
    %c0_i32 = arith.constant 0 : i32
    %c0_i32_0 = arith.constant 0 : i32
    return %arg0, %c0_i32 : i32, i32
  }
}

</mosaic_0001>

<bundles_post_ra>
// kernel: cnn_forward.3
= control target key start
LH: loop header
LB: loop body
LE: loop exit
PB: predicated region body
PF: predicated region fallthrough
CT: control target
= control target key end

     0   :  { %s2103_s21 = smov 0   ;;  %s2105_s22 = smov 0   ;;  %s2674_s0 = inlined_call_operand.vmem [shape: f32[968,128], index: 0, kind: input, shape index: {}]   ;;  %s2675_s1 = inlined_call_operand.vmem [shape: f32[968,128], index: 1, kind: input, shape index: {}]   ;;  %s2676_s2 = inlined_call_operand.vmem [shape: f32[968,128], index: 2, kind: input, shape index: {}]   ;;  %s2677_s3 = inlined_call_operand.vmem [shape: f32[968,128], index: 3, kind: input, shape index: {}]   ;;  %s2678_s4 = inlined_call_operand.vmem [shape: f32[128,128], index: 4, kind: input, shape index: {}]   ;;  %s2679_s5 = inlined_call_operand.vmem [shape: f32[1,128], index: 5, kind: input, shape index: {}]   ;;  %s2680_s6 = inlined_call_operand.vmem [shape: f32[968,128], index: 6, kind: output, shape index: {}]  }
   0x1   :  { %s2107_s23 = smov 0  }
   0x2 LB: > { %s2116_s24 = sadd.s32 4294967295, %s2034_s23   ;;  %s2118_s25 = sadd.s32 1, %s2034_s23   ;;  %s2034_s23 = sphi %s2107_s23, %s2687_s23   ;;  %s2030_s22 = sphi %s2105_s22, %s2686_s22   ;;  %s2026_s21 = sphi %s2103_s21, %s2685_s21  }
   0x3   : > { %s166_s26 = ssub.s32 %s2034_s23, %s2118_s25  ;;  %s169_s27 = sadd.s32 1, %s2030_s22 }
   0x4   : > { %p167_p0 = scmp.eq.s32.totalorder %s166_s26, 0  ;;  %p179_p1 = scmp.ne.s32.totalorder %s2030_s22, %s2026_s21 }
   0x5   : > { %p180_p2 = scmp.eq.s32.totalorder %s2116_s24, 7  ;;  %p1509_p3 = scmp.ge.s32.totalorder %s2034_s23, 1 }
   0x6   : > { %s2126_s28 = scalar_select %p167_p0, %s2030_s22, %s169_s27  }
   0x7   : > { %p2128_p4 = por %p180_p2, %p179_p1  ;;  %p278_p5 = scmp.lt.s32.totalorder %s2034_s23, 9 }
   0x9   : > { %p279_p6 = pnand %p1509_p3, %p278_p5 }
   0xa   : > { %s2197_s26 = sshll.u32 (!%p279_p6), %s2116_s24, 4  ;;  %s335_s20 = sand.u32 (!%p279_p6), 1, %s2026_s21  }
   0xb   : > { %282 = sbr.rel (%p279_p6) target bundleno = 371 (0x173), region = 44  ;;  %p343_p7 = scmp.lt.s32.totalorder (!%p279_p6), %s2197_s26, 120 }
   0xc   : > { %s1510_s23 = sshll.u32 (!%p279_p6), %s335_s20, 7 }
   0xd   : > { %s2504_s21 = scalar_lea.vmem (!%p279_p6), [#allocation2], %s1510_s23  }
  0x10   : > { %v2135_v0 = vld [vmem:[%s2678_s4 + $0x78] sm:$0xff]  ;;  %v2140_v1 = vld [vmem:[%s2678_s4 + $0x70] sm:$0xff]  ;;  %v2149_v2 = vld [vmem:[%s2678_s4 + $0x68] sm:$0xff]  ;;  %s344_s11 = scalar_select %p343_p7, %s2197_s26, 120 }
  0x11   : > { %1668 = vmatprep.subr.mxu0 %v2135_v0  ;;  %1724 = vmatprep.subr.mxu1 %v2135_v0  ;;  %v2158_v3 = vld [vmem:[%s2678_s4 + $0x60] sm:$0xff]  ;;  %v2167_v4 = vld [vmem:[%s2678_s4 + $0x58] sm:$0xff]  ;;  %v2176_v5 = vld [vmem:[%s2678_s4 + $0x50] sm:$0xff]  ;;  %s1202_s27 = ssub.s32 (%p2128_p4), 121, %s2197_s26 }
  0x12   : > { %1669 = vmatpush3.msra.mxu0 %v2135_v0  ;;  %1725 = vmatpush3.msra.mxu1 %v2135_v0  ;;  %v2185_v6 = vld [vmem:[%s2678_s4 + $0x48] sm:$0xff]  ;;  %v2194_v7 = vld [vmem:[%s2678_s4 + $0x40] sm:$0xff]  ;;  %v2206_v8 = vld [vmem:[%s2678_s4 + $0x38] sm:$0xff]  ;;  %s2248_s16 = sshll.u32 %s344_s11, 3  ;;  %p1203_p8 = scmp.lt.s32.totalorder (%p2128_p4), %s1202_s27, 16 }
  0x13   : > { %1670 = vmatprep.subr.mxu0 %v2140_v1  ;;  %1726 = vmatprep.subr.mxu1 %v2140_v1  ;;  %v2216_v9 = vld [vmem:[%s2678_s4 + $0x30] sm:$0xff]  ;;  %v2225_v10 = vld [vmem:[%s2678_s4 + $0x28] sm:$0xff]  ;;  %v2235_v11 = vld [vmem:[%s2678_s4 + $0x20] sm:$0xff]  ;;  %s2270_s30 = scalar_lea.vmem %s2674_s0, %s2248_s16  ;;  %s2278_s9 = scalar_lea.vmem %s2675_s1, %s2248_s16 }
  0x14   : > { %1671 = vmatpush3.msra.mxu0 %v2140_v1  ;;  %1727 = vmatpush3.msra.mxu1 %v2140_v1  ;;  %v2244_v12 = vld [vmem:[%s2678_s4 + $0x18] sm:$0xff]  ;;  %v2255_v13 = vld [vmem:[%s2678_s4 + $0x10] sm:$0xff]  ;;  %v2264_v14 = vld [vmem:[%s2678_s4 + $0x8] sm:$0xff]  ;;  %s2385_s14 = scalar_lea.vmem %s2676_s2, %s2248_s16  ;;  %s2393_s18 = scalar_lea.vmem %s2677_s3, %s2248_s16 }
  0x15   : > { %1672 = vmatprep.subr.mxu0 %v2149_v2  ;;  %1728 = vmatprep.subr.mxu1 %v2149_v2  ;;  %v2285_v15 = vld [vmem:[%s2678_s4] sm:$0xff]  ;;  %v417_v18 = vld [vmem:[%s2270_s30 + $0x8] sm:$0xff]  ;;  %v418_v20 = vld [vmem:[%s2270_s30 + $0x10] sm:$0xff] }
  0x16   : > { %1673 = vmatpush3.msra.mxu0 %v2149_v2  ;;  %1729 = vmatpush3.msra.mxu1 %v2149_v2  ;;  %v416_v16 = vld [vmem:[%s2270_s30] sm:$0xff]  ;;  %v600_v19 = vld [vmem:[%s2278_s9 + $0x8] sm:$0xff]  ;;  %v601_v21 = vld [vmem:[%s2278_s9 + $0x10] sm:$0xff] }
  0x17   : > { %1674 = vmatprep.subr.mxu0 %v2158_v3  ;;  %1730 = vmatprep.subr.mxu1 %v2158_v3  ;;  %v599_v17 = vld [vmem:[%s2278_s9] sm:$0xff]  ;;  %v419_v22 = vld [vmem:[%s2270_s30 + $0x18] sm:$0xff]  ;;  %v421_v26 = vld [vmem:[%s2270_s30 + $0x28] sm:$0xff] }
  0x18   : > { %1675 = vmatpush3.msra.mxu0 %v2158_v3  ;;  %1731 = vmatpush3.msra.mxu1 %v2158_v3  ;;  %v602_v23 = vld [vmem:[%s2278_s9 + $0x18] sm:$0xff]  ;;  %v420_v24 = vld [vmem:[%s2270_s30 + $0x20] sm:$0xff]  ;;  %v604_v27 = vld [vmem:[%s2278_s9 + $0x28] sm:$0xff] }
  0x19   : > { %1676 = vmatprep.subr.mxu0 %v2167_v4  ;;  %1732 = vmatprep.subr.mxu1 %v2167_v4  ;;  %v603_v25 = vld [vmem:[%s2278_s9 + $0x20] sm:$0xff]  ;;  %v422_v28 = vld [vmem:[%s2270_s30 + $0x30] sm:$0xff]  ;;  %v423_v30 = vld [vmem:[%s2270_s30 + $0x38] sm:$0xff] }
  0x1a   : > { %1677 = vmatpush3.msra.mxu0 %v2167_v4  ;;  %1733 = vmatpush3.msra.mxu1 %v2167_v4  ;;  %v605_v29 = vld [vmem:[%s2278_s9 + $0x30] sm:$0xff]  ;;  %v606_v31 = vld [vmem:[%s2278_s9 + $0x38] sm:$0xff]  ;;  %v424_v32 = vld [vmem:[%s2270_s30 + $0x40] sm:$0xff] }
  0x1b   : > { %1678 = vmatprep.subr.mxu0 %v2176_v5  ;;  %1734 = vmatprep.subr.mxu1 %v2176_v5  ;;  %v607_v33 = vld [vmem:[%s2278_s9 + $0x40] sm:$0xff]  ;;  %v425_v34 = vld [vmem:[%s2270_s30 + $0x48] sm:$0xff]  ;;  %v426_v36 = vld [vmem:[%s2270_s30 + $0x50] sm:$0xff] }
  0x1c   : > { %1679 = vmatpush3.msra.mxu0 %v2176_v5  ;;  %1735 = vmatpush3.msra.mxu1 %v2176_v5  ;;  %v608_v35 = vld [vmem:[%s2278_s9 + $0x48] sm:$0xff]  ;;  %v609_v37 = vld [vmem:[%s2278_s9 + $0x50] sm:$0xff]  ;;  %v427_v38 = vld [vmem:[%s2270_s30 + $0x58] sm:$0xff] }
  0x1d   : > { %1680 = vmatprep.subr.mxu0 %v2185_v6  ;;  %1736 = vmatprep.subr.mxu1 %v2185_v6  ;;  %v610_v39 = vld [vmem:[%s2278_s9 + $0x58] sm:$0xff]  ;;  %v428_v40 = vld [vmem:[%s2270_s30 + $0x60] sm:$0xff]  ;;  %v429_v42 = vld [vmem:[%s2270_s30 + $0x68] sm:$0xff] }
  0x1e   : > { %1681 = vmatpush3.msra.mxu0 %v2185_v6  ;;  %1737 = vmatpush3.msra.mxu1 %v2185_v6  ;;  %v611_v41 = vld [vmem:[%s2278_s9 + $0x60] sm:$0xff]  ;;  %v612_v43 = vld [vmem:[%s2278_s9 + $0x68] sm:$0xff]  ;;  %v430_v44 = vld [vmem:[%s2270_s30 + $0x70] sm:$0xff] }
  0x1f   : > { %1682 = vmatprep.subr.mxu0 %v2194_v7  ;;  %1738 = vmatprep.subr.mxu1 %v2194_v7  ;;  %v613_v45 = vld [vmem:[%s2278_s9 + $0x70] sm:$0xff]  ;;  %v431_v46 = vld [vmem:[%s2270_s30 + $0x78] sm:$0xff]  ;;  %v792_v48 = vld [vmem:[%s2385_s14] sm:$0xff]  ;;  %s1537_s30 = sshll.u32 (%p2128_p4), %s2116_s24, 7 }
  0x20   : > { %1683 = vmatpush3.msra.mxu0 %v2194_v7  ;;  %1739 = vmatpush3.msra.mxu1 %v2194_v7  ;;  %v614_v47 = vld [vmem:[%s2278_s9 + $0x78] sm:$0xff]  ;;  %v793_v49 = vld [vmem:[%s2385_s14 + $0x8] sm:$0xff]  ;;  %v985_v50 = vld [vmem:[%s2393_s18] sm:$0xff]  ;;  %s2581_s9 = scalar_lea.vmem (%p2128_p4), %s2680_s6, %s1537_s30  }
  0x21   : > { %1684 = vmatprep.subr.mxu0 %v2206_v8  ;;  %1740 = vmatprep.subr.mxu1 %v2206_v8  ;;  %v794_v51 = vld [vmem:[%s2385_s14 + $0x10] sm:$0xff]  ;;  %v986_v52 = vld [vmem:[%s2393_s18 + $0x8] sm:$0xff]  ;;  %v795_v54 = vld [vmem:[%s2385_s14 + $0x18] sm:$0xff] }
  0x22   : > { %1685 = vmatpush3.msra.mxu0 %v2206_v8  ;;  %1741 = vmatpush3.msra.mxu1 %v2206_v8  ;;  %v987_v53 = vld [vmem:[%s2393_s18 + $0x10] sm:$0xff]  ;;  %v796_v55 = vld [vmem:[%s2385_s14 + $0x20] sm:$0xff]  ;;  %v988_v56 = vld [vmem:[%s2393_s18 + $0x18] sm:$0xff] }
  0x23   : > { %1686 = vmatprep.subr.mxu0 %v2216_v9  ;;  %1742 = vmatprep.subr.mxu1 %v2216_v9  ;;  %v989_v57 = vld [vmem:[%s2393_s18 + $0x20] sm:$0xff]  ;;  %v797_v58 = vld [vmem:[%s2385_s14 + $0x28] sm:$0xff]  ;;  %v798_v59 = vld [vmem:[%s2385_s14 + $0x30] sm:$0xff] }
  0x24   : > { %1687 = vmatpush3.msra.mxu0 %v2216_v9  ;;  %1743 = vmatpush3.msra.mxu1 %v2216_v9  ;;  %v990_v60 = vld [vmem:[%s2393_s18 + $0x28] sm:$0xff]  ;;  %v991_v61 = vld [vmem:[%s2393_s18 + $0x30] sm:$0xff]  ;;  %v799_v62 = vld [vmem:[%s2385_s14 + $0x38] sm:$0xff] }
  0x25   : > { %1688 = vmatprep.subr.mxu0 %v2225_v10  ;;  %1744 = vmatprep.subr.mxu1 %v2225_v10  ;;  %v800_v63 = vld [vmem:[%s2385_s14 + $0x40] sm:$0xff] }
  0x26   : > { %1689 = vmatpush3.msra.mxu0 %v2225_v10  ;;  %1745 = vmatpush3.msra.mxu1 %v2225_v10 }
  0x27   : > { %1690 = vmatprep.subr.mxu0 %v2235_v11  ;;  %1746 = vmatprep.subr.mxu1 %v2235_v11 }
  0x28   : > { %1691 = vmatpush3.msra.mxu0 %v2235_v11  ;;  %1747 = vmatpush3.msra.mxu1 %v2235_v11 }
  0x29   : > { %1692 = vmatprep.subr.mxu0 %v2244_v12  ;;  %1748 = vmatprep.subr.mxu1 %v2244_v12 }
  0x2a   : > { %1693 = vmatpush3.msra.mxu0 %v2244_v12  ;;  %1749 = vmatpush3.msra.mxu1 %v2244_v12 }
  0x2b   : > { %1694 = vmatprep.subr.mxu0 %v2255_v13  ;;  %1750 = vmatprep.subr.mxu1 %v2255_v13 }
  0x2c   : > { %1695 = vmatpush3.msra.mxu0 %v2255_v13  ;;  %1751 = vmatpush3.msra.mxu1 %v2255_v13 }
  0x2d   : > { %1696 = vmatprep.subr.mxu0 %v2264_v14  ;;  %1752 = vmatprep.subr.mxu1 %v2264_v14 }
  0x2e   : > { %1697 = vmatpush3.msra.mxu0 %v2264_v14  ;;  %1753 = vmatpush3.msra.mxu1 %v2264_v14 }
  0x2f   : > { %1698 = vmatprep.subr.mxu0 %v2285_v15  ;;  %1754 = vmatprep.subr.mxu1 %v2285_v15 }
  0x30   : > { %1699 = vmatpush3.msra.mxu0 %v2285_v15  ;;  %1700 = vmatprep.mubr.f32.mxu0 %v416_v16 }
  0x31   : > { %1755 = vmatpush3.msra.mxu1 %v2285_v15  ;;  %1756 = vmatprep.mubr.f32.mxu1 %v599_v17 }
  0x32   : > { %1701 = vmatmul.mubr.f32.vlgmr.msra.gmra.mxu0 %v417_v18  ;;  %1757 = vmatmul.mubr.f32.vlgmr.msra.gmra.mxu1 %v600_v19 }
  0x33   : > { %1780 = vmatprep.subr.mxu0 %v2135_v0  ;;  %1836 = vmatprep.subr.mxu1 %v2135_v0 }
  0x34   : > { %1781 = vmatpush3.msra.mxu0 %v2135_v0  ;;  %1837 = vmatpush3.msra.mxu1 %v2135_v0  ;;  %v992_v0 = vld [vmem:[%s2393_s18 + $0x38] sm:$0xff] }
  0x35   : > { %1782 = vmatprep.subr.mxu0 %v2140_v1  ;;  %1703 = vmatprep.mubr.f32.mxu0 %v418_v20 }
  0x36   : > { %1759 = vmatprep.mubr.f32.mxu1 %v601_v21  ;;  %1783 = vmatpush3.msra.mxu0 %v2140_v1 }
  0x37   : > { %1838 = vmatprep.subr.mxu1 %v2140_v1  ;;  %1704 = vmatmul.mubr.f32.gmra.mxu0 %v419_v22 }
  0x38   : > { %1760 = vmatmul.mubr.f32.gmra.mxu1 %v602_v23  ;;  %1784 = vmatprep.subr.mxu0 %v2149_v2 }
  0x39   : > { %1839 = vmatpush3.msra.mxu1 %v2140_v1  ;;  %1785 = vmatpush3.msra.mxu0 %v2149_v2  ;;  %v993_v1 = vld [vmem:[%s2393_s18 + $0x40] sm:$0xff] }
  0x3a   : > { %1840 = vmatprep.subr.mxu1 %v2149_v2  ;;  %1786 = vmatprep.subr.mxu0 %v2158_v3 }
  0x3b   : > { %1841 = vmatpush3.msra.mxu1 %v2149_v2  ;;  %1706 = vmatprep.mubr.f32.mxu0 %v420_v24  ;;  %v801_v2 = vld [vmem:[%s2385_s14 + $0x48] sm:$0xff] }
  0x3c   : > { %1762 = vmatprep.mubr.f32.mxu1 %v603_v25  ;;  %1787 = vmatpush3.msra.mxu0 %v2158_v3 }
  0x3d   : > { %1842 = vmatprep.subr.mxu1 %v2158_v3  ;;  %1707 = vmatmul.mubr.f32.gmra.mxu0 %v421_v26 }
  0x3e   : > { %1763 = vmatmul.mubr.f32.gmra.mxu1 %v604_v27  ;;  %1788 = vmatprep.subr.mxu0 %v2167_v4 }
  0x3f   : > { %1843 = vmatpush3.msra.mxu1 %v2158_v3  ;;  %1789 = vmatpush3.msra.mxu0 %v2167_v4  ;;  %v802_v3 = vld [vmem:[%s2385_s14 + $0x50] sm:$0xff] }
  0x40   : > { %1844 = vmatprep.subr.mxu1 %v2167_v4  ;;  %1790 = vmatprep.subr.mxu0 %v2176_v5 }
  0x41   : > { %1845 = vmatpush3.msra.mxu1 %v2167_v4  ;;  %1709 = vmatprep.mubr.f32.mxu0 %v422_v28  ;;  %v994_v4 = vld [vmem:[%s2393_s18 + $0x48] sm:$0xff] }
  0x42   : > { %1765 = vmatprep.mubr.f32.mxu1 %v605_v29  ;;  %1791 = vmatpush3.msra.mxu0 %v2176_v5 }
  0x43   : > { %1846 = vmatprep.subr.mxu1 %v2176_v5  ;;  %1710 = vmatmul.mubr.f32.gmra.mxu0 %v423_v30 }
  0x44   : > { %1766 = vmatmul.mubr.f32.gmra.mxu1 %v606_v31  ;;  %1792 = vmatprep.subr.mxu0 %v2185_v6 }
  0x45   : > { %1847 = vmatpush3.msra.mxu1 %v2176_v5  ;;  %1793 = vmatpush3.msra.mxu0 %v2185_v6  ;;  %v995_v5 = vld [vmem:[%s2393_s18 + $0x50] sm:$0xff] }
  0x46   : > { %1848 = vmatprep.subr.mxu1 %v2185_v6  ;;  %1794 = vmatprep.subr.mxu0 %v2194_v7 }
  0x47   : > { %1849 = vmatpush3.msra.mxu1 %v2185_v6  ;;  %1712 = vmatprep.mubr.f32.mxu0 %v424_v32  ;;  %v803_v6 = vld [vmem:[%s2385_s14 + $0x58] sm:$0xff] }
  0x48   : > { %1768 = vmatprep.mubr.f32.mxu1 %v607_v33  ;;  %1795 = vmatpush3.msra.mxu0 %v2194_v7 }
  0x49   : > { %1850 = vmatprep.subr.mxu1 %v2194_v7  ;;  %1713 = vmatmul.mubr.f32.gmra.mxu0 %v425_v34 }
  0x4a   : > { %1769 = vmatmul.mubr.f32.gmra.mxu1 %v608_v35  ;;  %1796 = vmatprep.subr.mxu0 %v2206_v8 }
  0x4b   : > { %1851 = vmatpush3.msra.mxu1 %v2194_v7  ;;  %1797 = vmatpush3.msra.mxu0 %v2206_v8  ;;  %v804_v7 = vld [vmem:[%s2385_s14 + $0x60] sm:$0xff] }
  0x4c   : > { %1852 = vmatprep.subr.mxu1 %v2206_v8  ;;  %1798 = vmatprep.subr.mxu0 %v2216_v9 }
  0x4d   : > { %1853 = vmatpush3.msra.mxu1 %v2206_v8  ;;  %1715 = vmatprep.mubr.f32.mxu0 %v426_v36  ;;  %v996_v8 = vld [vmem:[%s2393_s18 + $0x58] sm:$0xff] }
  0x4e   : > { %1771 = vmatprep.mubr.f32.mxu1 %v609_v37  ;;  %1799 = vmatpush3.msra.mxu0 %v2216_v9 }
  0x4f   : > { %1854 = vmatprep.subr.mxu1 %v2216_v9  ;;  %1716 = vmatmul.mubr.f32.gmra.mxu0 %v427_v38 }
  0x50   : > { %1772 = vmatmul.mubr.f32.gmra.mxu1 %v610_v39  ;;  %1800 = vmatprep.subr.mxu0 %v2225_v10 }
  0x51   : > { %1855 = vmatpush3.msra.mxu1 %v2216_v9  ;;  %1801 = vmatpush3.msra.mxu0 %v2225_v10  ;;  %v997_v9 = vld [vmem:[%s2393_s18 + $0x60] sm:$0xff] }
  0x52   : > { %1856 = vmatprep.subr.mxu1 %v2225_v10  ;;  %1802 = vmatprep.subr.mxu0 %v2235_v11 }
  0x53   : > { %1857 = vmatpush3.msra.mxu1 %v2225_v10  ;;  %1718 = vmatprep.mubr.f32.mxu0 %v428_v40  ;;  %v805_v10 = vld [vmem:[%s2385_s14 + $0x68] sm:$0xff]  ;;  %v2442_v40 = vld [vmem:[%s2679_s5] ss:$0 sm:$0xff] }
  0x54   : > { %1774 = vmatprep.mubr.f32.mxu1 %v611_v41  ;;  %1803 = vmatpush3.msra.mxu0 %v2235_v11 }
  0x55   : > { %1858 = vmatprep.subr.mxu1 %v2235_v11  ;;  %1719 = vmatmul.mubr.f32.gmra.mxu0 %v429_v42 }
  0x56   : > { %1775 = vmatmul.mubr.f32.gmra.mxu1 %v612_v43  ;;  %1804 = vmatprep.subr.mxu0 %v2244_v12 }
  0x57   : > { %1859 = vmatpush3.msra.mxu1 %v2235_v11  ;;  %1805 = vmatpush3.msra.mxu0 %v2244_v12  ;;  %v806_v11 = vld [vmem:[%s2385_s14 + $0x70] sm:$0xff] }
  0x58   : > { %1860 = vmatprep.subr.mxu1 %v2244_v12  ;;  %1806 = vmatprep.subr.mxu0 %v2255_v13 }
  0x59   : > { %1861 = vmatpush3.msra.mxu1 %v2244_v12  ;;  %1721 = vmatprep.mubr.f32.mxu0 %v430_v44  ;;  %v998_v12 = vld [vmem:[%s2393_s18 + $0x68] sm:$0xff] }
  0x5a   : > { %1777 = vmatprep.mubr.f32.mxu1 %v613_v45  ;;  %1807 = vmatpush3.msra.mxu0 %v2255_v13 }
  0x5b   : > { %1862 = vmatprep.subr.mxu1 %v2255_v13  ;;  %1722 = vmatmul.mubr.f32.gmra.mxu0 %v431_v46 }
  0x5c   : > { %1778 = vmatmul.mubr.f32.gmra.mxu1 %v614_v47  ;;  %1808 = vmatprep.subr.mxu0 %v2264_v14 }
  0x5d   : > { %1863 = vmatpush3.msra.mxu1 %v2255_v13  ;;  %1809 = vmatpush3.msra.mxu0 %v2264_v14  ;;  %v999_v13 = vld [vmem:[%s2393_s18 + $0x70] sm:$0xff] }
  0x5e   : > { %1864 = vmatprep.subr.mxu1 %v2264_v14  ;;  %1810 = vmatprep.subr.mxu0 %v2285_v15 }
  0x5f   : > { %1865 = vmatpush3.msra.mxu1 %v2264_v14  ;;  %1811 = vmatpush3.msra.mxu0 %v2285_v15  ;;  %v807_v14 = vld [vmem:[%s2385_s14 + $0x78] sm:$0xff] }
  0x60   : > { %1812 = vmatprep.mubr.f32.mxu0 %v792_v48  ;;  %1866 = vmatprep.subr.mxu1 %v2285_v15 }
  0x61   : > { %1813 = vmatmul.mubr.f32.vlgmr.msra.gmra.mxu0 %v793_v49  ;;  %1867 = vmatpush3.msra.mxu1 %v2285_v15  ;;  %v1000_v15 = vld [vmem:[%s2393_s18 + $0x78] sm:$0xff] }
  0x62   : > { %1868 = vmatprep.mubr.f32.mxu1 %v985_v50  ;;  %1815 = vmatprep.mubr.f32.mxu0 %v794_v51 }
  0x63   : > { %1869 = vmatmul.mubr.f32.vlgmr.msra.gmra.mxu1 %v986_v52 }
  0x64   : > { %1871 = vmatprep.mubr.f32.mxu1 %v987_v53 }
  0x65   : > { %1816 = vmatmul.mubr.f32.gmra.mxu0 %v795_v54 }
  0x66   : > { %1818 = vmatprep.mubr.f32.mxu0 %v796_v55 }
  0x67   : > { %1872 = vmatmul.mubr.f32.gmra.mxu1 %v988_v56 }
  0x68   : > { %1874 = vmatprep.mubr.f32.mxu1 %v989_v57 }
  0x69   : > { %1819 = vmatmul.mubr.f32.gmra.mxu0 %v797_v58 }
  0x6a   : > { %1821 = vmatprep.mubr.f32.mxu0 %v798_v59 }
  0x6b   : > { %1875 = vmatmul.mubr.f32.gmra.mxu1 %v990_v60 }
  0x6c   : > { %1877 = vmatprep.mubr.f32.mxu1 %v991_v61 }
  0x6d   : > { %1822 = vmatmul.mubr.f32.gmra.mxu0 %v799_v62 }
  0x6e   : > { %1824 = vmatprep.mubr.f32.mxu0 %v800_v63 }
  0x6f   : > { %1878 = vmatmul.mubr.f32.gmra.mxu1 %v992_v0 }
  0x70   : > { %1880 = vmatprep.mubr.f32.mxu1 %v993_v1 }
  0x71   : > { %1825 = vmatmul.mubr.f32.gmra.mxu0 %v801_v2 }
  0x72   : > { %1827 = vmatprep.mubr.f32.mxu0 %v802_v3 }
  0x73   : > { %1881 = vmatmul.mubr.f32.gmra.mxu1 %v994_v4 }
  0x74   : > { %1883 = vmatprep.mubr.f32.mxu1 %v995_v5 }
  0x75   : > { %1828 = vmatmul.mubr.f32.gmra.mxu0 %v803_v6 }
  0x76   : > { %1830 = vmatprep.mubr.f32.mxu0 %v804_v7 }
  0x77   : > { %1884 = vmatmul.mubr.f32.gmra.mxu1 %v996_v8 }
  0x78   : > { %1886 = vmatprep.mubr.f32.mxu1 %v997_v9 }
  0x79   : > { %1831 = vmatmul.mubr.f32.gmra.mxu0 %v805_v10 }
  0x7a   : > { %1833 = vmatprep.mubr.f32.mxu0 %v806_v11 }
  0x7b   : > { %1887 = vmatmul.mubr.f32.gmra.mxu1 %v998_v12 }
  0x7c   : > { %1889 = vmatprep.mubr.f32.mxu1 %v999_v13 }
  0x7d   : > { %1834 = vmatmul.mubr.f32.gmra.mxu0 %v807_v14 }
  0x7f   : > { %1890 = vmatmul.mubr.f32.gmra.mxu1 %v1000_v15 }
  0xf2   : > { %v1702_v16 = vpop.f32.mrf.mxu0  ;;  %v1758_v17 = vpop.f32.mrf.mxu1 }
  0xf3   : > { %v510_v44 = vadd.f32 %v1702_v16, %v2442_v40  ;;  %v687_v45 = vadd.f32 %v1758_v17, %v2442_v40 }
  0xf4   : > { %v504_v18 = vpop.f32.mrf.mxu0  ;;  %v681_v19 = vpop.f32.mrf.mxu1 }
  0xf5   : > { %v505_v46 = vadd.f32 %v2442_v40, %v504_v18  ;;  %v682_v47 = vadd.f32 %v2442_v40, %v681_v19  ;;  %v584_v62 = vmax.f32 %v510_v44, 0.0  ;;  %v761_v63 = vmax.f32 %v687_v45, 0.0 }
  0xf7   : > { %v1705_v20 = vpop.f32.mrf.mxu0  ;;  %v583_v0 = vmax.f32 %v505_v46, 0.0  ;;  %v760_v1 = vmax.f32 %v682_v47, 0.0  ;;  %v777_v17 = vmax.f32 %v584_v62, %v761_v63 }
  0xf8   : > { %v1761_v21 = vpop.f32.mrf.mxu1  ;;  %v520_v49 = vadd.f32 %v1705_v20, %v2442_v40 }
  0xf9   : > { %v514_v22 = vpop.f32.mrf.mxu0  ;;  %v697_v50 = vadd.f32 %v1761_v21, %v2442_v40  ;;  %v776_v18 = vmax.f32 %v583_v0, %v760_v1 }
  0xfa   : > { %v691_v23 = vpop.f32.mrf.mxu1  ;;  %v515_v51 = vadd.f32 %v2442_v40, %v514_v22  ;;  %v586_v3 = vmax.f32 %v520_v49, 0.0 }
  0xfb   : > { %v692_v52 = vadd.f32 %v2442_v40, %v691_v23  ;;  %v763_v4 = vmax.f32 %v697_v50, 0.0 }
  0xfc   : > { %v585_v5 = vmax.f32 %v515_v51, 0.0 }
  0xfd   : > { %v1708_v24 = vpop.f32.mrf.mxu0  ;;  %v762_v6 = vmax.f32 %v692_v52, 0.0 }
  0xfe   : > { %v1764_v25 = vpop.f32.mrf.mxu1  ;;  %v530_v53 = vadd.f32 %v1708_v24, %v2442_v40 }
  0xff   : > { %v524_v26 = vpop.f32.mrf.mxu0  ;;  %v707_v54 = vadd.f32 %v1764_v25, %v2442_v40  ;;  %v779_v25 = vmax.f32 %v586_v3, %v763_v4 }
 0x100   : > { %v701_v27 = vpop.f32.mrf.mxu1  ;;  %v525_v55 = vadd.f32 %v2442_v40, %v524_v26  ;;  %v588_v8 = vmax.f32 %v530_v53, 0.0  ;;  %v778_v26 = vmax.f32 %v585_v5, %v762_v6 }
 0x101   : > { %v702_v56 = vadd.f32 %v2442_v40, %v701_v27  ;;  %v765_v9 = vmax.f32 %v707_v54, 0.0 }
 0x102   : > { %v587_v10 = vmax.f32 %v525_v55, 0.0 }
 0x103   : > { %v1711_v28 = vpop.f32.mrf.mxu0  ;;  %v764_v11 = vmax.f32 %v702_v56, 0.0  ;;  %v781_v27 = vmax.f32 %v588_v8, %v765_v9 }
 0x104   : > { %v1767_v29 = vpop.f32.mrf.mxu1  ;;  %v540_v57 = vadd.f32 %v1711_v28, %v2442_v40 }
 0x105   : > { %v534_v30 = vpop.f32.mrf.mxu0  ;;  %v717_v58 = vadd.f32 %v1767_v29, %v2442_v40  ;;  %v2483_v29 = vmax.f32 %v587_v10, %v764_v11 }
 0x106   : > { %v711_v31 = vpop.f32.mrf.mxu1  ;;  %v535_v59 = vadd.f32 %v2442_v40, %v534_v30  ;;  %v590_v12 = vmax.f32 %v540_v57, 0.0 }
 0x107   : > { %v712_v60 = vadd.f32 %v2442_v40, %v711_v31  ;;  %v767_v13 = vmax.f32 %v717_v58, 0.0 }
 0x108   : > { %v589_v14 = vmax.f32 %v535_v59, 0.0 }
 0x109   : > { %v1714_v32 = vpop.f32.mrf.mxu0  ;;  %v766_v15 = vmax.f32 %v712_v60, 0.0  ;;  %v2485_v30 = vmax.f32 %v590_v12, %v767_v13 }
 0x10a   : > { %v1770_v33 = vpop.f32.mrf.mxu1  ;;  %v550_v19 = vadd.f32 %v1714_v32, %v2442_v40 }
 0x10b   : > { %v544_v34 = vpop.f32.mrf.mxu0  ;;  %v727_v20 = vadd.f32 %v1770_v33, %v2442_v40  ;;  %v2487_v31 = vmax.f32 %v589_v14, %v766_v15 }
 0x10c   : > { %v721_v35 = vpop.f32.mrf.mxu1  ;;  %v545_v21 = vadd.f32 %v2442_v40, %v544_v34 }
 0x10d   : > { %v722_v22 = vadd.f32 %v2442_v40, %v721_v35  ;;  %v592_v35 = vmax.f32 %v550_v19, 0.0  ;;  %v769_v46 = vmax.f32 %v727_v20, 0.0 }
 0x10e   : > { %v591_v47 = vmax.f32 %v545_v21, 0.0 }
 0x10f   : > { %v1717_v36 = vpop.f32.mrf.mxu0  ;;  %v768_v49 = vmax.f32 %v722_v22, 0.0  ;;  %v2499_v4 = vmax.f32 %v592_v35, %v769_v46 }
 0x110   : > { %v1773_v37 = vpop.f32.mrf.mxu1  ;;  %v560_v23 = vadd.f32 %v1717_v36, %v2442_v40 }
 0x111   : > { %v2435_v38 = vpop.f32.mrf.mxu0  ;;  %v737_v32 = vadd.f32 %v1773_v37, %v2442_v40  ;;  %v2501_v5 = vmax.f32 %v591_v47, %v768_v49 }
 0x112   : > { %v2437_v39 = vpop.f32.mrf.mxu1  ;;  %v594_v50 = vmax.f32 %v560_v23, 0.0  ;;  %v555_v57 = vadd.f32 %v2442_v40, %v2435_v38 }
 0x113   : > { %v771_v56 = vmax.f32 %v737_v32, 0.0  ;;  %v732_v58 = vadd.f32 %v2442_v40, %v2437_v39 }
 0x114   : > { %v593_v14 = vmax.f32 %v555_v57, 0.0 }
 0x115   : > { %v2444_v41 = vpop.f32.mrf.mxu0  ;;  %v2509_v13 = vmax.f32 %v594_v50, %v771_v56  ;;  %v770_v20 = vmax.f32 %v732_v58, 0.0 }
 0x116   : > { %v2446_v42 = vpop.f32.mrf.mxu1 }
 0x117   : > { %v2448_v43 = vpop.f32.mrf.mxu0  ;;  %v747_v46 = vadd.f32 %v2446_v42, %v2442_v40 }
 0x118   : > { %v2454_v48 = vpop.f32.mrf.mxu1  ;;  %v565_v47 = vadd.f32 %v2442_v40, %v2448_v43 }
 0x119   : > { %v742_v42 = vadd.f32 %v2442_v40, %v2454_v48 }
 0x11b   : > { %v2468_v61 = vpop.f32.mrf.mxu0 }
 0x11c   : > { %v2470_v2 = vpop.f32.mrf.mxu1 }
 0x11d   : > { %v2472_v7 = vpop.f32.mrf.mxu0 }
 0x11e   : > { %v2474_v16 = vpop.f32.mrf.mxu1 }
 0x121   : > { %v1814_v24 = vpop.f32.mrf.mxu0 }
 0x122   : > { %v880_v28 = vadd.f32 %v1814_v24, %v2442_v40  ;;  %v570_v24 = vadd.f32 %v2444_v41, %v2442_v40 }
 0x123   : > { %v1870_v33 = vpop.f32.mrf.mxu1  ;;  %v874_v34 = vpop.f32.mrf.mxu0 }
 0x124   : > { %v954_v44 = vmax.f32 %v880_v28, 0.0  ;;  %v1073_v36 = vadd.f32 %v1870_v33, %v2442_v40  ;;  %v875_v45 = vadd.f32 %v2442_v40, %v874_v34 }
 0x125   : > { %v1067_v51 = vpop.f32.mrf.mxu1  ;;  %v1817_v52 = vpop.f32.mrf.mxu0 }
 0x126   : > { %v970_v53 = vmax.f32 %v777_v17, %v954_v44  ;;  %v1147_v54 = vmax.f32 %v1073_v36, 0.0  ;;  %v953_v55 = vmax.f32 %v875_v45, 0.0  ;;  %v1068_v37 = vadd.f32 %v2442_v40, %v1067_v51 }
 0x127   : > { %v890_v59 = vadd.f32 %v1817_v52, %v2442_v40  ;;  %v1873_v60 = vpop.f32.mrf.mxu1  ;;  %v884_v62 = vpop.f32.mrf.mxu0 }
 0x128   : > { %v1163_v63 = vmax.f32 %v970_v53, %v1147_v54  ;;  %v969_v0 = vmax.f32 %v776_v18, %v953_v55  ;;  %v1146_v1 = vmax.f32 %v1068_v37, 0.0  ;;  %v1083_v3 = vadd.f32 %v1873_v60, %v2442_v40 }
 0x129   : > { %v956_v6 = vmax.f32 %v890_v59, 0.0  ;;  %v885_v8 = vadd.f32 %v2442_v40, %v884_v62  ;;  %v1077_v38 = vpop.f32.mrf.mxu1  ;;  %v1820_v9 = vpop.f32.mrf.mxu0  ;;  %v2525_v54 = vmax.f32 %v593_v14, %v770_v20  ;;  %v596_v60 = vmax.f32 %v570_v24, 0.0 }
 0x12a   : > { %1179 = vst [vmem:[%s2504_s21 + $0x8] sm:$0xff] %v1163_v63  ;;  %v1162_v39 = vmax.f32 %v969_v0, %v1146_v1  ;;  %v1149_v10 = vmax.f32 %v1083_v3, 0.0  ;;  %v1078_v11 = vadd.f32 %v2442_v40, %v1077_v38  ;;  %v900_v12 = vadd.f32 %v1820_v9, %v2442_v40 }
 0x12b   : > { %v972_v15 = vmax.f32 %v779_v25, %v956_v6  ;;  %v955_v17 = vmax.f32 %v885_v8, 0.0  ;;  %v1876_v18 = vpop.f32.mrf.mxu1  ;;  %v894_v19 = vpop.f32.mrf.mxu0  ;;  %v773_v62 = vmax.f32 %v747_v46, 0.0  ;;  %v595_v3 = vmax.f32 %v565_v47, 0.0 }
 0x12c   : > { %1178 = vst [vmem:[%s2504_s21] sm:$0xff] %v1162_v39  ;;  %v958_v21 = vmax.f32 %v900_v12, 0.0  ;;  %v1093_v22 = vadd.f32 %v1876_v18, %v2442_v40  ;;  %v895_v23 = vadd.f32 %v2442_v40, %v894_v19  ;;  %v1148_v33 = vmax.f32 %v1078_v11, 0.0 }
 0x12d   : > { %v1165_v28 = vmax.f32 %v972_v15, %v1149_v10  ;;  %v971_v32 = vmax.f32 %v778_v26, %v955_v17  ;;  %v1087_v34 = vpop.f32.mrf.mxu1  ;;  %v1823_v35 = vpop.f32.mrf.mxu0  ;;  %v772_v9 = vmax.f32 %v742_v42, 0.0  ;;  %v789_v19 = vmax.f32 %v596_v60, %v773_v62 }
 0x12e   : > { %v974_v25 = vmax.f32 %v781_v27, %v958_v21  ;;  %v1151_v44 = vmax.f32 %v1093_v22, 0.0  ;;  %v957_v36 = vmax.f32 %v895_v23, 0.0  ;;  %v1088_v45 = vadd.f32 %v2442_v40, %v1087_v34 }
 0x12f   : > { %1181 = vst [vmem:[%s2504_s21 + $0x18] sm:$0xff] %v1165_v28  ;;  %v1164_v41 = vmax.f32 %v971_v32, %v1148_v33  ;;  %v910_v26 = vadd.f32 %v1823_v35, %v2442_v40  ;;  %v1879_v49 = vpop.f32.mrf.mxu1  ;;  %v904_v50 = vpop.f32.mrf.mxu0  ;;  %v580_v20 = vadd.f32 %v2468_v61, %v2442_v40  ;;  %v788_v33 = vmax.f32 %v595_v3, %v772_v9 }
 0x130   : > { %v1167_v51 = vmax.f32 %v974_v25, %v1151_v44  ;;  %v973_v27 = vmax.f32 %v2483_v29, %v957_v36  ;;  %v1150_v52 = vmax.f32 %v1088_v45, 0.0  ;;  %v1103_v53 = vadd.f32 %v1879_v49, %v2442_v40 }
 0x131   : > { %1180 = vst [vmem:[%s2504_s21 + $0x10] sm:$0xff] %v1164_v41  ;;  %v960_v43 = vmax.f32 %v910_v26, 0.0  ;;  %v905_v55 = vadd.f32 %v2442_v40, %v904_v50  ;;  %v1097_v37 = vpop.f32.mrf.mxu1  ;;  %v1826_v56 = vpop.f32.mrf.mxu0  ;;  %v757_v34 = vadd.f32 %v2470_v2, %v2442_v40  ;;  %v575_v47 = vadd.f32 %v2442_v40, %v2472_v7 }
 0x132   : > { %1183 = vst [vmem:[%s2504_s21 + $0x28] sm:$0xff] %v1167_v51  ;;  %v1166_v57 = vmax.f32 %v973_v27, %v1150_v52  ;;  %v1153_v58 = vmax.f32 %v1103_v53, 0.0  ;;  %v1098_v29 = vadd.f32 %v2442_v40, %v1097_v37  ;;  %v920_v59 = vadd.f32 %v1826_v56, %v2442_v40 }
 0x133   : > { %v976_v63 = vmax.f32 %v2485_v30, %v960_v43  ;;  %v959_v0 = vmax.f32 %v905_v55, 0.0  ;;  %v1882_v48 = vpop.f32.mrf.mxu1  ;;  %v914_v1 = vpop.f32.mrf.mxu0  ;;  %v752_v2 = vadd.f32 %v2442_v40, %v2474_v16  ;;  %v598_v51 = vmax.f32 %v580_v20, 0.0 }
 0x134   : > { %1182 = vst [vmem:[%s2504_s21 + $0x20] sm:$0xff] %v1166_v57  ;;  %v962_v6 = vmax.f32 %v920_v59, 0.0  ;;  %v1113_v8 = vadd.f32 %v1882_v48, %v2442_v40  ;;  %v915_v38 = vadd.f32 %v2442_v40, %v914_v1  ;;  %v1152_v11 = vmax.f32 %v1098_v29, 0.0 }
 0x135   : > { %v1169_v39 = vmax.f32 %v976_v63, %v1153_v58  ;;  %v975_v10 = vmax.f32 %v2487_v31, %v959_v0  ;;  %v1107_v12 = vpop.f32.mrf.mxu1  ;;  %v1829_v14 = vpop.f32.mrf.mxu0  ;;  %v775_v42 = vmax.f32 %v757_v34, 0.0  ;;  %v597_v29 = vmax.f32 %v575_v47, 0.0 }
 0x136   : > { %v978_v30 = vmax.f32 %v2499_v4, %v962_v6  ;;  %v1155_v15 = vmax.f32 %v1113_v8, 0.0  ;;  %v961_v17 = vmax.f32 %v915_v38, 0.0  ;;  %v1108_v18 = vadd.f32 %v2442_v40, %v1107_v12 }
 0x137   : > { %1185 = vst [vmem:[%s2504_s21 + $0x38] sm:$0xff] %v1169_v39  ;;  %v1168_v21 = vmax.f32 %v975_v10, %v1152_v11  ;;  %v930_v22 = vadd.f32 %v1829_v14, %v2442_v40  ;;  %v1885_v31 = vpop.f32.mrf.mxu1  ;;  %v924_v23 = vpop.f32.mrf.mxu0  ;;  %v774_v59 = vmax.f32 %v752_v2, 0.0  ;;  %v791_v6 = vmax.f32 %v598_v51, %v775_v42 }
 0x138   : > { %v1171_v24 = vmax.f32 %v978_v30, %v1155_v15  ;;  %v977_v28 = vmax.f32 %v2501_v5, %v961_v17  ;;  %v1154_v4 = vmax.f32 %v1108_v18, 0.0  ;;  %v1123_v32 = vadd.f32 %v1885_v31, %v2442_v40 }
 0x139   : > { %1184 = vst [vmem:[%s2504_s21 + $0x30] sm:$0xff] %v1168_v21  ;;  %v964_v35 = vmax.f32 %v930_v22, 0.0  ;;  %v925_v61 = vadd.f32 %v2442_v40, %v924_v23  ;;  %v1117_v25 = vpop.f32.mrf.mxu1  ;;  %v1832_v44 = vpop.f32.mrf.mxu0  ;;  %v790_v12 = vmax.f32 %v597_v29, %v774_v59 }
 0x13a   : > { %1187 = vst [vmem:[%s2504_s21 + $0x48] sm:$0xff] %v1171_v24  ;;  %v1170_v36 = vmax.f32 %v977_v28, %v1154_v4  ;;  %v1157_v45 = vmax.f32 %v1123_v32, 0.0  ;;  %v1118_v46 = vadd.f32 %v2442_v40, %v1117_v25  ;;  %v940_v5 = vadd.f32 %v1832_v44, %v2442_v40 }
 0x13b   : > { %v980_v41 = vmax.f32 %v2509_v13, %v964_v35  ;;  %v963_v26 = vmax.f32 %v925_v61, 0.0  ;;  %v1888_v49 = vpop.f32.mrf.mxu1  ;;  %v934_v50 = vpop.f32.mrf.mxu0 }
 0x13c   : > { %1186 = vst [vmem:[%s2504_s21 + $0x40] sm:$0xff] %v1170_v36  ;;  %v966_v27 = vmax.f32 %v940_v5, 0.0  ;;  %v1133_v52 = vadd.f32 %v1888_v49, %v2442_v40  ;;  %v935_v53 = vadd.f32 %v2442_v40, %v934_v50  ;;  %v1156_v55 = vmax.f32 %v1118_v46, 0.0 }
 0x13d   : > { %v1173_v43 = vmax.f32 %v980_v41, %v1157_v45  ;;  %v979_v7 = vmax.f32 %v2525_v54, %v963_v26  ;;  %v1127_v37 = vpop.f32.mrf.mxu1  ;;  %v1835_v16 = vpop.f32.mrf.mxu0 }
 0x13e   : > { %v982_v56 = vmax.f32 %v789_v19, %v966_v27  ;;  %v1159_v13 = vmax.f32 %v1133_v52, 0.0  ;;  %v965_v57 = vmax.f32 %v935_v53, 0.0  ;;  %v1128_v58 = vadd.f32 %v2442_v40, %v1127_v37 }
 0x13f   : > { %1189 = vst [vmem:[%s2504_s21 + $0x58] sm:$0xff] %v1173_v43  ;;  %v1172_v60 = vmax.f32 %v979_v7, %v1156_v55  ;;  %v950_v62 = vadd.f32 %v1835_v16, %v2442_v40  ;;  %v1891_v63 = vpop.f32.mrf.mxu1  ;;  %v944_v0 = vpop.f32.mrf.mxu0 }
 0x140   : > { %v1175_v48 = vmax.f32 %v982_v56, %v1159_v13  ;;  %v981_v54 = vmax.f32 %v788_v33, %v965_v57  ;;  %v1158_v1 = vmax.f32 %v1128_v58, 0.0  ;;  %v1143_v3 = vadd.f32 %v1891_v63, %v2442_v40 }
 0x141   : > { %1188 = vst [vmem:[%s2504_s21 + $0x50] sm:$0xff] %v1172_v60  ;;  %v968_v8 = vmax.f32 %v950_v62, 0.0  ;;  %v945_v38 = vadd.f32 %v2442_v40, %v944_v0  ;;  %v1137_v9 = vpop.f32.mrf.mxu1 }
 0x142   : > { %1191 = vst [vmem:[%s2504_s21 + $0x68] sm:$0xff] %v1175_v48  ;;  %v1174_v39 = vmax.f32 %v981_v54, %v1158_v1  ;;  %v1161_v10 = vmax.f32 %v1143_v3, 0.0  ;;  %v1138_v11 = vadd.f32 %v2442_v40, %v1137_v9 }
 0x143   : > { %v984_v14 = vmax.f32 %v791_v6, %v968_v8  ;;  %v967_v30 = vmax.f32 %v945_v38, 0.0 }
 0x144   : > { %1190 = vst [vmem:[%s2504_s21 + $0x60] sm:$0xff] %v1174_v39  ;;  %v1160_v18 = vmax.f32 %v1138_v11, 0.0 }
 0x145   : > { %v1177_v15 = vmax.f32 %v984_v14, %v1161_v10  ;;  %v983_v17 = vmax.f32 %v790_v12, %v967_v30  ;;  %1200 = sbr.rel (!%p2128_p4) target bundleno = 371 (0x173), region = 48 }
 0x147   : > { %1193 = vst [vmem:[%s2504_s21 + $0x78] sm:$0xff] %v1177_v15  ;;  %v1176_v19 = vmax.f32 %v983_v17, %v1160_v18 }
 0x149   : > { %1192 = vst [vmem:[%s2504_s21 + $0x70] sm:$0xff] %v1176_v19 }
 0x14a   : > { %s2689_s27 = smov (!%p1203_p8, %s1202_s27), 16 }
 0x14b   : > { %s1522_s10 = sshll.u32 %s2689_s27, 7 }
 0x14c   : > { %p1525_p9 = scmp.eq.s32.totalorder %s1522_s10, 0 }
 0x14d   : > { %s2587_s11 = sshrl.u32 (!%p1525_p9), %s2689_s27, 4 }
 0x14e   : > { %1211 = sbr.rel (%p1525_p9) target bundleno = 371 (0x173), region = 52  ;;  %p1526_p10 = scmp.le.s32.totalorder (!%p1525_p9), %s2587_s11, 0 }
 0x153   : > { %1444 = sbr.rel (%p1526_p10) target bundleno = 354 (0x162), region = 137  ;;  %s2682_s24 = smov (!%p1526_p10), %s2581_s9 }
 0x154   : > { %s2683_s29 = smov (!%p1526_p10), %s2504_s21  ;;  %s2596_s26 = smov (!%p1526_p10), 0  }
 0x155   : > { %s2598_s12 = smov (!%p1526_p10), 0  }
 0x158 LB: >> { %v1304_v40 = vld [vmem:[%s2042_s29] sm:$0xff]  ;;  %v1306_v20 = vld [vmem:[%s2042_s29 + $0x8] sm:$0xff]  ;;  %v1308_v21 = vld [vmem:[%s2042_s29 + $0x10] sm:$0xff]  ;;  %s1336_s13 = sadd.s32 1, %s2046_s26  ;;  %s1298_s12 = sadd.s32 1, %s2050_s12   ;;  %s2050_s12 = sphi %s2598_s12, %s1298_s12   ;;  %s2046_s26 = sphi %s2596_s26, %s2684_s26   ;;  %s2042_s29 = sphi %s2683_s29, %s1341_s29   ;;  %s2038_s24 = sphi %s2682_s24, %s1342_s24  }
 0x159   : >> { %1305 = vst [vmem:[%s2038_s24] sm:$0xff] %v1304_v40  ;;  %1307 = vst [vmem:[%s2038_s24 + $0x8] sm:$0xff] %v1306_v20  ;;  %v1310_v22 = vld [vmem:[%s2042_s29 + $0x18] sm:$0xff]  ;;  %v1312_v31 = vld [vmem:[%s2042_s29 + $0x20] sm:$0xff]  ;;  %p1337_p11 = scmp.ge.s32.totalorder %s1336_s13, %s2587_s11  ;;  %p1297_p12 = scmp.ge.s32.totalorder %s1298_s12, %s2587_s11 }
 0x15a   : >> { %1309 = vst [vmem:[%s2038_s24 + $0x10] sm:$0xff] %v1308_v21  ;;  %v1314_v23 = vld [vmem:[%s2042_s29 + $0x28] sm:$0xff]  ;;  %1311 = vst [vmem:[%s2038_s24 + $0x18] sm:$0xff] %v1310_v22  ;;  %v1316_v24 = vld [vmem:[%s2042_s29 + $0x30] sm:$0xff] }
 0x15b   : >> { %1313 = vst [vmem:[%s2038_s24 + $0x20] sm:$0xff] %v1312_v31  ;;  %1315 = vst [vmem:[%s2038_s24 + $0x28] sm:$0xff] %v1314_v23  ;;  %v1318_v28 = vld [vmem:[%s2042_s29 + $0x38] sm:$0xff]  ;;  %v1320_v4 = vld [vmem:[%s2042_s29 + $0x40] sm:$0xff]  ;;  %s2691_s13 = smov (%p1337_p11, %s1336_s13), 0 }
 0x15c   : >> { %1317 = vst [vmem:[%s2038_s24 + $0x30] sm:$0xff] %v1316_v24  ;;  %1319 = vst [vmem:[%s2038_s24 + $0x38] sm:$0xff] %v1318_v28  ;;  %v1322_v32 = vld [vmem:[%s2042_s29 + $0x48] sm:$0xff]  ;;  %v1324_v33 = vld [vmem:[%s2042_s29 + $0x50] sm:$0xff]  ;;  %s1527_s14 = sshll.u32 %s2691_s13, 7  ;;  %s2684_s26 = smov %s2691_s13 }
 0x15d   : >> { %1321 = vst [vmem:[%s2038_s24 + $0x40] sm:$0xff] %v1320_v4  ;;  %v1326_v34 = vld [vmem:[%s2042_s29 + $0x58] sm:$0xff]  ;;  %1323 = vst [vmem:[%s2038_s24 + $0x48] sm:$0xff] %v1322_v32  ;;  %v1328_v35 = vld [vmem:[%s2042_s29 + $0x60] sm:$0xff]  ;;  %1300 = sbr.rel (!%p1297_p12) target bundleno = 344 (0x158), region = 143 }
 0x15e   : >> { %1325 = vst [vmem:[%s2038_s24 + $0x50] sm:$0xff] %v1324_v33  ;;  %1327 = vst [vmem:[%s2038_s24 + $0x58] sm:$0xff] %v1326_v34  ;;  %v1330_v61 = vld [vmem:[%s2042_s29 + $0x68] sm:$0xff]  ;;  %v1332_v25 = vld [vmem:[%s2042_s29 + $0x70] sm:$0xff] }
 0x15f   : >> { %1329 = vst [vmem:[%s2038_s24 + $0x60] sm:$0xff] %v1328_v35  ;;  %1331 = vst [vmem:[%s2038_s24 + $0x68] sm:$0xff] %v1330_v61  ;;  %v1334_v44 = vld [vmem:[%s2042_s29 + $0x78] sm:$0xff]  ;;  %s1341_s29 = scalar_lea.vmem %s2504_s21, %s1527_s14 [#allocation2]  }
 0x160   : >> { %1333 = vst [vmem:[%s2038_s24 + $0x70] sm:$0xff] %v1332_v25  ;;  %1335 = vst [vmem:[%s2038_s24 + $0x78] sm:$0xff] %v1334_v44  ;;  %s1342_s24 = scalar_lea.vmem %s2581_s9, %s1527_s14  }
 0x162 PF: > { %s2656_s15 = sand.u32 15, %s2689_s27   ;;  %s1538_s17 = sshll.u32 %s2587_s11, 7 }
 0x163   : > { %s1347_s18 = scalar_lea.vmem %s2504_s21, %s1538_s17 [#allocation2]   ;;  %s1349_s16 = scalar_lea.vmem %s2581_s9, %s1538_s17  }
 0x164   : > { %p1532_p13 = scmp.le.s32.totalorder %s2656_s15, 0 }
 0x165   : > { %s2052_s19 = smov (!%p1532_p13), %s1349_s16   ;;  %s2056_s20 = smov (!%p1532_p13), %s1347_s18  }
 0x166   : > { %1458 = sbr.rel (%p1532_p13) target bundleno = 371 (0x173), region = 148  ;;  %s2060_s23 = smov (!%p1532_p13), 0  }
 0x167   : > { %s2064_s30 = smov (!%p1532_p13), 0  }
 0x16b LB: >> { %v1359_v36 = vld [vmem:[%s2058_s20] sm:$0xff]  ;;  %s1361_s27 = sadd.s32 1, %s2062_s23  ;;  %s1353_s30 = sadd.s32 1, %s2066_s30   ;;  %s2066_s30 = sphi %s2064_s30, %s1353_s30   ;;  %s2062_s23 = sphi %s2060_s23, %s2061_s23   ;;  %s2058_s20 = sphi %s2056_s20, %s1366_s20   ;;  %s2054_s19 = sphi %s2052_s19, %s1367_s19  }
 0x16c   : >> { %1360 = vst [vmem:[%s2054_s19] sm:$0xff] %v1359_v36  ;;  %p1362_p0 = scmp.ge.s32.totalorder %s1361_s27, %s2656_s15  ;;  %p1352_p1 = scmp.ge.s32.totalorder %s1353_s30, %s2656_s15 }
 0x16e   : >> { %s2693_s27 = smov (%p1362_p0, %s1361_s27), 0  ;;  %1355 = sbr.rel (!%p1352_p1) target bundleno = 363 (0x16b), region = 154 }
 0x16f   : >> { %s1533_s21 = sshll.u32 %s2693_s27, 3  ;;  %s2061_s23 = smov %s2693_s27  }
 0x170   : >> { %s1366_s20 = scalar_lea.vmem %s1347_s18, %s1533_s21 [#allocation2]   ;;  %s1367_s19 = scalar_lea.vmem %s1349_s16, %s1533_s21  }
 0x173 PF: > { %p13_p2 = scmp.ge.s32.totalorder %s2118_s25, 10   ;;  %s2685_s21 = smov %s2030_s22 }
 0x174   : > { %s2686_s22 = smov %s2126_s28  ;;  %s2687_s23 = smov %s2118_s25 }
 0x175   :  { %15 = sbr.rel (!%p13_p2) target bundleno = 2 (0x2), region = 165 }

// kernel: cnn_forward.4
= control target key start
LH: loop header
LB: loop body
LE: loop exit
PB: predicated region body
PF: predicated region fallthrough
CT: control target
= control target key end

     0   :  { %s2191_s21 = smov 0   ;;  %s2193_s22 = smov 0   ;;  %s3029_s0 = inlined_call_operand.vmem [shape: f32[162,256], index: 0, kind: input, shape index: {}]   ;;  %s3030_s1 = inlined_call_operand.vmem [shape: f32[162,256], index: 1, kind: input, shape index: {}]   ;;  %s3031_s2 = inlined_call_operand.vmem [shape: f32[162,256], index: 2, kind: input, shape index: {}]   ;;  %s3032_s3 = inlined_call_operand.vmem [shape: f32[162,256], index: 3, kind: input, shape index: {}]   ;;  %s3033_s4 = inlined_call_operand.vmem [shape: f32[256,128], index: 4, kind: input, shape index: {}]   ;;  %s3034_s5 = inlined_call_operand.vmem [shape: f32[1,128], index: 5, kind: input, shape index: {}]   ;;  %s3035_s6 = inlined_call_operand.vmem [shape: f32[162,128], index: 6, kind: output, shape index: {}]  }
   0x1   :  { %s2195_s23 = smov 0  }
   0x2 LB: > { %s2204_s24 = sadd.s32 4294967295, %s2122_s23   ;;  %s2206_s25 = sadd.s32 1, %s2122_s23   ;;  %s2122_s23 = sphi %s2195_s23, %s3066_s23   ;;  %s2118_s22 = sphi %s2193_s22, %s3065_s22   ;;  %s2114_s21 = sphi %s2191_s21, %s3064_s21  }
   0x3   : > { %s166_s26 = ssub.s32 %s2122_s23, %s2206_s25  ;;  %s169_s27 = sadd.s32 1, %s2118_s22 }
   0x4   : > { %p167_p0 = scmp.eq.s32.totalorder %s166_s26, 0  ;;  %p179_p1 = scmp.ne.s32.totalorder %s2118_s22, %s2114_s21 }
   0x5   : > { %p180_p2 = scmp.eq.s32.totalorder %s2204_s24, 1  ;;  %p1621_p3 = scmp.ge.s32.totalorder %s2122_s23, 1 }
   0x6   : > { %s2214_s28 = scalar_select %p167_p0, %s2118_s22, %s169_s27  }
   0x7   : > { %p2216_p4 = por %p180_p2, %p179_p1  ;;  %p290_p5 = scmp.lt.s32.totalorder %s2122_s23, 3 }
   0x9   : > { %p291_p6 = pnand %p1621_p3, %p290_p5 }
   0xb   : > { %294 = sbr.rel (%p291_p6) target bundleno = 421 (0x1a5), region = 44 }
  0x10   : > { %v2223_v0 = vld [vmem:[%s3033_s4 + $0xf8] sm:$0xff]  ;;  %v2233_v2 = vld [vmem:[%s3033_s4 + $0xf0] sm:$0xff]  ;;  %v2247_v4 = vld [vmem:[%s3033_s4 + $0xe8] sm:$0xff]  ;;  %s2320_s18 = sshll.u32 %s2204_s24, 4  ;;  %s355_s17 = sand.u32 1, %s2114_s21  }
  0x11   : > { %v2228_v1 = vld [vmem:[%s3033_s4 + $0x78] sm:$0xff]  ;;  %1660 = vmatprep.subr.mxu0 %v2223_v0  ;;  %1740 = vmatprep.subr.mxu1 %v2223_v0  ;;  %v2240_v3 = vld [vmem:[%s3033_s4 + $0x70] sm:$0xff]  ;;  %v2254_v5 = vld [vmem:[%s3033_s4 + $0x68] sm:$0xff]  ;;  %p364_p7 = scmp.lt.s32.totalorder %s2320_s18, 20  ;;  %s1622_s19 = sshll.u32 %s355_s17, 7 }
  0x12   : > { %1661 = vmatpush3.msra.mxu0 %v2228_v1  ;;  %1741 = vmatpush3.msra.mxu1 %v2228_v1  ;;  %v2261_v6 = vld [vmem:[%s3033_s4 + $0xe0] sm:$0xff]  ;;  %v2275_v8 = vld [vmem:[%s3033_s4 + $0xd8] sm:$0xff]  ;;  %v2289_v10 = vld [vmem:[%s3033_s4 + $0xd0] sm:$0xff]  ;;  %s2818_s21 = scalar_lea.vmem [#allocation2], %s1622_s19   ;;  %s1314_s20 = ssub.s32 (%p2216_p4), 21, %s2320_s18 }
  0x13   : > { %1662 = vmatprep.subr.mxu0 %v2233_v2  ;;  %1742 = vmatprep.subr.mxu1 %v2233_v2  ;;  %v2268_v7 = vld [vmem:[%s3033_s4 + $0x60] sm:$0xff]  ;;  %v2282_v9 = vld [vmem:[%s3033_s4 + $0x58] sm:$0xff]  ;;  %v2296_v11 = vld [vmem:[%s3033_s4 + $0x50] sm:$0xff]  ;;  %s365_s15 = scalar_select %p364_p7, %s2320_s18, 20 }
  0x14   : > { %1663 = vmatpush3.msra.mxu0 %v2240_v3  ;;  %1743 = vmatpush3.msra.mxu1 %v2240_v3  ;;  %v2303_v12 = vld [vmem:[%s3033_s4 + $0xc8] sm:$0xff]  ;;  %v2317_v14 = vld [vmem:[%s3033_s4 + $0xc0] sm:$0xff]  ;;  %v2334_v16 = vld [vmem:[%s3033_s4 + $0xb8] sm:$0xff]  ;;  %s1657_s23 = sshll.u32 (%p2216_p4), %s2204_s24, 7  ;;  %p1315_p8 = scmp.lt.s32.totalorder (%p2216_p4), %s1314_s20, 16 }
  0x15   : > { %1664 = vmatprep.subr.mxu0 %v2247_v4  ;;  %1744 = vmatprep.subr.mxu1 %v2247_v4  ;;  %v2310_v13 = vld [vmem:[%s3033_s4 + $0x48] sm:$0xff]  ;;  %v2327_v15 = vld [vmem:[%s3033_s4 + $0x40] sm:$0xff]  ;;  %v2341_v17 = vld [vmem:[%s3033_s4 + $0x38] sm:$0xff]  ;;  %s2401_s7 = sshll.u32 %s365_s15, 4  ;;  %s2936_s30 = scalar_lea.vmem (%p2216_p4), %s3035_s6, %s1657_s23  }
  0x16   : > { %1665 = vmatpush3.msra.mxu0 %v2254_v5  ;;  %1745 = vmatpush3.msra.mxu1 %v2254_v5  ;;  %v2349_v18 = vld [vmem:[%s3033_s4 + $0xb0] sm:$0xff]  ;;  %v2363_v20 = vld [vmem:[%s3033_s4 + $0xa8] sm:$0xff]  ;;  %v2378_v22 = vld [vmem:[%s3033_s4 + $0xa0] sm:$0xff]  ;;  %s2428_s16 = scalar_lea.vmem %s3029_s0, %s2401_s7  ;;  %s2441_s26 = scalar_lea.vmem %s3030_s1, %s2401_s7 }
  0x17   : > { %1666 = vmatprep.subr.mxu0 %v2261_v6  ;;  %1746 = vmatprep.subr.mxu1 %v2261_v6  ;;  %v2356_v19 = vld [vmem:[%s3033_s4 + $0x30] sm:$0xff]  ;;  %v2370_v21 = vld [vmem:[%s3033_s4 + $0x28] sm:$0xff]  ;;  %v2385_v23 = vld [vmem:[%s3033_s4 + $0x20] sm:$0xff]  ;;  %s2585_s12 = scalar_lea.vmem %s3031_s2, %s2401_s7  ;;  %s2595_s15 = scalar_lea.vmem %s3032_s3, %s2401_s7 }
  0x18   : > { %1667 = vmatpush3.msra.mxu0 %v2268_v7  ;;  %1747 = vmatpush3.msra.mxu1 %v2268_v7  ;;  %v2392_v24 = vld [vmem:[%s3033_s4 + $0x98] sm:$0xff]  ;;  %v2408_v26 = vld [vmem:[%s3033_s4 + $0x90] sm:$0xff]  ;;  %v2422_v28 = vld [vmem:[%s3033_s4 + $0x88] sm:$0xff] }
  0x19   : > { %1668 = vmatprep.subr.mxu0 %v2275_v8  ;;  %1748 = vmatprep.subr.mxu1 %v2275_v8  ;;  %v2399_v25 = vld [vmem:[%s3033_s4 + $0x18] sm:$0xff]  ;;  %v2415_v27 = vld [vmem:[%s3033_s4 + $0x10] sm:$0xff]  ;;  %v2435_v29 = vld [vmem:[%s3033_s4 + $0x8] sm:$0xff] }
  0x1a   : > { %1669 = vmatpush3.msra.mxu0 %v2282_v9  ;;  %1749 = vmatpush3.msra.mxu1 %v2282_v9  ;;  %v2448_v30 = vld [vmem:[%s3033_s4 + $0x80] sm:$0xff]  ;;  %v465_v32 = vld [vmem:[%s2428_s16 + $0x8] sm:$0xff]  ;;  %v467_v36 = vld [vmem:[%s2428_s16 + $0x18] sm:$0xff] }
  0x1b   : > { %1670 = vmatprep.subr.mxu0 %v2289_v10  ;;  %1750 = vmatprep.subr.mxu1 %v2289_v10  ;;  %v2455_v31 = vld [vmem:[%s3033_s4] sm:$0xff]  ;;  %v664_v33 = vld [vmem:[%s2441_s26 + $0x8] sm:$0xff]  ;;  %v666_v37 = vld [vmem:[%s2441_s26 + $0x18] sm:$0xff] }
  0x1c   : > { %1671 = vmatpush3.msra.mxu0 %v2296_v11  ;;  %1751 = vmatpush3.msra.mxu1 %v2296_v11  ;;  %v464_v34 = vld [vmem:[%s2428_s16] sm:$0xff]  ;;  %v466_v38 = vld [vmem:[%s2428_s16 + $0x10] sm:$0xff]  ;;  %v469_v40 = vld [vmem:[%s2428_s16 + $0x28] sm:$0xff] }
  0x1d   : > { %1672 = vmatprep.subr.mxu0 %v2303_v12  ;;  %1752 = vmatprep.subr.mxu1 %v2303_v12  ;;  %v663_v35 = vld [vmem:[%s2441_s26] sm:$0xff]  ;;  %v665_v39 = vld [vmem:[%s2441_s26 + $0x10] sm:$0xff]  ;;  %v668_v41 = vld [vmem:[%s2441_s26 + $0x28] sm:$0xff] }
  0x1e   : > { %1673 = vmatpush3.msra.mxu0 %v2310_v13  ;;  %1753 = vmatpush3.msra.mxu1 %v2310_v13  ;;  %v468_v42 = vld [vmem:[%s2428_s16 + $0x20] sm:$0xff]  ;;  %v471_v44 = vld [vmem:[%s2428_s16 + $0x38] sm:$0xff]  ;;  %v470_v46 = vld [vmem:[%s2428_s16 + $0x30] sm:$0xff] }
  0x1f   : > { %1674 = vmatprep.subr.mxu0 %v2317_v14  ;;  %1754 = vmatprep.subr.mxu1 %v2317_v14  ;;  %v667_v43 = vld [vmem:[%s2441_s26 + $0x20] sm:$0xff]  ;;  %v670_v45 = vld [vmem:[%s2441_s26 + $0x38] sm:$0xff]  ;;  %v669_v47 = vld [vmem:[%s2441_s26 + $0x30] sm:$0xff] }
  0x20   : > { %1675 = vmatpush3.msra.mxu0 %v2327_v15  ;;  %1755 = vmatpush3.msra.mxu1 %v2327_v15  ;;  %v473_v48 = vld [vmem:[%s2428_s16 + $0x48] sm:$0xff]  ;;  %v472_v50 = vld [vmem:[%s2428_s16 + $0x40] sm:$0xff]  ;;  %v475_v52 = vld [vmem:[%s2428_s16 + $0x58] sm:$0xff] }
  0x21   : > { %1676 = vmatprep.subr.mxu0 %v2334_v16  ;;  %1756 = vmatprep.subr.mxu1 %v2334_v16  ;;  %v672_v49 = vld [vmem:[%s2441_s26 + $0x48] sm:$0xff]  ;;  %v671_v51 = vld [vmem:[%s2441_s26 + $0x40] sm:$0xff]  ;;  %v674_v53 = vld [vmem:[%s2441_s26 + $0x58] sm:$0xff] }
  0x22   : > { %1677 = vmatpush3.msra.mxu0 %v2341_v17  ;;  %1757 = vmatpush3.msra.mxu1 %v2341_v17  ;;  %v474_v54 = vld [vmem:[%s2428_s16 + $0x50] sm:$0xff]  ;;  %v477_v56 = vld [vmem:[%s2428_s16 + $0x68] sm:$0xff]  ;;  %v476_v58 = vld [vmem:[%s2428_s16 + $0x60] sm:$0xff] }
  0x23   : > { %1678 = vmatprep.subr.mxu0 %v2349_v18  ;;  %1758 = vmatprep.subr.mxu1 %v2349_v18  ;;  %v673_v55 = vld [vmem:[%s2441_s26 + $0x50] sm:$0xff]  ;;  %v676_v57 = vld [vmem:[%s2441_s26 + $0x68] sm:$0xff]  ;;  %v675_v59 = vld [vmem:[%s2441_s26 + $0x60] sm:$0xff] }
  0x24   : > { %1679 = vmatpush3.msra.mxu0 %v2356_v19  ;;  %1759 = vmatpush3.msra.mxu1 %v2356_v19  ;;  %v479_v60 = vld [vmem:[%s2428_s16 + $0x78] sm:$0xff]  ;;  %v478_v62 = vld [vmem:[%s2428_s16 + $0x70] sm:$0xff] }
  0x25   : > { %1680 = vmatprep.subr.mxu0 %v2363_v20  ;;  %1760 = vmatprep.subr.mxu1 %v2363_v20  ;;  %v678_v61 = vld [vmem:[%s2441_s26 + $0x78] sm:$0xff]  ;;  %v677_v63 = vld [vmem:[%s2441_s26 + $0x70] sm:$0xff] }
  0x26   : > { %1681 = vmatpush3.msra.mxu0 %v2370_v21  ;;  %1761 = vmatpush3.msra.mxu1 %v2370_v21 }
  0x27   : > { %1682 = vmatprep.subr.mxu0 %v2378_v22  ;;  %1762 = vmatprep.subr.mxu1 %v2378_v22 }
  0x28   : > { %1683 = vmatpush3.msra.mxu0 %v2385_v23  ;;  %1763 = vmatpush3.msra.mxu1 %v2385_v23 }
  0x29   : > { %1684 = vmatprep.subr.mxu0 %v2392_v24  ;;  %1764 = vmatprep.subr.mxu1 %v2392_v24 }
  0x2a   : > { %1685 = vmatpush3.msra.mxu0 %v2399_v25  ;;  %1765 = vmatpush3.msra.mxu1 %v2399_v25 }
  0x2b   : > { %1686 = vmatprep.subr.mxu0 %v2408_v26  ;;  %1766 = vmatprep.subr.mxu1 %v2408_v26 }
  0x2c   : > { %1687 = vmatpush3.msra.mxu0 %v2415_v27  ;;  %1767 = vmatpush3.msra.mxu1 %v2415_v27 }
  0x2d   : > { %1688 = vmatprep.subr.mxu0 %v2422_v28  ;;  %1768 = vmatprep.subr.mxu1 %v2422_v28 }
  0x2e   : > { %1689 = vmatpush3.msra.mxu0 %v2435_v29  ;;  %1769 = vmatpush3.msra.mxu1 %v2435_v29 }
  0x2f   : > { %1690 = vmatprep.subr.mxu0 %v2448_v30  ;;  %1770 = vmatprep.subr.mxu1 %v2448_v30 }
  0x30   : > { %1691 = vmatpush3.msra.mxu0 %v2455_v31  ;;  %566 = vmatprep.mubr.f32.mxu0 %v465_v32  ;;  %v689_v32 = vld [vmem:[%s2441_s26 + $0xd0] sm:$0xff] }
  0x31   : > { %1771 = vmatpush3.msra.mxu1 %v2455_v31  ;;  %759 = vmatprep.mubr.f32.mxu1 %v664_v33  ;;  %v692_v33 = vld [vmem:[%s2441_s26 + $0xe8] sm:$0xff] }
  0x32   : > { %567 = vmatmul.mubr.f32.vlgmr.msra.gmra.mxu0 %v464_v34  ;;  %760 = vmatmul.mubr.f32.vlgmr.msra.gmra.mxu1 %v663_v35  ;;  %v691_v34 = vld [vmem:[%s2441_s26 + $0xe0] sm:$0xff]  ;;  %v694_v35 = vld [vmem:[%s2441_s26 + $0xf8] sm:$0xff] }
  0x33   : > { %1820 = vmatprep.subr.mxu0 %v2223_v0  ;;  %1900 = vmatprep.subr.mxu1 %v2223_v0  ;;  %v481_v0 = vld [vmem:[%s2428_s16 + $0x88] sm:$0xff] }
  0x34   : > { %1821 = vmatpush3.msra.mxu0 %v2228_v1  ;;  %571 = vmatprep.mubr.f32.mxu0 %v467_v36  ;;  %v693_v36 = vld [vmem:[%s2441_s26 + $0xf0] sm:$0xff] }
  0x35   : > { %764 = vmatprep.mubr.f32.mxu1 %v666_v37  ;;  %1901 = vmatpush3.msra.mxu1 %v2228_v1  ;;  %v680_v1 = vld [vmem:[%s2441_s26 + $0x88] sm:$0xff]  ;;  %v872_v37 = vld [vmem:[%s2585_s12] sm:$0xff] }
  0x36   : > { %572 = vmatmul.mubr.f32.gmra.mxu0 %v466_v38  ;;  %765 = vmatmul.mubr.f32.gmra.mxu1 %v665_v39  ;;  %v1081_v38 = vld [vmem:[%s2595_s15] sm:$0xff]  ;;  %v875_v39 = vld [vmem:[%s2585_s12 + $0x18] sm:$0xff] }
  0x37   : > { %1822 = vmatprep.subr.mxu0 %v2233_v2  ;;  %1902 = vmatprep.subr.mxu1 %v2233_v2  ;;  %v480_v2 = vld [vmem:[%s2428_s16 + $0x80] sm:$0xff] }
  0x38   : > { %1823 = vmatpush3.msra.mxu0 %v2240_v3  ;;  %576 = vmatprep.mubr.f32.mxu0 %v469_v40  ;;  %v874_v40 = vld [vmem:[%s2585_s12 + $0x10] sm:$0xff] }
  0x39   : > { %769 = vmatprep.mubr.f32.mxu1 %v668_v41  ;;  %1903 = vmatpush3.msra.mxu1 %v2240_v3  ;;  %v679_v3 = vld [vmem:[%s2441_s26 + $0x80] sm:$0xff]  ;;  %v877_v41 = vld [vmem:[%s2585_s12 + $0x28] sm:$0xff] }
  0x3a   : > { %577 = vmatmul.mubr.f32.gmra.mxu0 %v468_v42  ;;  %770 = vmatmul.mubr.f32.gmra.mxu1 %v667_v43  ;;  %v1086_v42 = vld [vmem:[%s2595_s15 + $0x28] sm:$0xff]  ;;  %v876_v43 = vld [vmem:[%s2585_s12 + $0x20] sm:$0xff] }
  0x3b   : > { %1824 = vmatprep.subr.mxu0 %v2247_v4  ;;  %1904 = vmatprep.subr.mxu1 %v2247_v4  ;;  %v483_v4 = vld [vmem:[%s2428_s16 + $0x98] sm:$0xff] }
  0x3c   : > { %1825 = vmatpush3.msra.mxu0 %v2254_v5  ;;  %581 = vmatprep.mubr.f32.mxu0 %v471_v44  ;;  %v879_v44 = vld [vmem:[%s2585_s12 + $0x38] sm:$0xff] }
  0x3d   : > { %774 = vmatprep.mubr.f32.mxu1 %v670_v45  ;;  %1905 = vmatpush3.msra.mxu1 %v2254_v5  ;;  %v682_v5 = vld [vmem:[%s2441_s26 + $0x98] sm:$0xff] }
  0x3e   : > { %582 = vmatmul.mubr.f32.gmra.mxu0 %v470_v46  ;;  %775 = vmatmul.mubr.f32.gmra.mxu1 %v669_v47  ;;  %v1088_v45 = vld [vmem:[%s2595_s15 + $0x38] sm:$0xff]  ;;  %v878_v46 = vld [vmem:[%s2585_s12 + $0x30] sm:$0xff] }
  0x3f   : > { %1826 = vmatprep.subr.mxu0 %v2261_v6  ;;  %1906 = vmatprep.subr.mxu1 %v2261_v6  ;;  %v482_v6 = vld [vmem:[%s2428_s16 + $0x90] sm:$0xff] }
  0x40   : > { %1827 = vmatpush3.msra.mxu0 %v2268_v7  ;;  %586 = vmatprep.mubr.f32.mxu0 %v473_v48  ;;  %v1087_v47 = vld [vmem:[%s2595_s15 + $0x30] sm:$0xff]  ;;  %v881_v48 = vld [vmem:[%s2585_s12 + $0x48] sm:$0xff] }
  0x41   : > { %779 = vmatprep.mubr.f32.mxu1 %v672_v49  ;;  %1907 = vmatpush3.msra.mxu1 %v2268_v7  ;;  %v681_v7 = vld [vmem:[%s2441_s26 + $0x90] sm:$0xff]  ;;  %v1090_v49 = vld [vmem:[%s2595_s15 + $0x48] sm:$0xff] }
  0x42   : > { %587 = vmatmul.mubr.f32.gmra.mxu0 %v472_v50  ;;  %780 = vmatmul.mubr.f32.gmra.mxu1 %v671_v51  ;;  %v880_v50 = vld [vmem:[%s2585_s12 + $0x40] sm:$0xff] }
  0x43   : > { %1828 = vmatprep.subr.mxu0 %v2275_v8  ;;  %1908 = vmatprep.subr.mxu1 %v2275_v8  ;;  %v485_v8 = vld [vmem:[%s2428_s16 + $0xa8] sm:$0xff]  ;;  %v1089_v51 = vld [vmem:[%s2595_s15 + $0x40] sm:$0xff] }
  0x44   : > { %1829 = vmatpush3.msra.mxu0 %v2282_v9  ;;  %591 = vmatprep.mubr.f32.mxu0 %v475_v52  ;;  %v883_v52 = vld [vmem:[%s2585_s12 + $0x58] sm:$0xff] }
  0x45   : > { %784 = vmatprep.mubr.f32.mxu1 %v674_v53  ;;  %1909 = vmatpush3.msra.mxu1 %v2282_v9  ;;  %v684_v9 = vld [vmem:[%s2441_s26 + $0xa8] sm:$0xff]  ;;  %v1092_v53 = vld [vmem:[%s2595_s15 + $0x58] sm:$0xff] }
  0x46   : > { %592 = vmatmul.mubr.f32.gmra.mxu0 %v474_v54  ;;  %785 = vmatmul.mubr.f32.gmra.mxu1 %v673_v55  ;;  %v882_v54 = vld [vmem:[%s2585_s12 + $0x50] sm:$0xff] }
  0x47   : > { %1830 = vmatprep.subr.mxu0 %v2289_v10  ;;  %1910 = vmatprep.subr.mxu1 %v2289_v10  ;;  %v484_v10 = vld [vmem:[%s2428_s16 + $0xa0] sm:$0xff]  ;;  %v1091_v55 = vld [vmem:[%s2595_s15 + $0x50] sm:$0xff] }
  0x48   : > { %1831 = vmatpush3.msra.mxu0 %v2296_v11  ;;  %596 = vmatprep.mubr.f32.mxu0 %v477_v56  ;;  %v885_v56 = vld [vmem:[%s2585_s12 + $0x68] sm:$0xff] }
  0x49   : > { %789 = vmatprep.mubr.f32.mxu1 %v676_v57  ;;  %1911 = vmatpush3.msra.mxu1 %v2296_v11  ;;  %v683_v11 = vld [vmem:[%s2441_s26 + $0xa0] sm:$0xff]  ;;  %v1094_v57 = vld [vmem:[%s2595_s15 + $0x68] sm:$0xff] }
  0x4a   : > { %597 = vmatmul.mubr.f32.gmra.mxu0 %v476_v58  ;;  %790 = vmatmul.mubr.f32.gmra.mxu1 %v675_v59  ;;  %v884_v58 = vld [vmem:[%s2585_s12 + $0x60] sm:$0xff] }
  0x4b   : > { %1832 = vmatprep.subr.mxu0 %v2303_v12  ;;  %1912 = vmatprep.subr.mxu1 %v2303_v12  ;;  %v487_v12 = vld [vmem:[%s2428_s16 + $0xb8] sm:$0xff]  ;;  %v1093_v59 = vld [vmem:[%s2595_s15 + $0x60] sm:$0xff] }
  0x4c   : > { %1833 = vmatpush3.msra.mxu0 %v2310_v13  ;;  %601 = vmatprep.mubr.f32.mxu0 %v479_v60  ;;  %v887_v60 = vld [vmem:[%s2585_s12 + $0x78] sm:$0xff] }
  0x4d   : > { %794 = vmatprep.mubr.f32.mxu1 %v678_v61  ;;  %1913 = vmatpush3.msra.mxu1 %v2310_v13  ;;  %v686_v13 = vld [vmem:[%s2441_s26 + $0xb8] sm:$0xff] }
  0x4e   : > { %602 = vmatmul.mubr.f32.gmra.mxu0 %v478_v62  ;;  %795 = vmatmul.mubr.f32.gmra.mxu1 %v677_v63  ;;  %v1096_v61 = vld [vmem:[%s2595_s15 + $0x78] sm:$0xff]  ;;  %v886_v62 = vld [vmem:[%s2585_s12 + $0x70] sm:$0xff] }
  0x4f   : > { %1834 = vmatprep.subr.mxu0 %v2317_v14  ;;  %1914 = vmatprep.subr.mxu1 %v2317_v14  ;;  %v486_v14 = vld [vmem:[%s2428_s16 + $0xb0] sm:$0xff] }
  0x50   : > { %1835 = vmatpush3.msra.mxu0 %v2327_v15  ;;  %606 = vmatprep.mubr.f32.mxu0 %v481_v0  ;;  %v1095_v63 = vld [vmem:[%s2595_s15 + $0x70] sm:$0xff]  ;;  %v889_v0 = vld [vmem:[%s2585_s12 + $0x88] sm:$0xff] }
  0x51   : > { %799 = vmatprep.mubr.f32.mxu1 %v680_v1  ;;  %1915 = vmatpush3.msra.mxu1 %v2327_v15  ;;  %v685_v15 = vld [vmem:[%s2441_s26 + $0xb0] sm:$0xff]  ;;  %v1098_v1 = vld [vmem:[%s2595_s15 + $0x88] sm:$0xff] }
  0x52   : > { %607 = vmatmul.mubr.f32.gmra.mxu0 %v480_v2  ;;  %800 = vmatmul.mubr.f32.gmra.mxu1 %v679_v3  ;;  %v888_v2 = vld [vmem:[%s2585_s12 + $0x80] sm:$0xff] }
  0x53   : > { %1836 = vmatprep.subr.mxu0 %v2334_v16  ;;  %1916 = vmatprep.subr.mxu1 %v2334_v16  ;;  %v489_v16 = vld [vmem:[%s2428_s16 + $0xc8] sm:$0xff]  ;;  %v1097_v3 = vld [vmem:[%s2595_s15 + $0x80] sm:$0xff] }
  0x54   : > { %1837 = vmatpush3.msra.mxu0 %v2341_v17  ;;  %611 = vmatprep.mubr.f32.mxu0 %v483_v4  ;;  %v891_v4 = vld [vmem:[%s2585_s12 + $0x98] sm:$0xff] }
  0x55   : > { %804 = vmatprep.mubr.f32.mxu1 %v682_v5  ;;  %1917 = vmatpush3.msra.mxu1 %v2341_v17  ;;  %v688_v17 = vld [vmem:[%s2441_s26 + $0xc8] sm:$0xff]  ;;  %v1100_v5 = vld [vmem:[%s2595_s15 + $0x98] sm:$0xff] }
  0x56   : > { %612 = vmatmul.mubr.f32.gmra.mxu0 %v482_v6  ;;  %805 = vmatmul.mubr.f32.gmra.mxu1 %v681_v7  ;;  %v890_v6 = vld [vmem:[%s2585_s12 + $0x90] sm:$0xff] }
  0x57   : > { %1838 = vmatprep.subr.mxu0 %v2349_v18  ;;  %1918 = vmatprep.subr.mxu1 %v2349_v18  ;;  %v488_v18 = vld [vmem:[%s2428_s16 + $0xc0] sm:$0xff]  ;;  %v1099_v7 = vld [vmem:[%s2595_s15 + $0x90] sm:$0xff] }
  0x58   : > { %1839 = vmatpush3.msra.mxu0 %v2356_v19  ;;  %616 = vmatprep.mubr.f32.mxu0 %v485_v8  ;;  %v893_v8 = vld [vmem:[%s2585_s12 + $0xa8] sm:$0xff] }
  0x59   : > { %809 = vmatprep.mubr.f32.mxu1 %v684_v9  ;;  %1919 = vmatpush3.msra.mxu1 %v2356_v19  ;;  %v687_v19 = vld [vmem:[%s2441_s26 + $0xc0] sm:$0xff]  ;;  %v1102_v9 = vld [vmem:[%s2595_s15 + $0xa8] sm:$0xff] }
  0x5a   : > { %617 = vmatmul.mubr.f32.gmra.mxu0 %v484_v10  ;;  %810 = vmatmul.mubr.f32.gmra.mxu1 %v683_v11  ;;  %v892_v10 = vld [vmem:[%s2585_s12 + $0xa0] sm:$0xff] }
  0x5b   : > { %1840 = vmatprep.subr.mxu0 %v2363_v20  ;;  %1920 = vmatprep.subr.mxu1 %v2363_v20  ;;  %v491_v20 = vld [vmem:[%s2428_s16 + $0xd8] sm:$0xff]  ;;  %v1101_v11 = vld [vmem:[%s2595_s15 + $0xa0] sm:$0xff] }
  0x5c   : > { %1841 = vmatpush3.msra.mxu0 %v2370_v21  ;;  %621 = vmatprep.mubr.f32.mxu0 %v487_v12  ;;  %v895_v12 = vld [vmem:[%s2585_s12 + $0xb8] sm:$0xff] }
  0x5d   : > { %814 = vmatprep.mubr.f32.mxu1 %v686_v13  ;;  %1921 = vmatpush3.msra.mxu1 %v2370_v21  ;;  %v690_v21 = vld [vmem:[%s2441_s26 + $0xd8] sm:$0xff] }
  0x5e   : > { %622 = vmatmul.mubr.f32.gmra.mxu0 %v486_v14  ;;  %815 = vmatmul.mubr.f32.gmra.mxu1 %v685_v15  ;;  %v1104_v13 = vld [vmem:[%s2595_s15 + $0xb8] sm:$0xff]  ;;  %v894_v14 = vld [vmem:[%s2585_s12 + $0xb0] sm:$0xff] }
  0x5f   : > { %1842 = vmatprep.subr.mxu0 %v2378_v22  ;;  %1922 = vmatprep.subr.mxu1 %v2378_v22  ;;  %v490_v22 = vld [vmem:[%s2428_s16 + $0xd0] sm:$0xff] }
  0x60   : > { %1843 = vmatpush3.msra.mxu0 %v2385_v23  ;;  %626 = vmatprep.mubr.f32.mxu0 %v489_v16  ;;  %v1103_v15 = vld [vmem:[%s2595_s15 + $0xb0] sm:$0xff]  ;;  %v897_v16 = vld [vmem:[%s2585_s12 + $0xc8] sm:$0xff] }
  0x61   : > { %819 = vmatprep.mubr.f32.mxu1 %v688_v17  ;;  %1923 = vmatpush3.msra.mxu1 %v2385_v23  ;;  %v493_v23 = vld [vmem:[%s2428_s16 + $0xe8] sm:$0xff] }
  0x62   : > { %627 = vmatmul.mubr.f32.gmra.mxu0 %v488_v18  ;;  %820 = vmatmul.mubr.f32.gmra.mxu1 %v687_v19  ;;  %v1106_v17 = vld [vmem:[%s2595_s15 + $0xc8] sm:$0xff]  ;;  %v896_v18 = vld [vmem:[%s2585_s12 + $0xc0] sm:$0xff] }
  0x63   : > { %1844 = vmatprep.subr.mxu0 %v2392_v24  ;;  %1924 = vmatprep.subr.mxu1 %v2392_v24  ;;  %v492_v24 = vld [vmem:[%s2428_s16 + $0xe0] sm:$0xff] }
  0x64   : > { %1845 = vmatpush3.msra.mxu0 %v2399_v25  ;;  %631 = vmatprep.mubr.f32.mxu0 %v491_v20  ;;  %v1105_v19 = vld [vmem:[%s2595_s15 + $0xc0] sm:$0xff]  ;;  %v899_v20 = vld [vmem:[%s2585_s12 + $0xd8] sm:$0xff] }
  0x65   : > { %824 = vmatprep.mubr.f32.mxu1 %v690_v21  ;;  %1925 = vmatpush3.msra.mxu1 %v2399_v25  ;;  %v495_v25 = vld [vmem:[%s2428_s16 + $0xf8] sm:$0xff] }
  0x66   : > { %632 = vmatmul.mubr.f32.gmra.mxu0 %v490_v22  ;;  %825 = vmatmul.mubr.f32.gmra.mxu1 %v689_v32  ;;  %v1108_v21 = vld [vmem:[%s2595_s15 + $0xd8] sm:$0xff]  ;;  %v898_v22 = vld [vmem:[%s2585_s12 + $0xd0] sm:$0xff] }
  0x67   : > { %1846 = vmatprep.subr.mxu0 %v2408_v26  ;;  %1926 = vmatprep.subr.mxu1 %v2408_v26  ;;  %v494_v26 = vld [vmem:[%s2428_s16 + $0xf0] sm:$0xff] }
  0x68   : > { %1847 = vmatpush3.msra.mxu0 %v2415_v27  ;;  %636 = vmatprep.mubr.f32.mxu0 %v493_v23  ;;  %v1107_v32 = vld [vmem:[%s2595_s15 + $0xd0] sm:$0xff]  ;;  %v901_v23 = vld [vmem:[%s2585_s12 + $0xe8] sm:$0xff] }
  0x69   : > { %829 = vmatprep.mubr.f32.mxu1 %v692_v33  ;;  %1927 = vmatpush3.msra.mxu1 %v2415_v27  ;;  %v873_v27 = vld [vmem:[%s2585_s12 + $0x8] sm:$0xff] }
  0x6a   : > { %637 = vmatmul.mubr.f32.gmra.mxu0 %v492_v24  ;;  %830 = vmatmul.mubr.f32.gmra.mxu1 %v691_v34  ;;  %v1110_v33 = vld [vmem:[%s2595_s15 + $0xe8] sm:$0xff]  ;;  %v900_v24 = vld [vmem:[%s2585_s12 + $0xe0] sm:$0xff] }
  0x6b   : > { %1848 = vmatprep.subr.mxu0 %v2422_v28  ;;  %1928 = vmatprep.subr.mxu1 %v2422_v28  ;;  %v1082_v28 = vld [vmem:[%s2595_s15 + $0x8] sm:$0xff]  ;;  %v1109_v34 = vld [vmem:[%s2595_s15 + $0xe0] sm:$0xff] }
  0x6c   : > { %1849 = vmatpush3.msra.mxu0 %v2435_v29  ;;  %641 = vmatprep.mubr.f32.mxu0 %v495_v25  ;;  %v903_v25 = vld [vmem:[%s2585_s12 + $0xf8] sm:$0xff] }
  0x6d   : > { %834 = vmatprep.mubr.f32.mxu1 %v694_v35  ;;  %1929 = vmatpush3.msra.mxu1 %v2435_v29  ;;  %v1084_v29 = vld [vmem:[%s2595_s15 + $0x18] sm:$0xff] }
  0x6e   : > { %642 = vmatmul.mubr.f32.gmra.mxu0 %v494_v26  ;;  %835 = vmatmul.mubr.f32.gmra.mxu1 %v693_v36  ;;  %v1112_v35 = vld [vmem:[%s2595_s15 + $0xf8] sm:$0xff]  ;;  %v902_v26 = vld [vmem:[%s2585_s12 + $0xf0] sm:$0xff] }
  0x6f   : > { %1850 = vmatprep.subr.mxu0 %v2448_v30  ;;  %1930 = vmatprep.subr.mxu1 %v2448_v30  ;;  %v1083_v30 = vld [vmem:[%s2595_s15 + $0x10] sm:$0xff] }
  0x70   : > { %1851 = vmatpush3.msra.mxu0 %v2455_v31  ;;  %968 = vmatprep.mubr.f32.mxu0 %v873_v27  ;;  %v1111_v36 = vld [vmem:[%s2595_s15 + $0xf0] sm:$0xff] }
  0x71   : > { %1931 = vmatpush3.msra.mxu1 %v2455_v31  ;;  %1177 = vmatprep.mubr.f32.mxu1 %v1082_v28  ;;  %v1085_v31 = vld [vmem:[%s2595_s15 + $0x20] sm:$0xff] }
  0x72   : > { %969 = vmatmul.mubr.f32.vlgmr.msra.gmra.mxu0 %v872_v37  ;;  %1178 = vmatmul.mubr.f32.vlgmr.msra.gmra.mxu1 %v1081_v38 }
  0x73   : > { %973 = vmatprep.mubr.f32.mxu0 %v875_v39  ;;  %1182 = vmatprep.mubr.f32.mxu1 %v1084_v29 }
  0x76   : > { %974 = vmatmul.mubr.f32.gmra.mxu0 %v874_v40  ;;  %1183 = vmatmul.mubr.f32.gmra.mxu1 %v1083_v30 }
  0x77   : > { %978 = vmatprep.mubr.f32.mxu0 %v877_v41  ;;  %1187 = vmatprep.mubr.f32.mxu1 %v1086_v42 }
  0x7a   : > { %979 = vmatmul.mubr.f32.gmra.mxu0 %v876_v43  ;;  %1188 = vmatmul.mubr.f32.gmra.mxu1 %v1085_v31 }
  0x7b   : > { %983 = vmatprep.mubr.f32.mxu0 %v879_v44  ;;  %1192 = vmatprep.mubr.f32.mxu1 %v1088_v45 }
  0x7e   : > { %984 = vmatmul.mubr.f32.gmra.mxu0 %v878_v46  ;;  %1193 = vmatmul.mubr.f32.gmra.mxu1 %v1087_v47 }
  0x7f   : > { %988 = vmatprep.mubr.f32.mxu0 %v881_v48  ;;  %1197 = vmatprep.mubr.f32.mxu1 %v1090_v49 }
  0x82   : > { %989 = vmatmul.mubr.f32.gmra.mxu0 %v880_v50  ;;  %1198 = vmatmul.mubr.f32.gmra.mxu1 %v1089_v51 }
  0x83   : > { %993 = vmatprep.mubr.f32.mxu0 %v883_v52  ;;  %1202 = vmatprep.mubr.f32.mxu1 %v1092_v53 }
  0x86   : > { %994 = vmatmul.mubr.f32.gmra.mxu0 %v882_v54  ;;  %1203 = vmatmul.mubr.f32.gmra.mxu1 %v1091_v55 }
  0x87   : > { %998 = vmatprep.mubr.f32.mxu0 %v885_v56  ;;  %1207 = vmatprep.mubr.f32.mxu1 %v1094_v57 }
  0x8a   : > { %999 = vmatmul.mubr.f32.gmra.mxu0 %v884_v58  ;;  %1208 = vmatmul.mubr.f32.gmra.mxu1 %v1093_v59 }
  0x8b   : > { %1003 = vmatprep.mubr.f32.mxu0 %v887_v60  ;;  %1212 = vmatprep.mubr.f32.mxu1 %v1096_v61 }
  0x8e   : > { %1004 = vmatmul.mubr.f32.gmra.mxu0 %v886_v62  ;;  %1213 = vmatmul.mubr.f32.gmra.mxu1 %v1095_v63 }
  0x8f   : > { %1008 = vmatprep.mubr.f32.mxu0 %v889_v0  ;;  %1217 = vmatprep.mubr.f32.mxu1 %v1098_v1 }
  0x92   : > { %1009 = vmatmul.mubr.f32.gmra.mxu0 %v888_v2  ;;  %1218 = vmatmul.mubr.f32.gmra.mxu1 %v1097_v3 }
  0x93   : > { %1013 = vmatprep.mubr.f32.mxu0 %v891_v4  ;;  %1222 = vmatprep.mubr.f32.mxu1 %v1100_v5 }
  0x96   : > { %1014 = vmatmul.mubr.f32.gmra.mxu0 %v890_v6  ;;  %1223 = vmatmul.mubr.f32.gmra.mxu1 %v1099_v7 }
  0x97   : > { %1018 = vmatprep.mubr.f32.mxu0 %v893_v8  ;;  %1227 = vmatprep.mubr.f32.mxu1 %v1102_v9 }
  0x9a   : > { %1019 = vmatmul.mubr.f32.gmra.mxu0 %v892_v10  ;;  %1228 = vmatmul.mubr.f32.gmra.mxu1 %v1101_v11 }
  0x9b   : > { %1023 = vmatprep.mubr.f32.mxu0 %v895_v12  ;;  %1232 = vmatprep.mubr.f32.mxu1 %v1104_v13 }
  0x9e   : > { %1024 = vmatmul.mubr.f32.gmra.mxu0 %v894_v14  ;;  %1233 = vmatmul.mubr.f32.gmra.mxu1 %v1103_v15 }
  0x9f   : > { %1028 = vmatprep.mubr.f32.mxu0 %v897_v16  ;;  %1237 = vmatprep.mubr.f32.mxu1 %v1106_v17 }
  0xa2   : > { %1029 = vmatmul.mubr.f32.gmra.mxu0 %v896_v18  ;;  %1238 = vmatmul.mubr.f32.gmra.mxu1 %v1105_v19 }
  0xa3   : > { %1033 = vmatprep.mubr.f32.mxu0 %v899_v20  ;;  %1242 = vmatprep.mubr.f32.mxu1 %v1108_v21 }
  0xa6   : > { %1034 = vmatmul.mubr.f32.gmra.mxu0 %v898_v22  ;;  %1243 = vmatmul.mubr.f32.gmra.mxu1 %v1107_v32 }
  0xa7   : > { %1038 = vmatprep.mubr.f32.mxu0 %v901_v23  ;;  %1247 = vmatprep.mubr.f32.mxu1 %v1110_v33 }
  0xaa   : > { %1039 = vmatmul.mubr.f32.gmra.mxu0 %v900_v24  ;;  %1248 = vmatmul.mubr.f32.gmra.mxu1 %v1109_v34 }
  0xab   : > { %1043 = vmatprep.mubr.f32.mxu0 %v903_v25  ;;  %1252 = vmatprep.mubr.f32.mxu1 %v1112_v35 }
  0xae   : > { %1044 = vmatmul.mubr.f32.gmra.mxu0 %v902_v26  ;;  %1253 = vmatmul.mubr.f32.gmra.mxu1 %v1111_v36  ;;  %v2776_v26 = vld [vmem:[%s3034_s5] ss:$0 sm:$0xff] }
  0xf2   : > { %v1692_v27 = vpop.f32.mrf.mxu0  ;;  %v1772_v28 = vpop.f32.mrf.mxu1 }
  0xf4   : > { %v1693_v37 = vpop.f32.mrf.mxu0  ;;  %v1773_v38 = vpop.f32.mrf.mxu1 }
  0xf5   : > { %v1694_v24 = vadd.f32 %v1693_v37, %v1692_v27  ;;  %v1774_v34 = vadd.f32 %v1773_v38, %v1772_v28 }
  0xf6   : > { %v2667_v39 = vpop.f32.mrf.mxu0  ;;  %v2669_v29 = vpop.f32.mrf.mxu1 }
  0xf8   : > { %v1696_v40 = vpop.f32.mrf.mxu0  ;;  %v2671_v30 = vpop.f32.mrf.mxu1 }
  0xf9   : > { %v1697_v27 = vadd.f32 %v1696_v40, %v2667_v39  ;;  %v1777_v38 = vadd.f32 %v2671_v30, %v2669_v29 }
  0xfa   : > { %v2673_v41 = vpop.f32.mrf.mxu0  ;;  %v2675_v42 = vpop.f32.mrf.mxu1 }
  0xfb   : > { %v767_v40 = vadd.f32 %v1777_v38, %v2776_v26 }
  0xfc   : > { %v1699_v43 = vpop.f32.mrf.mxu0  ;;  %v1779_v31 = vpop.f32.mrf.mxu1 }
  0xfe   : > { %v2677_v44 = vpop.f32.mrf.mxu0  ;;  %v2679_v45 = vpop.f32.mrf.mxu1 }
 0x100   : > { %v2681_v46 = vpop.f32.mrf.mxu0  ;;  %v2683_v47 = vpop.f32.mrf.mxu1 }
 0x101   : > { %v1703_v30 = vadd.f32 %v2681_v46, %v2677_v44  ;;  %v841_v46 = vmax.f32 %v767_v40, 0.0 }
 0x102   : > { %v2685_v48 = vpop.f32.mrf.mxu0  ;;  %v2687_v49 = vpop.f32.mrf.mxu1 }
 0x104   : > { %v2689_v50 = vpop.f32.mrf.mxu0  ;;  %v2691_v51 = vpop.f32.mrf.mxu1 }
 0x106   : > { %v2693_v52 = vpop.f32.mrf.mxu0  ;;  %v2695_v53 = vpop.f32.mrf.mxu1 }
 0x108   : > { %v2697_v54 = vpop.f32.mrf.mxu0  ;;  %v2699_v55 = vpop.f32.mrf.mxu1 }
 0x10a   : > { %v2701_v56 = vpop.f32.mrf.mxu0  ;;  %v2703_v57 = vpop.f32.mrf.mxu1 }
 0x10c   : > { %v2705_v58 = vpop.f32.mrf.mxu0  ;;  %v2707_v59 = vpop.f32.mrf.mxu1 }
 0x10e   : > { %v2709_v60 = vpop.f32.mrf.mxu0  ;;  %v2711_v61 = vpop.f32.mrf.mxu1 }
 0x110   : > { %v2713_v62 = vpop.f32.mrf.mxu0  ;;  %v2715_v63 = vpop.f32.mrf.mxu1 }
 0x112   : > { %v2717_v0 = vpop.f32.mrf.mxu0  ;;  %v2719_v1 = vpop.f32.mrf.mxu1 }
 0x114   : > { %v2721_v2 = vpop.f32.mrf.mxu0  ;;  %v2723_v3 = vpop.f32.mrf.mxu1 }
 0x116   : > { %v2725_v4 = vpop.f32.mrf.mxu0  ;;  %v2727_v5 = vpop.f32.mrf.mxu1 }
 0x118   : > { %v2729_v6 = vpop.f32.mrf.mxu0  ;;  %v2731_v7 = vpop.f32.mrf.mxu1 }
 0x11a   : > { %v2733_v8 = vpop.f32.mrf.mxu0  ;;  %v2735_v9 = vpop.f32.mrf.mxu1 }
 0x11c   : > { %v2737_v10 = vpop.f32.mrf.mxu0  ;;  %v2739_v11 = vpop.f32.mrf.mxu1 }
 0x11e   : > { %v2741_v12 = vpop.f32.mrf.mxu0  ;;  %v2743_v13 = vpop.f32.mrf.mxu1 }
 0x120   : > { %v2745_v14 = vpop.f32.mrf.mxu0  ;;  %v2747_v15 = vpop.f32.mrf.mxu1 }
 0x122   : > { %v2749_v16 = vpop.f32.mrf.mxu0  ;;  %v2751_v17 = vpop.f32.mrf.mxu1 }
 0x124   : > { %v2753_v18 = vpop.f32.mrf.mxu0  ;;  %v2755_v19 = vpop.f32.mrf.mxu1 }
 0x126   : > { %v2757_v20 = vpop.f32.mrf.mxu0  ;;  %v2759_v21 = vpop.f32.mrf.mxu1 }
 0x127   : > { %3037 = vst [vmem:[#allocation3_spill] sm:$0xff] %v2757_v20  ;;  %3038 = vst [vmem:[#allocation4_spill] sm:$0xff] %v2759_v21 }
 0x128   : > { %v2761_v22 = vpop.f32.mrf.mxu0  ;;  %v2763_v32 = vpop.f32.mrf.mxu1 }
 0x129   : > { %3039 = vst [vmem:[#allocation5_spill] sm:$0xff] %v2761_v22  ;;  %3040 = vst [vmem:[#allocation6_spill] sm:$0xff] %v2763_v32  ;;  %v569_v32 = vadd.f32 %v1694_v24, %v2776_v26 }
 0x12a   : > { %v2765_v23 = vpop.f32.mrf.mxu0  ;;  %v2767_v33 = vpop.f32.mrf.mxu1 }
 0x12b   : > { %3041 = vst [vmem:[#allocation7_spill] sm:$0xff] %v2765_v23  ;;  %3042 = vst [vmem:[#allocation8_spill] sm:$0xff] %v2767_v33  ;;  %v762_v23 = vadd.f32 %v1774_v34, %v2776_v26  ;;  %v574_v34 = vadd.f32 %v1697_v27, %v2776_v26 }
 0x12c   : > { %v2769_v25 = vpop.f32.mrf.mxu0  ;;  %v2771_v35 = vpop.f32.mrf.mxu1 }
 0x12d   : > { %3043 = vst [vmem:[#allocation9_spill] sm:$0xff] %v2769_v25  ;;  %3044 = vst [vmem:[#allocation10_spill] sm:$0xff] %v2771_v35  ;;  %v1700_v35 = vadd.f32 %v1699_v43, %v2673_v41  ;;  %v647_v25 = vmax.f32 %v569_v32, 0.0  ;;  %v840_v24 = vmax.f32 %v762_v23, 0.0  ;;  %v1783_v41 = vadd.f32 %v2683_v47, %v2679_v45 }
 0x12e   : > { %v2778_v36 = vpop.f32.mrf.mxu0  ;;  %v2780_v21 = vpop.f32.mrf.mxu1 }
 0x12f   : > { %3045 = vst [vmem:[#allocation11_spill] sm:$0xff] %v2778_v36  ;;  %3046 = vst [vmem:[#allocation12_spill] sm:$0xff] %v2780_v21  ;;  %v1780_v36 = vadd.f32 %v1779_v31, %v2675_v42  ;;  %v579_v20 = vadd.f32 %v1700_v35, %v2776_v26  ;;  %v856_v23 = vmax.f32 %v647_v25, %v840_v24 }
 0x130   : > { %v2785_v28 = vpop.f32.mrf.mxu0  ;;  %v2787_v37 = vpop.f32.mrf.mxu1  ;;  %v777_v25 = vadd.f32 %v1783_v41, %v2776_v26 }
 0x131   : > { %3047 = vst [vmem:[#allocation13_spill] sm:$0xff] %v2785_v28  ;;  %3048 = vst [vmem:[#allocation14_spill] sm:$0xff] %v2787_v37  ;;  %v772_v29 = vadd.f32 %v1780_v36, %v2776_v26  ;;  %v649_v27 = vmax.f32 %v579_v20, 0.0  ;;  %v1709_v20 = vadd.f32 %v2697_v54, %v2693_v52 }
 0x132   : > { %v1852_v33 = vpop.f32.mrf.mxu0  ;;  %v1932_v21 = vpop.f32.mrf.mxu1 }
 0x133   : > { %v842_v38 = vmax.f32 %v772_v29, 0.0 }
 0x134   : > { %v1853_v22 = vpop.f32.mrf.mxu0  ;;  %v1933_v39 = vpop.f32.mrf.mxu1 }
 0x135   : > { %v1854_v28 = vadd.f32 %v1853_v22, %v1852_v33  ;;  %v1934_v37 = vadd.f32 %v1933_v39, %v1932_v21  ;;  %v648_v22 = vmax.f32 %v574_v34, 0.0  ;;  %v1706_v21 = vadd.f32 %v2689_v50, %v2685_v48 }
 0x136   : > { %v1855_v42 = vpop.f32.mrf.mxu0  ;;  %v1935_v43 = vpop.f32.mrf.mxu1  ;;  %v1786_v33 = vadd.f32 %v2691_v51, %v2687_v49 }
 0x137   : > { %v971_v31 = vadd.f32 %v1854_v28, %v2776_v26  ;;  %v1180_v32 = vadd.f32 %v1934_v37, %v2776_v26  ;;  %v584_v28 = vadd.f32 %v1703_v30, %v2776_v26  ;;  %v589_v51 = vadd.f32 %v1706_v21, %v2776_v26 }
 0x138   : > { %v1856_v35 = vpop.f32.mrf.mxu0  ;;  %v1936_v44 = vpop.f32.mrf.mxu1  ;;  %v782_v39 = vadd.f32 %v1786_v33, %v2776_v26  ;;  %v857_v30 = vmax.f32 %v648_v22, %v841_v46  ;;  %v843_v21 = vmax.f32 %v777_v25, 0.0 }
 0x139   : > { %v1049_v36 = vmax.f32 %v971_v31, 0.0  ;;  %v1857_v45 = vadd.f32 %v1856_v35, %v1855_v42  ;;  %v1937_v47 = vadd.f32 %v1936_v44, %v1935_v43  ;;  %v1258_v48 = vmax.f32 %v1180_v32, 0.0 }
 0x13a   : > { %v1858_v37 = vpop.f32.mrf.mxu0  ;;  %v1938_v24 = vpop.f32.mrf.mxu1  ;;  %v858_v31 = vmax.f32 %v649_v27, %v842_v38  ;;  %v1789_v32 = vadd.f32 %v2699_v55, %v2695_v53  ;;  %v651_v33 = vmax.f32 %v589_v51, 0.0  ;;  %v844_v46 = vmax.f32 %v782_v39, 0.0 }
 0x13b   : > { %v1065_v34 = vmax.f32 %v856_v23, %v1049_v36  ;;  %v976_v50 = vadd.f32 %v1857_v45, %v2776_v26  ;;  %v1185_v49 = vadd.f32 %v1937_v47, %v2776_v26  ;;  %v650_v23 = vmax.f32 %v584_v28, 0.0 }
 0x13c   : > { %v1859_v40 = vpop.f32.mrf.mxu0  ;;  %v1939_v29 = vpop.f32.mrf.mxu1  ;;  %v2823_v45 = vadd.f32 %v1709_v20, %v2776_v26 }
 0x13d   : > { %v1274_v42 = vmax.f32 %v1065_v34, %v1258_v48  ;;  %v1050_v41 = vmax.f32 %v976_v50, 0.0  ;;  %v1860_v43 = vadd.f32 %v1859_v40, %v1858_v37  ;;  %v1940_v35 = vadd.f32 %v1939_v29, %v1938_v24 }
 0x13e   : > { %v1861_v44 = vpop.f32.mrf.mxu0  ;;  %v1941_v36 = vpop.f32.mrf.mxu1  ;;  %v1259_v54 = vmax.f32 %v1185_v49, 0.0  ;;  %v787_v37 = vadd.f32 %v1789_v32, %v2776_v26  ;;  %v1712_v24 = vadd.f32 %v2705_v58, %v2701_v56  ;;  %v1792_v34 = vadd.f32 %v2707_v59, %v2703_v57 }
 0x13f   : > { %1290 = vst [vmem:[%s2818_s21] sm:$0xff] %v1274_v42  ;;  %v1066_v52 = vmax.f32 %v857_v30, %v1050_v41  ;;  %v981_v22 = vadd.f32 %v1860_v43, %v2776_v26  ;;  %v1190_v53 = vadd.f32 %v1940_v35, %v2776_v26  ;;  %v859_v40 = vmax.f32 %v650_v23, %v843_v21 }
 0x140   : > { %v1862_v55 = vpop.f32.mrf.mxu0  ;;  %v1942_v47 = vpop.f32.mrf.mxu1  ;;  %v860_v29 = vmax.f32 %v651_v33, %v844_v46  ;;  %v652_v41 = vmax.f32 %v2823_v45, 0.0  ;;  %v599_v57 = vadd.f32 %v1712_v24, %v2776_v26  ;;  %v792_v59 = vadd.f32 %v1792_v34, %v2776_v26 }
 0x141   : > { %v1275_v27 = vmax.f32 %v1066_v52, %v1259_v54  ;;  %v1051_v38 = vmax.f32 %v981_v22, 0.0  ;;  %v1863_v28 = vadd.f32 %v1862_v55, %v1861_v44  ;;  %v1943_v25 = vadd.f32 %v1942_v47, %v1941_v36 }
 0x142   : > { %v1864_v48 = vpop.f32.mrf.mxu0  ;;  %v1944_v50 = vpop.f32.mrf.mxu1  ;;  %v1260_v51 = vmax.f32 %v1190_v53, 0.0  ;;  %v845_v36 = vmax.f32 %v787_v37, 0.0  ;;  %v1795_v54 = vadd.f32 %v2715_v63, %v2711_v61  ;;  %v1718_v22 = vadd.f32 %v2721_v2, %v2717_v0 }
 0x143   : > { %1291 = vst [vmem:[%s2818_s21 + $0x8] sm:$0xff] %v1275_v27  ;;  %v1067_v49 = vmax.f32 %v858_v31, %v1051_v38  ;;  %v986_v39 = vadd.f32 %v1863_v28, %v2776_v26  ;;  %v1195_v20 = vadd.f32 %v1943_v25, %v2776_v26  ;;  %v1715_v31 = vadd.f32 %v2713_v62, %v2709_v60 }
 0x144   : > { %v1865_v30 = vpop.f32.mrf.mxu0  ;;  %v1945_v42 = vpop.f32.mrf.mxu1  ;;  %v1798_v33 = vadd.f32 %v2723_v3, %v2719_v1  ;;  %v653_v27 = vmax.f32 %v599_v57, 0.0  ;;  %v846_v38 = vmax.f32 %v792_v59, 0.0  ;;  %v797_v3 = vadd.f32 %v1795_v54, %v2776_v26 }
 0x145   : > { %v1276_v56 = vmax.f32 %v1067_v49, %v1260_v51  ;;  %v1052_v58 = vmax.f32 %v986_v39, 0.0  ;;  %v1866_v43 = vadd.f32 %v1865_v30, %v1864_v48  ;;  %v1946_v32 = vadd.f32 %v1945_v42, %v1944_v50 }
 0x146   : > { %v1867_v35 = vpop.f32.mrf.mxu0  ;;  %v1947_v44 = vpop.f32.mrf.mxu1  ;;  %v1261_v21 = vmax.f32 %v1195_v20, 0.0  ;;  %v604_v28 = vadd.f32 %v1715_v31, %v2776_v26  ;;  %v609_v37 = vadd.f32 %v1718_v22, %v2776_v26  ;;  %v802_v24 = vadd.f32 %v1798_v33, %v2776_v26 }
 0x147   : > { %1292 = vst [vmem:[%s2818_s21 + $0x10] sm:$0xff] %v1276_v56  ;;  %v1068_v23 = vmax.f32 %v859_v40, %v1052_v58  ;;  %v991_v52 = vadd.f32 %v1866_v43, %v2776_v26  ;;  %v1200_v60 = vadd.f32 %v1946_v32, %v2776_v26  ;;  %v861_v50 = vmax.f32 %v652_v41, %v845_v36 }
 0x148   : > { %v1868_v62 = vpop.f32.mrf.mxu0  ;;  %v1948_v46 = vpop.f32.mrf.mxu1  ;;  %v862_v20 = vmax.f32 %v653_v27, %v846_v38  ;;  %v1721_v40 = vadd.f32 %v2729_v6, %v2725_v4  ;;  %v654_v58 = vmax.f32 %v604_v28, 0.0  ;;  %v847_v41 = vmax.f32 %v797_v3, 0.0 }
 0x149   : > { %v1277_v45 = vmax.f32 %v1068_v23, %v1261_v21  ;;  %v1053_v53 = vmax.f32 %v991_v52, 0.0  ;;  %v1869_v55 = vadd.f32 %v1868_v62, %v1867_v35  ;;  %v1949_v47 = vadd.f32 %v1948_v46, %v1947_v44 }
 0x14a   : > { %v1870_v25 = vpop.f32.mrf.mxu0  ;;  %v1950_v61 = vpop.f32.mrf.mxu1  ;;  %v1262_v0 = vmax.f32 %v1200_v60, 0.0  ;;  %v655_v31 = vmax.f32 %v609_v37, 0.0  ;;  %v848_v32 = vmax.f32 %v802_v24, 0.0  ;;  %v614_v23 = vadd.f32 %v1721_v40, %v2776_v26 }
 0x14b   : > { %1293 = vst [vmem:[%s2818_s21 + $0x18] sm:$0xff] %v1277_v45  ;;  %v1069_v63 = vmax.f32 %v860_v29, %v1053_v53  ;;  %v996_v2 = vadd.f32 %v1869_v55, %v2776_v26  ;;  %v1205_v1 = vadd.f32 %v1949_v47, %v2776_v26  ;;  %v1801_v29 = vadd.f32 %v2731_v7, %v2727_v5 }
 0x14c   : > { %v1871_v34 = vpop.f32.mrf.mxu0  ;;  %v1951_v48 = vpop.f32.mrf.mxu1  ;;  %v1724_v52 = vadd.f32 %v2737_v10, %v2733_v8  ;;  %v1804_v54 = vadd.f32 %v2739_v11, %v2735_v9  ;;  %v863_v53 = vmax.f32 %v654_v58, %v847_v41  ;;  %v864_v27 = vmax.f32 %v655_v31, %v848_v32 }
 0x14d   : > { %v1278_v49 = vmax.f32 %v1069_v63, %v1262_v0  ;;  %v1054_v51 = vmax.f32 %v996_v2, 0.0  ;;  %v1872_v39 = vadd.f32 %v1871_v34, %v1870_v25  ;;  %v1952_v30 = vadd.f32 %v1951_v48, %v1950_v61 }
 0x14e   : > { %v1873_v42 = vpop.f32.mrf.mxu0  ;;  %v1953_v56 = vpop.f32.mrf.mxu1  ;;  %v1263_v57 = vmax.f32 %v1205_v1, 0.0  ;;  %v807_v21 = vadd.f32 %v1801_v29, %v2776_v26  ;;  %v656_v10 = vmax.f32 %v614_v23, 0.0  ;;  %v619_v9 = vadd.f32 %v1724_v52, %v2776_v26 }
 0x14f   : > { %1294 = vst [vmem:[%s2818_s21 + $0x20] sm:$0xff] %v1278_v49  ;;  %v1070_v43 = vmax.f32 %v861_v50, %v1054_v51  ;;  %v1001_v59 = vadd.f32 %v1872_v39, %v2776_v26  ;;  %v1210_v35 = vadd.f32 %v1952_v30, %v2776_v26  ;;  %v812_v11 = vadd.f32 %v1804_v54, %v2776_v26 }
 0x150   : > { %v1874_v44 = vpop.f32.mrf.mxu0  ;;  %v1954_v4 = vpop.f32.mrf.mxu1  ;;  %v849_v0 = vmax.f32 %v807_v21, 0.0  ;;  %v1727_v37 = vadd.f32 %v2745_v14, %v2741_v12  ;;  %v1807_v24 = vadd.f32 %v2747_v15, %v2743_v13  ;;  %v1730_v34 = vadd.f32 %v2753_v18, %v2749_v16 }
 0x151   : > { %v1279_v6 = vmax.f32 %v1070_v43, %v1263_v57  ;;  %v1055_v36 = vmax.f32 %v1001_v59, 0.0  ;;  %v1875_v5 = vadd.f32 %v1874_v44, %v1873_v42  ;;  %v1955_v7 = vadd.f32 %v1954_v4, %v1953_v56  ;;  %v3050_v44 = vld [vmem:[#allocation5_spill] sm:$0xff] }
 0x152   : > { %v1876_v22 = vpop.f32.mrf.mxu0  ;;  %v1956_v33 = vpop.f32.mrf.mxu1  ;;  %v1264_v62 = vmax.f32 %v1210_v35, 0.0  ;;  %v657_v29 = vmax.f32 %v619_v9, 0.0  ;;  %v850_v30 = vmax.f32 %v812_v11, 0.0  ;;  %v1810_v42 = vadd.f32 %v2755_v19, %v2751_v17  ;;  %v3049_v35 = vld [vmem:[#allocation3_spill] sm:$0xff] }
 0x153   : > { %1295 = vst [vmem:[%s2818_s21 + $0x28] sm:$0xff] %v1279_v6  ;;  %v1071_v60 = vmax.f32 %v862_v20, %v1055_v36  ;;  %v1006_v46 = vadd.f32 %v1875_v5, %v2776_v26  ;;  %v1215_v45 = vadd.f32 %v1955_v7, %v2776_v26  ;;  %v624_v56 = vadd.f32 %v1727_v37, %v2776_v26  ;;  %v3051_v6 = vld [vmem:[#allocation4_spill] sm:$0xff]  ;;  %v3052_v36 = vld [vmem:[#allocation6_spill] sm:$0xff]  ;;  %v3053_v11 = vld [vmem:[#allocation7_spill] sm:$0xff] }
 0x154   : > { %v1877_v55 = vpop.f32.mrf.mxu0  ;;  %v1957_v47 = vpop.f32.mrf.mxu1  ;;  %v817_v58 = vadd.f32 %v1807_v24, %v2776_v26  ;;  %v629_v43 = vadd.f32 %v1730_v34, %v2776_v26  ;;  %v865_v41 = vmax.f32 %v656_v10, %v849_v0  ;;  %v822_v32 = vadd.f32 %v1810_v42, %v2776_v26  ;;  %v3055_v24 = vld [vmem:[#allocation8_spill] sm:$0xff]  ;;  %v3056_v34 = vld [vmem:[#allocation10_spill] sm:$0xff] }
 0x155   : > { %v1280_v38 = vmax.f32 %v1071_v60, %v1264_v62  ;;  %v1056_v28 = vmax.f32 %v1006_v46, 0.0  ;;  %v1878_v8 = vadd.f32 %v1877_v55, %v1876_v22  ;;  %v1958_v25 = vadd.f32 %v1957_v47, %v1956_v33 }
 0x156   : > { %v1879_v61 = vpop.f32.mrf.mxu0  ;;  %v1959_v63 = vpop.f32.mrf.mxu1  ;;  %v1265_v1 = vmax.f32 %v1215_v45, 0.0  ;;  %v1733_v4 = vadd.f32 %v3050_v44, %v3049_v35  ;;  %v1813_v5 = vadd.f32 %v3052_v36, %v3051_v6  ;;  %v866_v52 = vmax.f32 %v657_v29, %v850_v30 }
 0x157   : > { %1296 = vst [vmem:[%s2818_s21 + $0x30] sm:$0xff] %v1280_v38  ;;  %v1072_v2 = vmax.f32 %v863_v53, %v1056_v28  ;;  %v1011_v3 = vadd.f32 %v1878_v8, %v2776_v26  ;;  %v1220_v48 = vadd.f32 %v1958_v25, %v2776_v26  ;;  %v658_v60 = vmax.f32 %v624_v56, 0.0  ;;  %v3054_v25 = vld [vmem:[#allocation9_spill] sm:$0xff] }
 0x158   : > { %v1880_v50 = vpop.f32.mrf.mxu0  ;;  %v1960_v49 = vpop.f32.mrf.mxu1  ;;  %v851_v62 = vmax.f32 %v817_v58, 0.0  ;;  %v659_v46 = vmax.f32 %v629_v43, 0.0  ;;  %v852_v8 = vmax.f32 %v822_v32, 0.0  ;;  %v634_v10 = vadd.f32 %v1733_v4, %v2776_v26  ;;  %v3057_v43 = vld [vmem:[#allocation11_spill] sm:$0xff] }
 0x159   : > { %v1281_v51 = vmax.f32 %v1072_v2, %v1265_v1  ;;  %v1057_v39 = vmax.f32 %v1011_v3, 0.0  ;;  %v1881_v20 = vadd.f32 %v1880_v50, %v1879_v61  ;;  %v1961_v40 = vadd.f32 %v1960_v49, %v1959_v63 }
 0x15a   : > { %v1882_v12 = vpop.f32.mrf.mxu0  ;;  %v1962_v14 = vpop.f32.mrf.mxu1  ;;  %v1266_v15 = vmax.f32 %v1220_v48, 0.0  ;;  %v827_v9 = vadd.f32 %v1813_v5, %v2776_v26  ;;  %v1736_v61 = vadd.f32 %v3054_v25, %v3053_v11  ;;  %v1816_v48 = vadd.f32 %v3056_v34, %v3055_v24 }
 0x15b   : > { %1297 = vst [vmem:[%s2818_s21 + $0x38] sm:$0xff] %v1281_v51  ;;  %v1073_v13 = vmax.f32 %v864_v27, %v1057_v39  ;;  %v1016_v16 = vadd.f32 %v1881_v20, %v2776_v26  ;;  %v1225_v18 = vadd.f32 %v1961_v40, %v2776_v26  ;;  %v867_v51 = vmax.f32 %v658_v60, %v851_v62 }
 0x15c   : > { %v1883_v57 = vpop.f32.mrf.mxu0  ;;  %v1963_v59 = vpop.f32.mrf.mxu1  ;;  %v868_v29 = vmax.f32 %v659_v46, %v852_v8  ;;  %v660_v30 = vmax.f32 %v634_v10, 0.0  ;;  %v853_v42 = vmax.f32 %v827_v9, 0.0  ;;  %v832_v58 = vadd.f32 %v1816_v48, %v2776_v26 }
 0x15d   : > { %v1282_v17 = vmax.f32 %v1073_v13, %v1266_v15  ;;  %v1058_v19 = vmax.f32 %v1016_v16, 0.0  ;;  %v1884_v31 = vadd.f32 %v1883_v57, %v1882_v12  ;;  %v1964_v7 = vadd.f32 %v1963_v59, %v1962_v14  ;;  %v3058_v57 = vld [vmem:[#allocation13_spill] sm:$0xff] }
 0x15e   : > { %v1885_v23 = vpop.f32.mrf.mxu0  ;;  %v1965_v21 = vpop.f32.mrf.mxu1  ;;  %v1267_v22 = vmax.f32 %v1225_v18, 0.0  ;;  %v639_v15 = vadd.f32 %v1736_v61, %v2776_v26  ;;  %v1739_v59 = vadd.f32 %v3058_v57, %v3057_v43 }
 0x15f   : > { %1298 = vst [vmem:[%s2818_s21 + $0x40] sm:$0xff] %v1282_v17  ;;  %v1074_v54 = vmax.f32 %v865_v41, %v1058_v19  ;;  %v1021_v33 = vadd.f32 %v1884_v31, %v2776_v26  ;;  %v1230_v45 = vadd.f32 %v1964_v7, %v2776_v26  ;;  %v3059_v41 = vld [vmem:[#allocation12_spill] sm:$0xff]  ;;  %v3060_v17 = vld [vmem:[#allocation14_spill] sm:$0xff] }
 0x160   : > { %v1886_v53 = vpop.f32.mrf.mxu0  ;;  %v1966_v55 = vpop.f32.mrf.mxu1  ;;  %v1819_v19 = vadd.f32 %v3060_v17, %v3059_v41  ;;  %v644_v60 = vadd.f32 %v1739_v59, %v2776_v26 }
 0x161   : > { %v1283_v47 = vmax.f32 %v1074_v54, %v1267_v22  ;;  %v1059_v27 = vmax.f32 %v1021_v33, 0.0  ;;  %v1887_v38 = vadd.f32 %v1886_v53, %v1885_v23  ;;  %v1967_v28 = vadd.f32 %v1966_v55, %v1965_v21 }
 0x162   : > { %v1888_v63 = vpop.f32.mrf.mxu0  ;;  %v1968_v0 = vpop.f32.mrf.mxu1  ;;  %v1268_v1 = vmax.f32 %v1230_v45, 0.0  ;;  %v661_v22 = vmax.f32 %v639_v15, 0.0  ;;  %v854_v33 = vmax.f32 %v832_v58, 0.0  ;;  %v837_v62 = vadd.f32 %v1819_v19, %v2776_v26 }
 0x163   : > { %1299 = vst [vmem:[%s2818_s21 + $0x48] sm:$0xff] %v1283_v47  ;;  %v1075_v2 = vmax.f32 %v866_v52, %v1059_v27  ;;  %v1026_v3 = vadd.f32 %v1887_v38, %v2776_v26  ;;  %v1235_v37 = vadd.f32 %v1967_v28, %v2776_v26  ;;  %v869_v53 = vmax.f32 %v660_v30, %v853_v42 }
 0x164   : > { %v1889_v50 = vpop.f32.mrf.mxu0  ;;  %v1969_v49 = vpop.f32.mrf.mxu1  ;;  %v870_v25 = vmax.f32 %v661_v22, %v854_v33  ;;  %v662_v61 = vmax.f32 %v644_v60, 0.0 }
 0x165   : > { %v1284_v39 = vmax.f32 %v1075_v2, %v1268_v1  ;;  %v1060_v20 = vmax.f32 %v1026_v3, 0.0  ;;  %v1890_v40 = vadd.f32 %v1889_v50, %v1888_v63  ;;  %v1970_v12 = vadd.f32 %v1969_v49, %v1968_v0 }
 0x166   : > { %v1891_v14 = vpop.f32.mrf.mxu0  ;;  %v1971_v13 = vpop.f32.mrf.mxu1  ;;  %v1269_v18 = vmax.f32 %v1235_v37, 0.0  ;;  %v855_v63 = vmax.f32 %v837_v62, 0.0 }
 0x167   : > { %1300 = vst [vmem:[%s2818_s21 + $0x50] sm:$0xff] %v1284_v39  ;;  %v1076_v16 = vmax.f32 %v867_v51, %v1060_v20  ;;  %v1031_v56 = vadd.f32 %v1890_v40, %v2776_v26  ;;  %v1240_v31 = vadd.f32 %v1970_v12, %v2776_v26 }
 0x168   : > { %v1892_v32 = vpop.f32.mrf.mxu0  ;;  %v1972_v35 = vpop.f32.mrf.mxu1  ;;  %v871_v39 = vmax.f32 %v662_v61, %v855_v63 }
 0x169   : > { %v1285_v44 = vmax.f32 %v1076_v16, %v1269_v18  ;;  %v1061_v4 = vmax.f32 %v1031_v56, 0.0  ;;  %v1893_v6 = vadd.f32 %v1892_v32, %v1891_v14  ;;  %v1973_v36 = vadd.f32 %v1972_v35, %v1971_v13 }
 0x16a   : > { %v1894_v5 = vpop.f32.mrf.mxu0  ;;  %v1974_v7 = vpop.f32.mrf.mxu1  ;;  %v1270_v21 = vmax.f32 %v1240_v31, 0.0 }
 0x16b   : > { %1301 = vst [vmem:[%s2818_s21 + $0x58] sm:$0xff] %v1285_v44  ;;  %v1077_v23 = vmax.f32 %v868_v29, %v1061_v4  ;;  %v1036_v52 = vadd.f32 %v1893_v6, %v2776_v26  ;;  %v1245_v54 = vadd.f32 %v1973_v36, %v2776_v26 }
 0x16c   : > { %v1895_v46 = vpop.f32.mrf.mxu0  ;;  %v1975_v45 = vpop.f32.mrf.mxu1 }
 0x16d   : > { %v1286_v55 = vmax.f32 %v1077_v23, %v1270_v21  ;;  %v1062_v47 = vmax.f32 %v1036_v52, 0.0  ;;  %v1896_v27 = vadd.f32 %v1895_v46, %v1894_v5  ;;  %v1976_v38 = vadd.f32 %v1975_v45, %v1974_v7 }
 0x16e   : > { %v1897_v28 = vpop.f32.mrf.mxu0  ;;  %v1977_v8 = vpop.f32.mrf.mxu1  ;;  %v1271_v9 = vmax.f32 %v1245_v54, 0.0 }
 0x16f   : > { %1302 = vst [vmem:[%s2818_s21 + $0x60] sm:$0xff] %v1286_v55  ;;  %v1078_v10 = vmax.f32 %v869_v53, %v1062_v47  ;;  %v1041_v11 = vadd.f32 %v1896_v27, %v2776_v26  ;;  %v1250_v0 = vadd.f32 %v1976_v38, %v2776_v26 }
 0x170   : > { %v1898_v2 = vpop.f32.mrf.mxu0  ;;  %v1978_v1 = vpop.f32.mrf.mxu1 }
 0x171   : > { %v1287_v3 = vmax.f32 %v1078_v10, %v1271_v9  ;;  %v1063_v37 = vmax.f32 %v1041_v11, 0.0  ;;  %v1899_v24 = vadd.f32 %v1898_v2, %v1897_v28  ;;  %v1979_v34 = vadd.f32 %v1978_v1, %v1977_v8 }
 0x172   : > { %v1272_v50 = vmax.f32 %v1250_v0, 0.0 }
 0x173   : > { %1303 = vst [vmem:[%s2818_s21 + $0x68] sm:$0xff] %v1287_v3  ;;  %v1079_v48 = vmax.f32 %v870_v25, %v1063_v37  ;;  %v1046_v49 = vadd.f32 %v1899_v24, %v2776_v26  ;;  %v1255_v51 = vadd.f32 %v1979_v34, %v2776_v26 }
 0x175   : > { %v1288_v20 = vmax.f32 %v1079_v48, %v1272_v50  ;;  %v1064_v40 = vmax.f32 %v1046_v49, 0.0  ;;  %v1273_v30 = vmax.f32 %v1255_v51, 0.0 }
 0x177   : > { %1304 = vst [vmem:[%s2818_s21 + $0x70] sm:$0xff] %v1288_v20  ;;  %v1080_v29 = vmax.f32 %v871_v39, %v1064_v40  ;;  %1312 = sbr.rel (!%p2216_p4) target bundleno = 421 (0x1a5), region = 48 }
 0x179   : > { %v1289_v42 = vmax.f32 %v1080_v29, %v1273_v30 }
 0x17b   : > { %1305 = vst [vmem:[%s2818_s21 + $0x78] sm:$0xff] %v1289_v42 }
 0x17c   : > { %s3068_s20 = smov (!%p1315_p8, %s1314_s20), 16 }
 0x17d   : > { %s1638_s8 = sshll.u32 %s3068_s20, 7 }
 0x17e   : > { %p1641_p9 = scmp.eq.s32.totalorder %s1638_s8, 0 }
 0x17f   : > { %s2942_s9 = sshrl.u32 (!%p1641_p9), %s3068_s20, 4 }
 0x180   : > { %1323 = sbr.rel (%p1641_p9) target bundleno = 421 (0x1a5), region = 52  ;;  %p1642_p10 = scmp.le.s32.totalorder (!%p1641_p9), %s2942_s9, 0 }
 0x185   : > { %1556 = sbr.rel (%p1642_p10) target bundleno = 404 (0x194), region = 137  ;;  %s3061_s24 = smov (!%p1642_p10), %s2936_s30 }
 0x186   : > { %s3062_s29 = smov (!%p1642_p10), %s2818_s21  ;;  %s2951_s18 = smov (!%p1642_p10), 0  }
 0x187   : > { %s2953_s10 = smov (!%p1642_p10), 0  }
 0x18a LB: >> { %v1416_v26 = vld [vmem:[%s2130_s29] sm:$0xff]  ;;  %v1418_v12 = vld [vmem:[%s2130_s29 + $0x8] sm:$0xff]  ;;  %v1420_v14 = vld [vmem:[%s2130_s29 + $0x10] sm:$0xff]  ;;  %s1448_s11 = sadd.s32 1, %s2134_s18  ;;  %s1410_s10 = sadd.s32 1, %s2138_s10   ;;  %s2138_s10 = sphi %s2953_s10, %s1410_s10   ;;  %s2134_s18 = sphi %s2951_s18, %s3063_s18   ;;  %s2130_s29 = sphi %s3062_s29, %s1453_s29   ;;  %s2126_s24 = sphi %s3061_s24, %s1454_s24  }
 0x18b   : >> { %1417 = vst [vmem:[%s2126_s24] sm:$0xff] %v1416_v26  ;;  %1419 = vst [vmem:[%s2126_s24 + $0x8] sm:$0xff] %v1418_v12  ;;  %v1422_v13 = vld [vmem:[%s2130_s29 + $0x18] sm:$0xff]  ;;  %v1424_v15 = vld [vmem:[%s2130_s29 + $0x20] sm:$0xff]  ;;  %p1449_p11 = scmp.ge.s32.totalorder %s1448_s11, %s2942_s9  ;;  %p1409_p12 = scmp.ge.s32.totalorder %s1410_s10, %s2942_s9 }
 0x18c   : >> { %1421 = vst [vmem:[%s2126_s24 + $0x10] sm:$0xff] %v1420_v14  ;;  %v1426_v16 = vld [vmem:[%s2130_s29 + $0x28] sm:$0xff]  ;;  %1423 = vst [vmem:[%s2126_s24 + $0x18] sm:$0xff] %v1422_v13  ;;  %v1428_v18 = vld [vmem:[%s2130_s29 + $0x30] sm:$0xff] }
 0x18d   : >> { %1425 = vst [vmem:[%s2126_s24 + $0x20] sm:$0xff] %v1424_v15  ;;  %1427 = vst [vmem:[%s2126_s24 + $0x28] sm:$0xff] %v1426_v16  ;;  %v1430_v56 = vld [vmem:[%s2130_s29 + $0x38] sm:$0xff]  ;;  %v1432_v58 = vld [vmem:[%s2130_s29 + $0x40] sm:$0xff]  ;;  %s3070_s11 = smov (%p1449_p11, %s1448_s11), 0 }
 0x18e   : >> { %1429 = vst [vmem:[%s2126_s24 + $0x30] sm:$0xff] %v1428_v18  ;;  %1431 = vst [vmem:[%s2126_s24 + $0x38] sm:$0xff] %v1430_v56  ;;  %v1434_v43 = vld [vmem:[%s2130_s29 + $0x48] sm:$0xff]  ;;  %v1436_v57 = vld [vmem:[%s2130_s29 + $0x50] sm:$0xff]  ;;  %s1643_s12 = sshll.u32 %s3070_s11, 7  ;;  %s3063_s18 = smov %s3070_s11 }
 0x18f   : >> { %1433 = vst [vmem:[%s2126_s24 + $0x40] sm:$0xff] %v1432_v58  ;;  %v1438_v59 = vld [vmem:[%s2130_s29 + $0x58] sm:$0xff]  ;;  %1435 = vst [vmem:[%s2126_s24 + $0x48] sm:$0xff] %v1434_v43  ;;  %v1440_v41 = vld [vmem:[%s2130_s29 + $0x60] sm:$0xff]  ;;  %1412 = sbr.rel (!%p1409_p12) target bundleno = 394 (0x18a), region = 143 }
 0x190   : >> { %1437 = vst [vmem:[%s2126_s24 + $0x50] sm:$0xff] %v1436_v57  ;;  %1439 = vst [vmem:[%s2126_s24 + $0x58] sm:$0xff] %v1438_v59  ;;  %v1442_v17 = vld [vmem:[%s2130_s29 + $0x68] sm:$0xff]  ;;  %v1444_v19 = vld [vmem:[%s2130_s29 + $0x70] sm:$0xff] }
 0x191   : >> { %1441 = vst [vmem:[%s2126_s24 + $0x60] sm:$0xff] %v1440_v41  ;;  %1443 = vst [vmem:[%s2126_s24 + $0x68] sm:$0xff] %v1442_v17  ;;  %v1446_v31 = vld [vmem:[%s2130_s29 + $0x78] sm:$0xff]  ;;  %s1453_s29 = scalar_lea.vmem %s2818_s21, %s1643_s12 [#allocation2]  }
 0x192   : >> { %1445 = vst [vmem:[%s2126_s24 + $0x70] sm:$0xff] %v1444_v19  ;;  %1447 = vst [vmem:[%s2126_s24 + $0x78] sm:$0xff] %v1446_v31  ;;  %s1454_s24 = scalar_lea.vmem %s2936_s30, %s1643_s12  }
 0x194 PF: > { %s3011_s13 = sand.u32 15, %s3068_s20   ;;  %s1658_s14 = sshll.u32 %s2942_s9, 7 }
 0x195   : > { %s1459_s15 = scalar_lea.vmem %s2818_s21, %s1658_s14 [#allocation2]   ;;  %s1461_s7 = scalar_lea.vmem %s2936_s30, %s1658_s14  }
 0x196   : > { %p1648_p13 = scmp.le.s32.totalorder %s3011_s13, 0 }
 0x197   : > { %s2140_s16 = smov (!%p1648_p13), %s1461_s7   ;;  %s2144_s17 = smov (!%p1648_p13), %s1459_s15  }
 0x198   : > { %1570 = sbr.rel (%p1648_p13) target bundleno = 421 (0x1a5), region = 148  ;;  %s2148_s19 = smov (!%p1648_p13), 0  }
 0x199   : > { %s2152_s23 = smov (!%p1648_p13), 0  }
 0x19d LB: >> { %v1471_v32 = vld [vmem:[%s2146_s17] sm:$0xff]  ;;  %s1473_s20 = sadd.s32 1, %s2150_s19  ;;  %s1465_s23 = sadd.s32 1, %s2154_s23   ;;  %s2154_s23 = sphi %s2152_s23, %s1465_s23   ;;  %s2150_s19 = sphi %s2148_s19, %s2149_s19   ;;  %s2146_s17 = sphi %s2144_s17, %s1478_s17   ;;  %s2142_s16 = sphi %s2140_s16, %s1479_s16  }
 0x19e   : >> { %1472 = vst [vmem:[%s2142_s16] sm:$0xff] %v1471_v32  ;;  %p1474_p0 = scmp.ge.s32.totalorder %s1473_s20, %s3011_s13  ;;  %p1464_p1 = scmp.ge.s32.totalorder %s1465_s23, %s3011_s13 }
 0x1a0   : >> { %s3072_s20 = smov (%p1474_p0, %s1473_s20), 0  ;;  %1467 = sbr.rel (!%p1464_p1) target bundleno = 413 (0x19d), region = 154 }
 0x1a1   : >> { %s1649_s21 = sshll.u32 %s3072_s20, 3  ;;  %s2149_s19 = smov %s3072_s20  }
 0x1a2   : >> { %s1478_s17 = scalar_lea.vmem %s1459_s15, %s1649_s21 [#allocation2]   ;;  %s1479_s16 = scalar_lea.vmem %s1461_s7, %s1649_s21  }
 0x1a5 PF: > { %p13_p2 = scmp.ge.s32.totalorder %s2206_s25, 4   ;;  %s3064_s21 = smov %s2118_s22 }
 0x1a6   : > { %s3065_s22 = smov %s2214_s28  ;;  %s3066_s23 = smov %s2206_s25 }
 0x1a7   :  { %15 = sbr.rel (!%p13_p2) target bundleno = 2 (0x2), region = 165 }

// kernel: cnn_forward.5
= control target key start
LH: loop header
LB: loop body
LE: loop exit
PB: predicated region body
PF: predicated region fallthrough
CT: control target
= control target key end

     0   :  { %v2009_v27 = vmov 1983009808   ;;  %v386_v29 = vlaneseq  ;;  %s3253_s0 = inlined_call_operand.vmem [shape: f32[2,2688], index: 0, kind: input, shape index: {}]   ;;  %s3254_s1 = inlined_call_operand.vmem [shape: f32[2688,128], index: 1, kind: input, shape index: {}]   ;;  %s3255_s2 = inlined_call_operand.vmem [shape: f32[1,128], index: 2, kind: input, shape index: {}]   ;;  %s3256_s3 = inlined_call_operand.vmem [shape: f32[128,128], index: 3, kind: input, shape index: {}]   ;;  %s3257_s4 = inlined_call_operand.vmem [shape: f32[1,128], index: 4, kind: input, shape index: {}]   ;;  %s3258_s5 = inlined_call_operand.vmem [shape: f32[128,128], index: 5, kind: input, shape index: {}]   ;;  %s3259_s6 = inlined_call_operand.vmem [shape: f32[1,128], index: 6, kind: input, shape index: {}]   ;;  %s3260_s7 = inlined_call_operand.hbm [shape: f32[2,128], index: 7, kind: output, shape index: {}]  }
   0x1   :  { %v64_v0 = vld [vmem:[%s3254_s1 + $0xf8] sm:$0xff]  ;;  %v63_v2 = vld [vmem:[%s3254_s1 + $0xf0] sm:$0xff]  ;;  %v62_v6 = vld [vmem:[%s3254_s1 + $0xe8] sm:$0xff]  ;;  %v384_v28 = vunpack.c.l.s4 %v2009_v27 }
   0x2   :  { %v48_v1 = vld [vmem:[%s3254_s1 + $0x78] sm:$0xff]  ;;  %1472 = vmatprep.subr.mxu0 %v64_v0  ;;  %v47_v4 = vld [vmem:[%s3254_s1 + $0x70] sm:$0xff]  ;;  %v46_v8 = vld [vmem:[%s3254_s1 + $0x68] sm:$0xff]  ;;  %v387_v39 = vshrl.u32 %v386_v29, 7 }
   0x3   :  { %v96_v3 = vld [vmem:[%s3254_s1 + $0x1f8] sm:$0xff]  ;;  %1473 = vmatpush3.msra.mxu0 %v48_v1  ;;  %v95_v7 = vld [vmem:[%s3254_s1 + $0x1f0] sm:$0xff]  ;;  %v94_v10 = vld [vmem:[%s3254_s1 + $0x1e8] sm:$0xff]  ;;  %v385_v38 = vunpack.c.0.s8 %v384_v28 }
   0x4   :  { %v80_v5 = vld [vmem:[%s3254_s1 + $0x178] sm:$0xff]  ;;  %1507 = vmatprep.subr.mxu1 %v96_v3  ;;  %1474 = vmatprep.subr.mxu0 %v63_v2  ;;  %v79_v9 = vld [vmem:[%s3254_s1 + $0x170] sm:$0xff]  ;;  %v61_v11 = vld [vmem:[%s3254_s1 + $0xe0] sm:$0xff] }
   0x5   :  { %1508 = vmatpush3.msra.mxu1 %v80_v5  ;;  %1475 = vmatpush3.msra.mxu0 %v47_v4  ;;  %v78_v12 = vld [vmem:[%s3254_s1 + $0x168] sm:$0xff]  ;;  %v45_v13 = vld [vmem:[%s3254_s1 + $0x60] sm:$0xff]  ;;  %v60_v15 = vld [vmem:[%s3254_s1 + $0xd8] sm:$0xff]  ;;  %v2182_v48 = vsub.s32 %v385_v38, %v387_v39 }
   0x6   :  { %1509 = vmatprep.subr.mxu1 %v95_v7  ;;  %1476 = vmatprep.subr.mxu0 %v62_v6  ;;  %v93_v14 = vld [vmem:[%s3254_s1 + $0x1e0] sm:$0xff]  ;;  %v44_v17 = vld [vmem:[%s3254_s1 + $0x58] sm:$0xff]  ;;  %v59_v19 = vld [vmem:[%s3254_s1 + $0xd0] sm:$0xff] }
   0x7   :  { %1510 = vmatpush3.msra.mxu1 %v79_v9  ;;  %1477 = vmatpush3.msra.mxu0 %v46_v8  ;;  %v77_v16 = vld [vmem:[%s3254_s1 + $0x160] sm:$0xff]  ;;  %v92_v18 = vld [vmem:[%s3254_s1 + $0x1d8] sm:$0xff]  ;;  %v43_v21 = vld [vmem:[%s3254_s1 + $0x50] sm:$0xff] }
   0x8   :  { %1511 = vmatprep.subr.mxu1 %v94_v10  ;;  %1478 = vmatprep.subr.mxu0 %v61_v11  ;;  %v76_v20 = vld [vmem:[%s3254_s1 + $0x158] sm:$0xff]  ;;  %v91_v22 = vld [vmem:[%s3254_s1 + $0x1d0] sm:$0xff]  ;;  %v58_v23 = vld [vmem:[%s3254_s1 + $0xc8] sm:$0xff] }
   0x9   :  { %1512 = vmatpush3.msra.mxu1 %v78_v12  ;;  %1479 = vmatpush3.msra.mxu0 %v45_v13  ;;  %v75_v24 = vld [vmem:[%s3254_s1 + $0x150] sm:$0xff]  ;;  %v42_v25 = vld [vmem:[%s3254_s1 + $0x48] sm:$0xff]  ;;  %v57_v30 = vld [vmem:[%s3254_s1 + $0xc0] sm:$0xff] }
   0xa   :  { %1513 = vmatprep.subr.mxu1 %v93_v14  ;;  %1480 = vmatprep.subr.mxu0 %v60_v15  ;;  %v90_v26 = vld [vmem:[%s3254_s1 + $0x1c8] sm:$0xff]  ;;  %v41_v32 = vld [vmem:[%s3254_s1 + $0x40] sm:$0xff]  ;;  %v56_v34 = vld [vmem:[%s3254_s1 + $0xb8] sm:$0xff] }
   0xb   :  { %1514 = vmatpush3.msra.mxu1 %v77_v16  ;;  %1481 = vmatpush3.msra.mxu0 %v44_v17  ;;  %v74_v31 = vld [vmem:[%s3254_s1 + $0x148] sm:$0xff]  ;;  %v89_v33 = vld [vmem:[%s3254_s1 + $0x1c0] sm:$0xff]  ;;  %v40_v36 = vld [vmem:[%s3254_s1 + $0x38] sm:$0xff] }
   0xc   :  { %1515 = vmatprep.subr.mxu1 %v92_v18  ;;  %1482 = vmatprep.subr.mxu0 %v59_v19  ;;  %v73_v35 = vld [vmem:[%s3254_s1 + $0x140] sm:$0xff]  ;;  %v88_v37 = vld [vmem:[%s3254_s1 + $0x1b8] sm:$0xff]  ;;  %v55_v40 = vld [vmem:[%s3254_s1 + $0xb0] sm:$0xff] }
   0xd   :  { %1516 = vmatpush3.msra.mxu1 %v76_v20  ;;  %1483 = vmatpush3.msra.mxu0 %v43_v21  ;;  %v72_v41 = vld [vmem:[%s3254_s1 + $0x138] sm:$0xff]  ;;  %v39_v42 = vld [vmem:[%s3254_s1 + $0x30] sm:$0xff]  ;;  %v54_v44 = vld [vmem:[%s3254_s1 + $0xa8] sm:$0xff] }
   0xe   :  { %1517 = vmatprep.subr.mxu1 %v91_v22  ;;  %1484 = vmatprep.subr.mxu0 %v58_v23  ;;  %v87_v43 = vld [vmem:[%s3254_s1 + $0x1b0] sm:$0xff]  ;;  %v38_v46 = vld [vmem:[%s3254_s1 + $0x28] sm:$0xff]  ;;  %v53_v49 = vld [vmem:[%s3254_s1 + $0xa0] sm:$0xff] }
   0xf   :  { %1518 = vmatpush3.msra.mxu1 %v75_v24  ;;  %1485 = vmatpush3.msra.mxu0 %v42_v25  ;;  %v71_v45 = vld [vmem:[%s3254_s1 + $0x130] sm:$0xff]  ;;  %v86_v47 = vld [vmem:[%s3254_s1 + $0x1a8] sm:$0xff]  ;;  %v27_v51 = vld [vmem:[%s3253_s0] sm:$0xff] }
  0x10   :  { %1519 = vmatprep.subr.mxu1 %v90_v26  ;;  %1486 = vmatprep.subr.mxu0 %v57_v30  ;;  %v70_v50 = vld [vmem:[%s3254_s1 + $0x128] sm:$0xff]  ;;  %v37_v52 = vld [vmem:[%s3254_s1 + $0x20] sm:$0xff]  ;;  %v52_v54 = vld [vmem:[%s3254_s1 + $0x98] sm:$0xff]  ;;  %v389_v58 = vrot.slane %v27_v51, %v2182_v48  ;;  %v382_v59 = vcombine.high %v27_v51, %v27_v51 }
  0x11   :  { %1520 = vmatpush3.msra.mxu1 %v74_v31  ;;  %1487 = vmatpush3.msra.mxu0 %v41_v32  ;;  %v85_v53 = vld [vmem:[%s3254_s1 + $0x1a0] sm:$0xff]  ;;  %v36_v56 = vld [vmem:[%s3254_s1 + $0x18] sm:$0xff]  ;;  %v51_v60 = vld [vmem:[%s3254_s1 + $0x90] sm:$0xff] }
  0x12   :  { %1521 = vmatprep.subr.mxu1 %v89_v33  ;;  %1488 = vmatprep.subr.mxu0 %v56_v34  ;;  %v69_v55 = vld [vmem:[%s3254_s1 + $0x120] sm:$0xff]  ;;  %v84_v57 = vld [vmem:[%s3254_s1 + $0x198] sm:$0xff]  ;;  %v35_v62 = vld [vmem:[%s3254_s1 + $0x10] sm:$0xff]  ;;  %v397_v4 = vcombine.high %v389_v58, %v389_v58  ;;  %v396_v5 = vrot.slane %v382_v59, %v2182_v48 }
  0x13   :  { %1522 = vmatpush3.msra.mxu1 %v73_v35  ;;  %1489 = vmatpush3.msra.mxu0 %v40_v36  ;;  %v68_v61 = vld [vmem:[%s3254_s1 + $0x118] sm:$0xff]  ;;  %v83_v63 = vld [vmem:[%s3254_s1 + $0x190] sm:$0xff]  ;;  %v50_v0 = vld [vmem:[%s3254_s1 + $0x88] sm:$0xff] }
  0x14   :  { %1523 = vmatprep.subr.mxu1 %v88_v37  ;;  %1490 = vmatprep.subr.mxu0 %v55_v40  ;;  %v67_v1 = vld [vmem:[%s3254_s1 + $0x110] sm:$0xff]  ;;  %v34_v2 = vld [vmem:[%s3254_s1 + $0x8] sm:$0xff]  ;;  %v49_v6 = vld [vmem:[%s3254_s1 + $0x80] sm:$0xff]  ;;  %v398_v12 = vcombine.high %v396_v5, %v396_v5 }
  0x15   :  { %1524 = vmatpush3.msra.mxu1 %v72_v41  ;;  %1491 = vmatpush3.msra.mxu0 %v39_v42  ;;  %v82_v3 = vld [vmem:[%s3254_s1 + $0x188] sm:$0xff]  ;;  %v33_v7 = vld [vmem:[%s3254_s1] sm:$0xff]  ;;  %v128_v10 = vld [vmem:[%s3254_s1 + $0x2f8] sm:$0xff] }
  0x16   :  { %1525 = vmatprep.subr.mxu1 %v87_v43  ;;  %1492 = vmatprep.subr.mxu0 %v54_v44  ;;  %v66_v8 = vld [vmem:[%s3254_s1 + $0x108] sm:$0xff]  ;;  %v81_v9 = vld [vmem:[%s3254_s1 + $0x180] sm:$0xff]  ;;  %v112_v13 = vld [vmem:[%s3254_s1 + $0x278] sm:$0xff] }
  0x17   :  { %1526 = vmatpush3.msra.mxu1 %v71_v45  ;;  %1493 = vmatpush3.msra.mxu0 %v38_v46  ;;  %v65_v11 = vld [vmem:[%s3254_s1 + $0x100] sm:$0xff]  ;;  %v127_v14 = vld [vmem:[%s3254_s1 + $0x2f0] sm:$0xff]  ;;  %v160_v15 = vld [vmem:[%s3254_s1 + $0x3f8] sm:$0xff] }
  0x18   :  { %1527 = vmatprep.subr.mxu1 %v86_v47  ;;  %1494 = vmatprep.subr.mxu0 %v53_v49  ;;  %v111_v16 = vld [vmem:[%s3254_s1 + $0x270] sm:$0xff]  ;;  %v144_v17 = vld [vmem:[%s3254_s1 + $0x378] sm:$0xff]  ;;  %v126_v18 = vld [vmem:[%s3254_s1 + $0x2e8] sm:$0xff] }
  0x19   :  { %1528 = vmatpush3.msra.mxu1 %v70_v50  ;;  %1495 = vmatpush3.msra.mxu0 %v37_v52  ;;  %v159_v19 = vld [vmem:[%s3254_s1 + $0x3f0] sm:$0xff]  ;;  %v110_v20 = vld [vmem:[%s3254_s1 + $0x268] sm:$0xff]  ;;  %v125_v22 = vld [vmem:[%s3254_s1 + $0x2e0] sm:$0xff] }
  0x1a   :  { %1529 = vmatprep.subr.mxu1 %v85_v53  ;;  %1496 = vmatprep.subr.mxu0 %v52_v54  ;;  %v143_v21 = vld [vmem:[%s3254_s1 + $0x370] sm:$0xff]  ;;  %v158_v23 = vld [vmem:[%s3254_s1 + $0x3e8] sm:$0xff]  ;;  %v109_v24 = vld [vmem:[%s3254_s1 + $0x260] sm:$0xff] }
  0x1b   :  { %1530 = vmatpush3.msra.mxu1 %v69_v55  ;;  %1497 = vmatpush3.msra.mxu0 %v36_v56  ;;  %v142_v25 = vld [vmem:[%s3254_s1 + $0x368] sm:$0xff]  ;;  %v124_v26 = vld [vmem:[%s3254_s1 + $0x2d8] sm:$0xff]  ;;  %v157_v27 = vld [vmem:[%s3254_s1 + $0x3e0] sm:$0xff] }
  0x1c   :  { %1531 = vmatprep.subr.mxu1 %v84_v57  ;;  %1498 = vmatprep.subr.mxu0 %v51_v60  ;;  %v108_v28 = vld [vmem:[%s3254_s1 + $0x258] sm:$0xff]  ;;  %v141_v29 = vld [vmem:[%s3254_s1 + $0x360] sm:$0xff]  ;;  %v123_v30 = vld [vmem:[%s3254_s1 + $0x2d0] sm:$0xff] }
  0x1d   :  { %1532 = vmatpush3.msra.mxu1 %v68_v61  ;;  %1499 = vmatpush3.msra.mxu0 %v35_v62  ;;  %v156_v31 = vld [vmem:[%s3254_s1 + $0x3d8] sm:$0xff]  ;;  %v107_v32 = vld [vmem:[%s3254_s1 + $0x250] sm:$0xff]  ;;  %v122_v34 = vld [vmem:[%s3254_s1 + $0x2c8] sm:$0xff] }
  0x1e   :  { %1533 = vmatprep.subr.mxu1 %v83_v63  ;;  %1500 = vmatprep.subr.mxu0 %v50_v0  ;;  %v140_v33 = vld [vmem:[%s3254_s1 + $0x358] sm:$0xff]  ;;  %v155_v35 = vld [vmem:[%s3254_s1 + $0x3d0] sm:$0xff]  ;;  %v106_v36 = vld [vmem:[%s3254_s1 + $0x248] sm:$0xff] }
  0x1f   :  { %1534 = vmatpush3.msra.mxu1 %v67_v1  ;;  %1501 = vmatpush3.msra.mxu0 %v34_v2  ;;  %v139_v37 = vld [vmem:[%s3254_s1 + $0x350] sm:$0xff]  ;;  %v121_v38 = vld [vmem:[%s3254_s1 + $0x2c0] sm:$0xff]  ;;  %v154_v39 = vld [vmem:[%s3254_s1 + $0x3c8] sm:$0xff] }
  0x20   :  { %1535 = vmatprep.subr.mxu1 %v82_v3  ;;  %1502 = vmatprep.subr.mxu0 %v49_v6  ;;  %v105_v40 = vld [vmem:[%s3254_s1 + $0x240] sm:$0xff]  ;;  %v138_v41 = vld [vmem:[%s3254_s1 + $0x348] sm:$0xff]  ;;  %v120_v42 = vld [vmem:[%s3254_s1 + $0x2b8] sm:$0xff] }
  0x21   :  { %559 = vmatprep.mubr.f32.mxu0 %v397_v4  ;;  %1503 = vmatpush3.msra.mxu0 %v33_v7  ;;  %v153_v43 = vld [vmem:[%s3254_s1 + $0x3c0] sm:$0xff]  ;;  %v104_v44 = vld [vmem:[%s3254_s1 + $0x238] sm:$0xff]  ;;  %v119_v46 = vld [vmem:[%s3254_s1 + $0x2b0] sm:$0xff] }
  0x22   :  { %1536 = vmatpush3.msra.mxu1 %v66_v8  ;;  %560 = vmatmul.mubr.f32.vlgmr.msra.gmra.mxu0 %v389_v58  ;;  %v137_v45 = vld [vmem:[%s3254_s1 + $0x340] sm:$0xff]  ;;  %v152_v47 = vld [vmem:[%s3254_s1 + $0x3b8] sm:$0xff]  ;;  %v103_v49 = vld [vmem:[%s3254_s1 + $0x230] sm:$0xff] }
  0x23   :  { %1537 = vmatprep.subr.mxu1 %v81_v9  ;;  %1542 = vmatprep.subr.mxu0 %v128_v10  ;;  %v136_v50 = vld [vmem:[%s3254_s1 + $0x338] sm:$0xff]  ;;  %v118_v51 = vld [vmem:[%s3254_s1 + $0x2a8] sm:$0xff]  ;;  %v151_v52 = vld [vmem:[%s3254_s1 + $0x3b0] sm:$0xff] }
  0x24   :  { %1538 = vmatpush3.msra.mxu1 %v65_v11  ;;  %629 = vmatprep.mubr.f32.mxu1 %v398_v12  ;;  %v102_v53 = vld [vmem:[%s3254_s1 + $0x228] sm:$0xff]  ;;  %v135_v54 = vld [vmem:[%s3254_s1 + $0x330] sm:$0xff]  ;;  %v117_v55 = vld [vmem:[%s3254_s1 + $0x2a0] sm:$0xff] }
  0x25   :  { %1543 = vmatpush3.msra.mxu0 %v112_v13  ;;  %630 = vmatmul.mubr.f32.vlgmr.msra.gmra.mxu1 %v396_v5  ;;  %v150_v56 = vld [vmem:[%s3254_s1 + $0x3a8] sm:$0xff]  ;;  %v101_v57 = vld [vmem:[%s3254_s1 + $0x220] sm:$0xff]  ;;  %v116_v60 = vld [vmem:[%s3254_s1 + $0x298] sm:$0xff] }
  0x26   :  { %1544 = vmatprep.subr.mxu0 %v127_v14  ;;  %1577 = vmatprep.subr.mxu1 %v160_v15  ;;  %v28_v58 = vld [vmem:[%s3253_s0 + $0x8] sm:$0xff]  ;;  %v149_v61 = vld [vmem:[%s3254_s1 + $0x3a0] sm:$0xff]  ;;  %v100_v62 = vld [vmem:[%s3254_s1 + $0x218] sm:$0xff] }
  0x27   :  { %1545 = vmatpush3.msra.mxu0 %v111_v16  ;;  %1578 = vmatpush3.msra.mxu1 %v144_v17  ;;  %v134_v59 = vld [vmem:[%s3254_s1 + $0x328] sm:$0xff]  ;;  %v133_v63 = vld [vmem:[%s3254_s1 + $0x320] sm:$0xff]  ;;  %v115_v0 = vld [vmem:[%s3254_s1 + $0x290] sm:$0xff]  ;;  %v399_v1 = vcombine.high %v28_v58, %v28_v58  ;;  %v406_v4 = vrot.slane %v28_v58, %v2182_v48 }
  0x28   :  { %1546 = vmatprep.subr.mxu0 %v126_v18  ;;  %1579 = vmatprep.subr.mxu1 %v159_v19  ;;  %v148_v2 = vld [vmem:[%s3254_s1 + $0x398] sm:$0xff]  ;;  %v99_v3 = vld [vmem:[%s3254_s1 + $0x210] sm:$0xff]  ;;  %v114_v6 = vld [vmem:[%s3254_s1 + $0x288] sm:$0xff] }
  0x29   :  { %1547 = vmatpush3.msra.mxu0 %v110_v20  ;;  %1580 = vmatpush3.msra.mxu1 %v143_v21  ;;  %v132_v5 = vld [vmem:[%s3254_s1 + $0x318] sm:$0xff]  ;;  %v147_v7 = vld [vmem:[%s3254_s1 + $0x390] sm:$0xff]  ;;  %v98_v8 = vld [vmem:[%s3254_s1 + $0x208] sm:$0xff]  ;;  %v413_v11 = vrot.slane %v399_v1, %v2182_v48  ;;  %v414_v14 = vcombine.high %v406_v4, %v406_v4 }
  0x2a   :  { %1548 = vmatprep.subr.mxu0 %v125_v22  ;;  %1581 = vmatprep.subr.mxu1 %v158_v23  ;;  %v131_v9 = vld [vmem:[%s3254_s1 + $0x310] sm:$0xff]  ;;  %v113_v10 = vld [vmem:[%s3254_s1 + $0x280] sm:$0xff]  ;;  %v146_v12 = vld [vmem:[%s3254_s1 + $0x388] sm:$0xff] }
  0x2b   :  { %1549 = vmatpush3.msra.mxu0 %v109_v24  ;;  %1582 = vmatpush3.msra.mxu1 %v142_v25  ;;  %v97_v13 = vld [vmem:[%s3254_s1 + $0x200] sm:$0xff]  ;;  %v130_v15 = vld [vmem:[%s3254_s1 + $0x308] sm:$0xff]  ;;  %v192_v17 = vld [vmem:[%s3254_s1 + $0x4f8] sm:$0xff]  ;;  %v415_v19 = vcombine.high %v413_v11, %v413_v11 }
  0x2c   :  { %1550 = vmatprep.subr.mxu0 %v124_v26  ;;  %1583 = vmatprep.subr.mxu1 %v157_v27  ;;  %v145_v16 = vld [vmem:[%s3254_s1 + $0x380] sm:$0xff]  ;;  %v176_v20 = vld [vmem:[%s3254_s1 + $0x478] sm:$0xff]  ;;  %v191_v21 = vld [vmem:[%s3254_s1 + $0x4f0] sm:$0xff] }
  0x2d   :  { %1551 = vmatpush3.msra.mxu0 %v108_v28  ;;  %1584 = vmatpush3.msra.mxu1 %v141_v29  ;;  %v129_v18 = vld [vmem:[%s3254_s1 + $0x300] sm:$0xff]  ;;  %v224_v22 = vld [vmem:[%s3254_s1 + $0x5f8] sm:$0xff]  ;;  %v175_v23 = vld [vmem:[%s3254_s1 + $0x470] sm:$0xff] }
  0x2e   :  { %1552 = vmatprep.subr.mxu0 %v123_v30  ;;  %1585 = vmatprep.subr.mxu1 %v156_v31  ;;  %v208_v24 = vld [vmem:[%s3254_s1 + $0x578] sm:$0xff]  ;;  %v190_v25 = vld [vmem:[%s3254_s1 + $0x4e8] sm:$0xff]  ;;  %v223_v26 = vld [vmem:[%s3254_s1 + $0x5f0] sm:$0xff] }
  0x2f   :  { %1553 = vmatpush3.msra.mxu0 %v107_v32  ;;  %1586 = vmatpush3.msra.mxu1 %v140_v33  ;;  %v174_v27 = vld [vmem:[%s3254_s1 + $0x468] sm:$0xff]  ;;  %v207_v28 = vld [vmem:[%s3254_s1 + $0x570] sm:$0xff]  ;;  %v189_v29 = vld [vmem:[%s3254_s1 + $0x4e0] sm:$0xff] }
  0x30   :  { %1554 = vmatprep.subr.mxu0 %v122_v34  ;;  %1587 = vmatprep.subr.mxu1 %v155_v35  ;;  %v222_v30 = vld [vmem:[%s3254_s1 + $0x5e8] sm:$0xff]  ;;  %v173_v31 = vld [vmem:[%s3254_s1 + $0x460] sm:$0xff]  ;;  %v188_v33 = vld [vmem:[%s3254_s1 + $0x4d8] sm:$0xff] }
  0x31   :  { %1555 = vmatpush3.msra.mxu0 %v106_v36  ;;  %1588 = vmatpush3.msra.mxu1 %v139_v37  ;;  %v206_v32 = vld [vmem:[%s3254_s1 + $0x568] sm:$0xff]  ;;  %v221_v34 = vld [vmem:[%s3254_s1 + $0x5e0] sm:$0xff]  ;;  %v172_v35 = vld [vmem:[%s3254_s1 + $0x458] sm:$0xff] }
  0x32   :  { %1556 = vmatprep.subr.mxu0 %v121_v38  ;;  %1589 = vmatprep.subr.mxu1 %v154_v39  ;;  %v205_v36 = vld [vmem:[%s3254_s1 + $0x560] sm:$0xff]  ;;  %v187_v37 = vld [vmem:[%s3254_s1 + $0x4d0] sm:$0xff]  ;;  %v220_v38 = vld [vmem:[%s3254_s1 + $0x5d8] sm:$0xff] }
  0x33   :  { %1557 = vmatpush3.msra.mxu0 %v105_v40  ;;  %1590 = vmatpush3.msra.mxu1 %v138_v41  ;;  %v171_v39 = vld [vmem:[%s3254_s1 + $0x450] sm:$0xff]  ;;  %v204_v40 = vld [vmem:[%s3254_s1 + $0x558] sm:$0xff]  ;;  %v186_v41 = vld [vmem:[%s3254_s1 + $0x4c8] sm:$0xff] }
  0x34   :  { %1558 = vmatprep.subr.mxu0 %v120_v42  ;;  %1591 = vmatprep.subr.mxu1 %v153_v43  ;;  %v219_v42 = vld [vmem:[%s3254_s1 + $0x5d0] sm:$0xff]  ;;  %v170_v43 = vld [vmem:[%s3254_s1 + $0x448] sm:$0xff] }
  0x35   :  { %1559 = vmatpush3.msra.mxu0 %v104_v44  ;;  %1592 = vmatpush3.msra.mxu1 %v137_v45  ;;  %v203_v44 = vld [vmem:[%s3254_s1 + $0x550] sm:$0xff]  ;;  %v185_v45 = vld [vmem:[%s3254_s1 + $0x4c0] sm:$0xff]  ;;  %v182_v58 = vld [vmem:[%s3254_s1 + $0x4a8] sm:$0xff] }
  0x36   :  { %1560 = vmatprep.subr.mxu0 %v119_v46  ;;  %1593 = vmatprep.subr.mxu1 %v152_v47  ;;  %v218_v46 = vld [vmem:[%s3254_s1 + $0x5c8] sm:$0xff]  ;;  %v169_v47 = vld [vmem:[%s3254_s1 + $0x440] sm:$0xff]  ;;  %v29_v1 = vld [vmem:[%s3253_s0 + $0x10] sm:$0xff] }
  0x37   :  { %1561 = vmatpush3.msra.mxu0 %v103_v49  ;;  %1594 = vmatpush3.msra.mxu1 %v136_v50  ;;  %v202_v49 = vld [vmem:[%s3254_s1 + $0x548] sm:$0xff]  ;;  %v184_v50 = vld [vmem:[%s3254_s1 + $0x4b8] sm:$0xff] }
  0x38   :  { %1562 = vmatprep.subr.mxu0 %v118_v51  ;;  %1595 = vmatprep.subr.mxu1 %v151_v52  ;;  %v217_v51 = vld [vmem:[%s3254_s1 + $0x5c0] sm:$0xff]  ;;  %v168_v52 = vld [vmem:[%s3254_s1 + $0x438] sm:$0xff] }
  0x39   :  { %1563 = vmatpush3.msra.mxu0 %v102_v53  ;;  %1596 = vmatpush3.msra.mxu1 %v135_v54  ;;  %v201_v53 = vld [vmem:[%s3254_s1 + $0x540] sm:$0xff]  ;;  %v183_v54 = vld [vmem:[%s3254_s1 + $0x4b0] sm:$0xff] }
  0x3a   :  { %1564 = vmatprep.subr.mxu0 %v117_v55  ;;  %1597 = vmatprep.subr.mxu1 %v150_v56  ;;  %v216_v55 = vld [vmem:[%s3254_s1 + $0x5b8] sm:$0xff]  ;;  %v167_v56 = vld [vmem:[%s3254_s1 + $0x430] sm:$0xff] }
  0x3b   :  { %1565 = vmatpush3.msra.mxu0 %v101_v57  ;;  %1598 = vmatpush3.msra.mxu1 %v134_v59  ;;  %v200_v57 = vld [vmem:[%s3254_s1 + $0x538] sm:$0xff]  ;;  %v215_v59 = vld [vmem:[%s3254_s1 + $0x5b0] sm:$0xff] }
  0x3c   :  { %1566 = vmatprep.subr.mxu0 %v116_v60  ;;  %1599 = vmatprep.subr.mxu1 %v149_v61  ;;  %v166_v60 = vld [vmem:[%s3254_s1 + $0x428] sm:$0xff]  ;;  %v199_v61 = vld [vmem:[%s3254_s1 + $0x530] sm:$0xff] }
  0x3d   :  { %1567 = vmatpush3.msra.mxu0 %v100_v62  ;;  %1600 = vmatpush3.msra.mxu1 %v133_v63  ;;  %v181_v62 = vld [vmem:[%s3254_s1 + $0x4a0] sm:$0xff]  ;;  %v214_v63 = vld [vmem:[%s3254_s1 + $0x5a8] sm:$0xff] }
  0x3e   :  { %1568 = vmatprep.subr.mxu0 %v115_v0  ;;  %1601 = vmatprep.subr.mxu1 %v148_v2  ;;  %v165_v0 = vld [vmem:[%s3254_s1 + $0x420] sm:$0xff]  ;;  %v198_v2 = vld [vmem:[%s3254_s1 + $0x528] sm:$0xff] }
  0x3f   :  { %1569 = vmatpush3.msra.mxu0 %v99_v3  ;;  %1602 = vmatpush3.msra.mxu1 %v132_v5  ;;  %v180_v3 = vld [vmem:[%s3254_s1 + $0x498] sm:$0xff] }
  0x40   :  { %1570 = vmatprep.subr.mxu0 %v114_v6  ;;  %1603 = vmatprep.subr.mxu1 %v147_v7  ;;  %v164_v5 = vld [vmem:[%s3254_s1 + $0x418] sm:$0xff]  ;;  %v197_v6 = vld [vmem:[%s3254_s1 + $0x520] sm:$0xff]  ;;  %v179_v7 = vld [vmem:[%s3254_s1 + $0x490] sm:$0xff] }
  0x41   :  { %1571 = vmatpush3.msra.mxu0 %v98_v8  ;;  %1604 = vmatpush3.msra.mxu1 %v131_v9  ;;  %v416_v8 = vcombine.high %v29_v1, %v29_v1  ;;  %v212_v9 = vld [vmem:[%s3254_s1 + $0x598] sm:$0xff] }
  0x42   :  { %1572 = vmatprep.subr.mxu0 %v113_v10  ;;  %1605 = vmatprep.subr.mxu1 %v146_v12  ;;  %v163_v10 = vld [vmem:[%s3254_s1 + $0x410] sm:$0xff]  ;;  %v196_v12 = vld [vmem:[%s3254_s1 + $0x518] sm:$0xff] }
  0x43   :  { %1573 = vmatpush3.msra.mxu0 %v97_v13  ;;  %699 = vmatprep.mubr.f32.mxu0 %v414_v14  ;;  %v178_v13 = vld [vmem:[%s3254_s1 + $0x488] sm:$0xff]  ;;  %v211_v14 = vld [vmem:[%s3254_s1 + $0x590] sm:$0xff] }
  0x44   :  { %1606 = vmatpush3.msra.mxu1 %v130_v15  ;;  %700 = vmatmul.mubr.f32.vlgmr.msra.gmra.mxu0 %v406_v4  ;;  %v213_v4 = vld [vmem:[%s3254_s1 + $0x5a0] sm:$0xff]  ;;  %v162_v15 = vld [vmem:[%s3254_s1 + $0x408] sm:$0xff] }
  0x45   :  { %1607 = vmatprep.subr.mxu1 %v145_v16  ;;  %1612 = vmatprep.subr.mxu0 %v192_v17  ;;  %v195_v16 = vld [vmem:[%s3254_s1 + $0x510] sm:$0xff]  ;;  %v177_v17 = vld [vmem:[%s3254_s1 + $0x480] sm:$0xff] }
  0x46   :  { %1608 = vmatpush3.msra.mxu1 %v129_v18  ;;  %769 = vmatprep.mubr.f32.mxu1 %v415_v19  ;;  %v430_v18 = vrot.slane %v416_v8, %v2182_v48  ;;  %v210_v19 = vld [vmem:[%s3254_s1 + $0x588] sm:$0xff] }
  0x47   :  { %1613 = vmatpush3.msra.mxu0 %v176_v20  ;;  %770 = vmatmul.mubr.f32.vlgmr.msra.gmra.mxu1 %v413_v11  ;;  %v423_v11 = vrot.slane %v29_v1, %v2182_v48  ;;  %v161_v20 = vld [vmem:[%s3254_s1 + $0x400] sm:$0xff] }
  0x48   :  { %1614 = vmatprep.subr.mxu0 %v191_v21  ;;  %1647 = vmatprep.subr.mxu1 %v224_v22  ;;  %v194_v22 = vld [vmem:[%s3254_s1 + $0x508] sm:$0xff] }
  0x49   :  { %1615 = vmatpush3.msra.mxu0 %v175_v23  ;;  %1648 = vmatpush3.msra.mxu1 %v208_v24  ;;  %v431_v21 = vcombine.high %v423_v11, %v423_v11  ;;  %v209_v23 = vld [vmem:[%s3254_s1 + $0x580] sm:$0xff]  ;;  %v256_v24 = vld [vmem:[%s3254_s1 + $0x6f8] sm:$0xff] }
  0x4a   :  { %1616 = vmatprep.subr.mxu0 %v190_v25  ;;  %1649 = vmatprep.subr.mxu1 %v223_v26  ;;  %v193_v25 = vld [vmem:[%s3254_s1 + $0x500] sm:$0xff]  ;;  %v432_v26 = vcombine.high %v430_v18, %v430_v18 }
  0x4b   :  { %1617 = vmatpush3.msra.mxu0 %v174_v27  ;;  %1650 = vmatpush3.msra.mxu1 %v207_v28  ;;  %v240_v27 = vld [vmem:[%s3254_s1 + $0x678] sm:$0xff]  ;;  %v255_v28 = vld [vmem:[%s3254_s1 + $0x6f0] sm:$0xff] }
  0x4c   :  { %1618 = vmatprep.subr.mxu0 %v189_v29  ;;  %1651 = vmatprep.subr.mxu1 %v222_v30  ;;  %v288_v29 = vld [vmem:[%s3254_s1 + $0x7f8] sm:$0xff]  ;;  %v239_v30 = vld [vmem:[%s3254_s1 + $0x670] sm:$0xff] }
  0x4d   :  { %1619 = vmatpush3.msra.mxu0 %v173_v31  ;;  %1652 = vmatpush3.msra.mxu1 %v206_v32  ;;  %v272_v31 = vld [vmem:[%s3254_s1 + $0x778] sm:$0xff]  ;;  %v254_v32 = vld [vmem:[%s3254_s1 + $0x6e8] sm:$0xff] }
  0x4e   :  { %1620 = vmatprep.subr.mxu0 %v188_v33  ;;  %1653 = vmatprep.subr.mxu1 %v221_v34  ;;  %v287_v33 = vld [vmem:[%s3254_s1 + $0x7f0] sm:$0xff]  ;;  %v238_v34 = vld [vmem:[%s3254_s1 + $0x668] sm:$0xff] }
  0x4f   :  { %1621 = vmatpush3.msra.mxu0 %v172_v35  ;;  %1654 = vmatpush3.msra.mxu1 %v205_v36  ;;  %v271_v35 = vld [vmem:[%s3254_s1 + $0x770] sm:$0xff]  ;;  %v253_v36 = vld [vmem:[%s3254_s1 + $0x6e0] sm:$0xff] }
  0x50   :  { %1622 = vmatprep.subr.mxu0 %v187_v37  ;;  %1655 = vmatprep.subr.mxu1 %v220_v38  ;;  %v286_v37 = vld [vmem:[%s3254_s1 + $0x7e8] sm:$0xff]  ;;  %v237_v38 = vld [vmem:[%s3254_s1 + $0x660] sm:$0xff] }
  0x51   :  { %1623 = vmatpush3.msra.mxu0 %v171_v39  ;;  %1656 = vmatpush3.msra.mxu1 %v204_v40  ;;  %v270_v39 = vld [vmem:[%s3254_s1 + $0x768] sm:$0xff]  ;;  %v252_v40 = vld [vmem:[%s3254_s1 + $0x6d8] sm:$0xff] }
  0x52   :  { %1624 = vmatprep.subr.mxu0 %v186_v41  ;;  %1657 = vmatprep.subr.mxu1 %v219_v42  ;;  %v285_v41 = vld [vmem:[%s3254_s1 + $0x7e0] sm:$0xff]  ;;  %v236_v42 = vld [vmem:[%s3254_s1 + $0x658] sm:$0xff] }
  0x53   :  { %1625 = vmatpush3.msra.mxu0 %v170_v43  ;;  %1658 = vmatpush3.msra.mxu1 %v203_v44  ;;  %v269_v43 = vld [vmem:[%s3254_s1 + $0x760] sm:$0xff]  ;;  %v251_v44 = vld [vmem:[%s3254_s1 + $0x6d0] sm:$0xff] }
  0x54   :  { %1626 = vmatprep.subr.mxu0 %v185_v45  ;;  %1659 = vmatprep.subr.mxu1 %v218_v46  ;;  %v284_v45 = vld [vmem:[%s3254_s1 + $0x7d8] sm:$0xff]  ;;  %v235_v46 = vld [vmem:[%s3254_s1 + $0x650] sm:$0xff] }
  0x55   :  { %1627 = vmatpush3.msra.mxu0 %v169_v47  ;;  %1660 = vmatpush3.msra.mxu1 %v202_v49  ;;  %v268_v47 = vld [vmem:[%s3254_s1 + $0x758] sm:$0xff]  ;;  %v250_v49 = vld [vmem:[%s3254_s1 + $0x6c8] sm:$0xff] }
  0x56   :  { %1628 = vmatprep.subr.mxu0 %v184_v50  ;;  %1661 = vmatprep.subr.mxu1 %v217_v51  ;;  %v283_v50 = vld [vmem:[%s3254_s1 + $0x7d0] sm:$0xff]  ;;  %v234_v51 = vld [vmem:[%s3254_s1 + $0x648] sm:$0xff] }
  0x57   :  { %1629 = vmatpush3.msra.mxu0 %v168_v52  ;;  %1662 = vmatpush3.msra.mxu1 %v201_v53  ;;  %v267_v52 = vld [vmem:[%s3254_s1 + $0x750] sm:$0xff]  ;;  %v249_v53 = vld [vmem:[%s3254_s1 + $0x6c0] sm:$0xff] }
  0x58   :  { %1630 = vmatprep.subr.mxu0 %v183_v54  ;;  %1663 = vmatprep.subr.mxu1 %v216_v55  ;;  %v282_v54 = vld [vmem:[%s3254_s1 + $0x7c8] sm:$0xff]  ;;  %v233_v55 = vld [vmem:[%s3254_s1 + $0x640] sm:$0xff] }
  0x59   :  { %1631 = vmatpush3.msra.mxu0 %v167_v56  ;;  %1664 = vmatpush3.msra.mxu1 %v200_v57 }
  0x5a   :  { %1632 = vmatprep.subr.mxu0 %v182_v58  ;;  %1665 = vmatprep.subr.mxu1 %v215_v59 }
  0x5b   :  { %1633 = vmatpush3.msra.mxu0 %v166_v60  ;;  %1666 = vmatpush3.msra.mxu1 %v199_v61 }
  0x5c   :  { %1634 = vmatprep.subr.mxu0 %v181_v62  ;;  %1667 = vmatprep.subr.mxu1 %v214_v63 }
  0x5d   :  { %1635 = vmatpush3.msra.mxu0 %v165_v0  ;;  %1668 = vmatpush3.msra.mxu1 %v198_v2 }
  0x5e   :  { %1636 = vmatprep.subr.mxu0 %v180_v3  ;;  %1669 = vmatprep.subr.mxu1 %v213_v4 }
  0x5f   :  { %1637 = vmatpush3.msra.mxu0 %v164_v5  ;;  %1670 = vmatpush3.msra.mxu1 %v197_v6 }
  0x60   :  { %1638 = vmatprep.subr.mxu0 %v179_v7  ;;  %1671 = vmatprep.subr.mxu1 %v212_v9 }
  0x61   :  { %1639 = vmatpush3.msra.mxu0 %v163_v10  ;;  %1672 = vmatpush3.msra.mxu1 %v196_v12 }
  0x62   :  { %1640 = vmatprep.subr.mxu0 %v178_v13  ;;  %1673 = vmatprep.subr.mxu1 %v211_v14 }
  0x63   :  { %1641 = vmatpush3.msra.mxu0 %v162_v15  ;;  %1674 = vmatpush3.msra.mxu1 %v195_v16 }
  0x64   :  { %1642 = vmatprep.subr.mxu0 %v177_v17  ;;  %1675 = vmatprep.subr.mxu1 %v210_v19 }
  0x65   :  { %1643 = vmatpush3.msra.mxu0 %v161_v20  ;;  %839 = vmatprep.mubr.f32.mxu0 %v431_v21 }
  0x66   :  { %1676 = vmatpush3.msra.mxu1 %v194_v22  ;;  %840 = vmatmul.mubr.f32.vlgmr.msra.gmra.mxu0 %v423_v11 }
  0x67   :  { %1677 = vmatprep.subr.mxu1 %v209_v23  ;;  %1682 = vmatprep.subr.mxu0 %v256_v24 }
  0x68   :  { %1678 = vmatpush3.msra.mxu1 %v193_v25  ;;  %909 = vmatprep.mubr.f32.mxu1 %v432_v26 }
  0x69   :  { %1683 = vmatpush3.msra.mxu0 %v240_v27  ;;  %910 = vmatmul.mubr.f32.vlgmr.msra.gmra.mxu1 %v430_v18 }
  0x6a   :  { %1684 = vmatprep.subr.mxu0 %v255_v28  ;;  %1717 = vmatprep.subr.mxu1 %v288_v29 }
  0x6b   :  { %1685 = vmatpush3.msra.mxu0 %v239_v30  ;;  %1718 = vmatpush3.msra.mxu1 %v272_v31 }
  0x6c   :  { %1686 = vmatprep.subr.mxu0 %v254_v32  ;;  %1719 = vmatprep.subr.mxu1 %v287_v33 }
  0x6d   :  { %1687 = vmatpush3.msra.mxu0 %v238_v34  ;;  %1720 = vmatpush3.msra.mxu1 %v271_v35 }
  0x6e   :  { %1688 = vmatprep.subr.mxu0 %v253_v36  ;;  %1721 = vmatprep.subr.mxu1 %v286_v37 }
  0x6f   :  { %1689 = vmatpush3.msra.mxu0 %v237_v38  ;;  %1722 = vmatpush3.msra.mxu1 %v270_v39 }
  0x70   :  { %1690 = vmatprep.subr.mxu0 %v252_v40  ;;  %1723 = vmatprep.subr.mxu1 %v285_v41 }
  0x71   :  { %1691 = vmatpush3.msra.mxu0 %v236_v42  ;;  %1724 = vmatpush3.msra.mxu1 %v269_v43 }
  0x72   :  { %1692 = vmatprep.subr.mxu0 %v251_v44  ;;  %1725 = vmatprep.subr.mxu1 %v284_v45 }
  0x73   :  { %1693 = vmatpush3.msra.mxu0 %v235_v46  ;;  %1726 = vmatpush3.msra.mxu1 %v268_v47 }
  0x74   :  { %1694 = vmatprep.subr.mxu0 %v250_v49 }
  0x75   :  { %12 = vsyncpa [#allocation3], 0  ;;  %1727 = vmatprep.subr.mxu1 %v283_v50  ;;  %1695 = vmatpush3.msra.mxu0 %v234_v51  ;;  %v266_v56 = vld [vmem:[%s3254_s1 + $0x748] sm:$0xff]  ;;  %v248_v57 = vld [vmem:[%s3254_s1 + $0x6b8] sm:$0xff]  ;;  %vm2011_vm0 = vmmov 0   ;;  %s2012_s10 = smov [#allocation2]  }
  0x76   :  { %1728 = vmatpush3.msra.mxu1 %v267_v52  ;;  %1696 = vmatprep.subr.mxu0 %v249_v53  ;;  %v281_v58 = vld [vmem:[%s3254_s1 + $0x7c0] sm:$0xff]  ;;  %v232_v59 = vld [vmem:[%s3254_s1 + $0x638] sm:$0xff]  ;;  %v247_v61 = vld [vmem:[%s3254_s1 + $0x6b0] sm:$0xff]  ;;  %s1460_s11 = sshll.u32 %s2012_s10, 4  ;;  %s1461_s11 = int_to_ptr.vmem [resolvable:$true] %s1460_s11 }
  0x77   :  { %1729 = vmatprep.subr.mxu1 %v282_v54  ;;  %1697 = vmatpush3.msra.mxu0 %v233_v55  ;;  %v265_v60 = vld [vmem:[%s3254_s1 + $0x740] sm:$0xff]  ;;  %v280_v62 = vld [vmem:[%s3254_s1 + $0x7b8] sm:$0xff]  ;;  %v231_v63 = vld [vmem:[%s3254_s1 + $0x630] sm:$0xff]  ;;  %p1992_p1 = scmp.lt.s32.totalorder %s1461_s11, %s1461_s11 }
  0x78   :  { %1730 = vmatpush3.msra.mxu1 %v266_v56  ;;  %1698 = vmatprep.subr.mxu0 %v248_v57  ;;  %v264_v0 = vld [vmem:[%s3254_s1 + $0x738] sm:$0xff]  ;;  %v246_v1 = vld [vmem:[%s3254_s1 + $0x6a8] sm:$0xff]  ;;  %v279_v2 = vld [vmem:[%s3254_s1 + $0x7b0] sm:$0xff] }
  0x79   :  { %1731 = vmatprep.subr.mxu1 %v281_v58  ;;  %1699 = vmatpush3.msra.mxu0 %v232_v59  ;;  %v230_v3 = vld [vmem:[%s3254_s1 + $0x628] sm:$0xff]  ;;  %v263_v4 = vld [vmem:[%s3254_s1 + $0x730] sm:$0xff]  ;;  %v245_v5 = vld [vmem:[%s3254_s1 + $0x6a0] sm:$0xff] }
  0x7a   :  { %1732 = vmatpush3.msra.mxu1 %v265_v60  ;;  %1700 = vmatprep.subr.mxu0 %v247_v61  ;;  %v278_v6 = vld [vmem:[%s3254_s1 + $0x7a8] sm:$0xff]  ;;  %v229_v7 = vld [vmem:[%s3254_s1 + $0x620] sm:$0xff]  ;;  %v30_v8 = vld [vmem:[%s3253_s0 + $0x18] sm:$0xff] }
  0x7b   :  { %1733 = vmatprep.subr.mxu1 %v280_v62  ;;  %1701 = vmatpush3.msra.mxu0 %v231_v63  ;;  %v262_v9 = vld [vmem:[%s3254_s1 + $0x728] sm:$0xff]  ;;  %v244_v10 = vld [vmem:[%s3254_s1 + $0x698] sm:$0xff]  ;;  %v277_v11 = vld [vmem:[%s3254_s1 + $0x7a0] sm:$0xff]  ;;  %v433_v15 = vcombine.high %v30_v8, %v30_v8  ;;  %v440_v18 = vrot.slane %v30_v8, %v2182_v48 }
  0x7c   :  { %1734 = vmatpush3.msra.mxu1 %v264_v0  ;;  %1702 = vmatprep.subr.mxu0 %v246_v1  ;;  %v228_v12 = vld [vmem:[%s3254_s1 + $0x618] sm:$0xff]  ;;  %v261_v13 = vld [vmem:[%s3254_s1 + $0x720] sm:$0xff]  ;;  %v243_v14 = vld [vmem:[%s3254_s1 + $0x690] sm:$0xff] }
  0x7d   :  { %1735 = vmatprep.subr.mxu1 %v279_v2  ;;  %1703 = vmatpush3.msra.mxu0 %v230_v3  ;;  %v276_v16 = vld [vmem:[%s3254_s1 + $0x798] sm:$0xff]  ;;  %v227_v17 = vld [vmem:[%s3254_s1 + $0x610] sm:$0xff]  ;;  %v242_v20 = vld [vmem:[%s3254_s1 + $0x688] sm:$0xff]  ;;  %v447_v25 = vrot.slane %v433_v15, %v2182_v48  ;;  %v448_v28 = vcombine.high %v440_v18, %v440_v18 }
  0x7e   :  { %1736 = vmatpush3.msra.mxu1 %v263_v4  ;;  %1704 = vmatprep.subr.mxu0 %v245_v5  ;;  %v260_v19 = vld [vmem:[%s3254_s1 + $0x718] sm:$0xff]  ;;  %v275_v21 = vld [vmem:[%s3254_s1 + $0x790] sm:$0xff]  ;;  %v226_v22 = vld [vmem:[%s3254_s1 + $0x608] sm:$0xff] }
  0x7f   :  { %1737 = vmatprep.subr.mxu1 %v278_v6  ;;  %1705 = vmatpush3.msra.mxu0 %v229_v7  ;;  %v259_v23 = vld [vmem:[%s3254_s1 + $0x710] sm:$0xff]  ;;  %v241_v24 = vld [vmem:[%s3254_s1 + $0x680] sm:$0xff]  ;;  %v274_v26 = vld [vmem:[%s3254_s1 + $0x788] sm:$0xff]  ;;  %v449_v33 = vcombine.high %v447_v25, %v447_v25 }
  0x80   :  { %1738 = vmatpush3.msra.mxu1 %v262_v9  ;;  %1706 = vmatprep.subr.mxu0 %v244_v10  ;;  %v225_v27 = vld [vmem:[%s3254_s1 + $0x600] sm:$0xff]  ;;  %v258_v29 = vld [vmem:[%s3254_s1 + $0x708] sm:$0xff]  ;;  %v320_v31 = vld [vmem:[%s3254_s1 + $0x8f8] sm:$0xff] }
  0x81   :  { %1739 = vmatprep.subr.mxu1 %v277_v11  ;;  %1707 = vmatpush3.msra.mxu0 %v228_v12  ;;  %v273_v30 = vld [vmem:[%s3254_s1 + $0x780] sm:$0xff]  ;;  %v304_v34 = vld [vmem:[%s3254_s1 + $0x878] sm:$0xff]  ;;  %v319_v35 = vld [vmem:[%s3254_s1 + $0x8f0] sm:$0xff] }
  0x82   :  { %1740 = vmatpush3.msra.mxu1 %v261_v13  ;;  %1708 = vmatprep.subr.mxu0 %v243_v14  ;;  %v257_v32 = vld [vmem:[%s3254_s1 + $0x700] sm:$0xff]  ;;  %v352_v36 = vld [vmem:[%s3254_s1 + $0x9f8] sm:$0xff]  ;;  %v303_v37 = vld [vmem:[%s3254_s1 + $0x870] sm:$0xff] }
  0x83   :  { %1741 = vmatprep.subr.mxu1 %v276_v16  ;;  %1709 = vmatpush3.msra.mxu0 %v227_v17  ;;  %v336_v38 = vld [vmem:[%s3254_s1 + $0x978] sm:$0xff]  ;;  %v318_v39 = vld [vmem:[%s3254_s1 + $0x8e8] sm:$0xff]  ;;  %v351_v40 = vld [vmem:[%s3254_s1 + $0x9f0] sm:$0xff] }
  0x84   :  { %1742 = vmatpush3.msra.mxu1 %v260_v19  ;;  %1710 = vmatprep.subr.mxu0 %v242_v20  ;;  %v302_v41 = vld [vmem:[%s3254_s1 + $0x868] sm:$0xff]  ;;  %v335_v42 = vld [vmem:[%s3254_s1 + $0x970] sm:$0xff]  ;;  %v317_v43 = vld [vmem:[%s3254_s1 + $0x8e0] sm:$0xff] }
  0x85   :  { %1743 = vmatprep.subr.mxu1 %v275_v21  ;;  %1711 = vmatpush3.msra.mxu0 %v226_v22  ;;  %v350_v44 = vld [vmem:[%s3254_s1 + $0x9e8] sm:$0xff]  ;;  %v301_v45 = vld [vmem:[%s3254_s1 + $0x860] sm:$0xff]  ;;  %v316_v47 = vld [vmem:[%s3254_s1 + $0x8d8] sm:$0xff] }
  0x86   :  { %1744 = vmatpush3.msra.mxu1 %v259_v23  ;;  %1712 = vmatprep.subr.mxu0 %v241_v24  ;;  %v334_v46 = vld [vmem:[%s3254_s1 + $0x968] sm:$0xff]  ;;  %v349_v49 = vld [vmem:[%s3254_s1 + $0x9e0] sm:$0xff]  ;;  %v300_v50 = vld [vmem:[%s3254_s1 + $0x858] sm:$0xff] }
  0x87   :  { %1745 = vmatprep.subr.mxu1 %v274_v26  ;;  %1713 = vmatpush3.msra.mxu0 %v225_v27  ;;  %v333_v51 = vld [vmem:[%s3254_s1 + $0x960] sm:$0xff]  ;;  %v315_v52 = vld [vmem:[%s3254_s1 + $0x8d0] sm:$0xff]  ;;  %v348_v53 = vld [vmem:[%s3254_s1 + $0x9d8] sm:$0xff] }
  0x88   :  { %979 = vmatprep.mubr.f32.mxu0 %v448_v28  ;;  %1746 = vmatpush3.msra.mxu1 %v258_v29  ;;  %v299_v54 = vld [vmem:[%s3254_s1 + $0x850] sm:$0xff]  ;;  %v332_v55 = vld [vmem:[%s3254_s1 + $0x958] sm:$0xff]  ;;  %v314_v56 = vld [vmem:[%s3254_s1 + $0x8c8] sm:$0xff] }
  0x89   :  { %980 = vmatmul.mubr.f32.vlgmr.msra.gmra.mxu0 %v440_v18  ;;  %1747 = vmatprep.subr.mxu1 %v273_v30  ;;  %v347_v57 = vld [vmem:[%s3254_s1 + $0x9d0] sm:$0xff]  ;;  %v298_v58 = vld [vmem:[%s3254_s1 + $0x848] sm:$0xff]  ;;  %v313_v60 = vld [vmem:[%s3254_s1 + $0x8c0] sm:$0xff] }
  0x8a   :  { %1752 = vmatprep.subr.mxu0 %v320_v31  ;;  %1748 = vmatpush3.msra.mxu1 %v257_v32  ;;  %v331_v59 = vld [vmem:[%s3254_s1 + $0x950] sm:$0xff]  ;;  %v346_v61 = vld [vmem:[%s3254_s1 + $0x9c8] sm:$0xff]  ;;  %v297_v62 = vld [vmem:[%s3254_s1 + $0x840] sm:$0xff] }
  0x8b   :  { %1049 = vmatprep.mubr.f32.mxu1 %v449_v33  ;;  %1753 = vmatpush3.msra.mxu0 %v304_v34  ;;  %v330_v63 = vld [vmem:[%s3254_s1 + $0x948] sm:$0xff]  ;;  %v312_v0 = vld [vmem:[%s3254_s1 + $0x8b8] sm:$0xff]  ;;  %v345_v1 = vld [vmem:[%s3254_s1 + $0x9c0] sm:$0xff] }
  0x8c   :  { %1050 = vmatmul.mubr.f32.vlgmr.msra.gmra.mxu1 %v447_v25  ;;  %1754 = vmatprep.subr.mxu0 %v319_v35  ;;  %v296_v2 = vld [vmem:[%s3254_s1 + $0x838] sm:$0xff]  ;;  %v329_v3 = vld [vmem:[%s3254_s1 + $0x940] sm:$0xff]  ;;  %v311_v4 = vld [vmem:[%s3254_s1 + $0x8b0] sm:$0xff] }
  0x8d   :  { %1787 = vmatprep.subr.mxu1 %v352_v36  ;;  %1755 = vmatpush3.msra.mxu0 %v303_v37  ;;  %v344_v5 = vld [vmem:[%s3254_s1 + $0x9b8] sm:$0xff]  ;;  %v295_v6 = vld [vmem:[%s3254_s1 + $0x830] sm:$0xff]  ;;  %v310_v8 = vld [vmem:[%s3254_s1 + $0x8a8] sm:$0xff] }
  0x8e   :  { %1788 = vmatpush3.msra.mxu1 %v336_v38  ;;  %1756 = vmatprep.subr.mxu0 %v318_v39  ;;  %v328_v7 = vld [vmem:[%s3254_s1 + $0x938] sm:$0xff]  ;;  %v343_v9 = vld [vmem:[%s3254_s1 + $0x9b0] sm:$0xff]  ;;  %v294_v10 = vld [vmem:[%s3254_s1 + $0x828] sm:$0xff] }
  0x8f   :  { %1789 = vmatprep.subr.mxu1 %v351_v40  ;;  %1757 = vmatpush3.msra.mxu0 %v302_v41  ;;  %v327_v11 = vld [vmem:[%s3254_s1 + $0x930] sm:$0xff]  ;;  %v309_v12 = vld [vmem:[%s3254_s1 + $0x8a0] sm:$0xff]  ;;  %v342_v13 = vld [vmem:[%s3254_s1 + $0x9a8] sm:$0xff]  ;;  %v2010_v40 = vmov 0.0  }
  0x90   :  { %1790 = vmatpush3.msra.mxu1 %v335_v42  ;;  %1758 = vmatprep.subr.mxu0 %v317_v43  ;;  %v293_v14 = vld [vmem:[%s3254_s1 + $0x820] sm:$0xff]  ;;  %v326_v16 = vld [vmem:[%s3254_s1 + $0x928] sm:$0xff]  ;;  %v308_v17 = vld [vmem:[%s3254_s1 + $0x898] sm:$0xff] }
  0x91   :  { %1791 = vmatprep.subr.mxu1 %v350_v44  ;;  %1759 = vmatpush3.msra.mxu0 %v301_v45  ;;  %v31_v15 = vld [vmem:[%s3253_s0 + $0x20] sm:$0xff]  ;;  %v292_v19 = vld [vmem:[%s3254_s1 + $0x818] sm:$0xff]  ;;  %v307_v21 = vld [vmem:[%s3254_s1 + $0x890] sm:$0xff] }
  0x92   :  { %1792 = vmatpush3.msra.mxu1 %v334_v46  ;;  %1760 = vmatprep.subr.mxu0 %v316_v47  ;;  %v341_v18 = vld [vmem:[%s3254_s1 + $0x9a0] sm:$0xff]  ;;  %v450_v22 = vcombine.high %v31_v15, %v31_v15  ;;  %v340_v23 = vld [vmem:[%s3254_s1 + $0x998] sm:$0xff]  ;;  %v291_v24 = vld [vmem:[%s3254_s1 + $0x810] sm:$0xff]  ;;  %v457_v25 = vrot.slane %v31_v15, %v2182_v48 }
  0x93   :  { %1793 = vmatprep.subr.mxu1 %v349_v49  ;;  %1761 = vmatpush3.msra.mxu0 %v300_v50  ;;  %v325_v20 = vld [vmem:[%s3254_s1 + $0x920] sm:$0xff]  ;;  %v324_v26 = vld [vmem:[%s3254_s1 + $0x918] sm:$0xff]  ;;  %v306_v27 = vld [vmem:[%s3254_s1 + $0x888] sm:$0xff] }
  0x94   :  { %1794 = vmatpush3.msra.mxu1 %v333_v51  ;;  %1762 = vmatprep.subr.mxu0 %v315_v52  ;;  %v339_v28 = vld [vmem:[%s3254_s1 + $0x990] sm:$0xff]  ;;  %v290_v29 = vld [vmem:[%s3254_s1 + $0x808] sm:$0xff]  ;;  %v305_v31 = vld [vmem:[%s3254_s1 + $0x880] sm:$0xff]  ;;  %v464_v32 = vrot.slane %v450_v22, %v2182_v48  ;;  %v465_v35 = vcombine.high %v457_v25, %v457_v25 }
  0x95   :  { %1795 = vmatprep.subr.mxu1 %v348_v53  ;;  %1763 = vmatpush3.msra.mxu0 %v299_v54  ;;  %v323_v30 = vld [vmem:[%s3254_s1 + $0x910] sm:$0xff]  ;;  %v338_v33 = vld [vmem:[%s3254_s1 + $0x988] sm:$0xff]  ;;  %v289_v34 = vld [vmem:[%s3254_s1 + $0x800] sm:$0xff] }
  0x96   :  { %1796 = vmatpush3.msra.mxu1 %v332_v55  ;;  %1764 = vmatprep.subr.mxu0 %v314_v56  ;;  %v322_v36 = vld [vmem:[%s3254_s1 + $0x908] sm:$0xff]  ;;  %v337_v48 = vld [vmem:[%s3254_s1 + $0x980] sm:$0xff]  ;;  %v466_v38 = vcombine.high %v464_v32, %v464_v32  ;;  %v368_v39 = vld [vmem:[%s3254_s1 + $0xa78] sm:$0xff] }
  0x97   :  { %1797 = vmatprep.subr.mxu1 %v347_v57  ;;  %1765 = vmatpush3.msra.mxu0 %v298_v58  ;;  %v321_v37 = vld [vmem:[%s3254_s1 + $0x900] sm:$0xff]  ;;  %v367_v41 = vld [vmem:[%s3254_s1 + $0xa70] sm:$0xff]  ;;  %v366_v42 = vld [vmem:[%s3254_s1 + $0xa68] sm:$0xff] }
  0x98   :  { %1798 = vmatpush3.msra.mxu1 %v331_v59  ;;  %1766 = vmatprep.subr.mxu0 %v313_v60  ;;  %v365_v43 = vld [vmem:[%s3254_s1 + $0xa60] sm:$0xff]  ;;  %v364_v44 = vld [vmem:[%s3254_s1 + $0xa58] sm:$0xff]  ;;  %v363_v45 = vld [vmem:[%s3254_s1 + $0xa50] sm:$0xff] }
  0x99   :  { %1799 = vmatprep.subr.mxu1 %v346_v61  ;;  %1767 = vmatpush3.msra.mxu0 %v297_v62  ;;  %v362_v46 = vld [vmem:[%s3254_s1 + $0xa48] sm:$0xff]  ;;  %v361_v47 = vld [vmem:[%s3254_s1 + $0xa40] sm:$0xff]  ;;  %v360_v49 = vld [vmem:[%s3254_s1 + $0xa38] sm:$0xff] }
  0x9a   :  { %1800 = vmatpush3.msra.mxu1 %v330_v63  ;;  %1768 = vmatprep.subr.mxu0 %v312_v0  ;;  %v359_v50 = vld [vmem:[%s3254_s1 + $0xa30] sm:$0xff]  ;;  %v358_v51 = vld [vmem:[%s3254_s1 + $0xa28] sm:$0xff]  ;;  %v357_v52 = vld [vmem:[%s3254_s1 + $0xa20] sm:$0xff] }
  0x9b   :  { %1801 = vmatprep.subr.mxu1 %v345_v1  ;;  %1769 = vmatpush3.msra.mxu0 %v296_v2  ;;  %v356_v53 = vld [vmem:[%s3254_s1 + $0xa18] sm:$0xff]  ;;  %v355_v54 = vld [vmem:[%s3254_s1 + $0xa10] sm:$0xff]  ;;  %v354_v55 = vld [vmem:[%s3254_s1 + $0xa08] sm:$0xff] }
  0x9c   :  { %1802 = vmatpush3.msra.mxu1 %v329_v3  ;;  %1770 = vmatprep.subr.mxu0 %v311_v4  ;;  %v353_v56 = vld [vmem:[%s3254_s1 + $0xa00] sm:$0xff]  ;;  %v1469_v57 = vld.sshfl [vmem:[%s3253_s0 + $0x28] sm:$0x3 pattern:$0x76325410]  ;;  %v1281_v58 = vld [vmem:[%s3256_s3 + $0x78] sm:$0xff] }
  0x9d   :  { %1803 = vmatprep.subr.mxu1 %v344_v5  ;;  %1771 = vmatpush3.msra.mxu0 %v295_v6  ;;  %v1280_v59 = vld [vmem:[%s3256_s3 + $0x70] sm:$0xff]  ;;  %v1279_v60 = vld [vmem:[%s3256_s3 + $0x68] sm:$0xff]  ;;  %v1278_v61 = vld [vmem:[%s3256_s3 + $0x60] sm:$0xff] }
  0x9e   :  { %1804 = vmatpush3.msra.mxu1 %v328_v7  ;;  %1772 = vmatprep.subr.mxu0 %v310_v8  ;;  %v1277_v62 = vld [vmem:[%s3256_s3 + $0x58] sm:$0xff]  ;;  %v1276_v63 = vld [vmem:[%s3256_s3 + $0x50] sm:$0xff]  ;;  %v1275_v0 = vld [vmem:[%s3256_s3 + $0x48] sm:$0xff] }
  0x9f   :  { %1805 = vmatprep.subr.mxu1 %v343_v9  ;;  %1773 = vmatpush3.msra.mxu0 %v294_v10  ;;  %v1274_v1 = vld [vmem:[%s3256_s3 + $0x40] sm:$0xff]  ;;  %v1273_v2 = vld [vmem:[%s3256_s3 + $0x38] sm:$0xff]  ;;  %v1272_v3 = vld [vmem:[%s3256_s3 + $0x30] sm:$0xff] }
  0xa0   :  { %1806 = vmatpush3.msra.mxu1 %v327_v11  ;;  %1774 = vmatprep.subr.mxu0 %v309_v12  ;;  %v1271_v4 = vld [vmem:[%s3256_s3 + $0x28] sm:$0xff]  ;;  %v1270_v5 = vld [vmem:[%s3256_s3 + $0x20] sm:$0xff]  ;;  %v1269_v6 = vld [vmem:[%s3256_s3 + $0x18] sm:$0xff] }
  0xa1   :  { %1807 = vmatprep.subr.mxu1 %v342_v13  ;;  %1775 = vmatpush3.msra.mxu0 %v293_v14  ;;  %v1268_v7 = vld [vmem:[%s3256_s3 + $0x10] sm:$0xff]  ;;  %v1267_v8 = vld [vmem:[%s3256_s3 + $0x8] sm:$0xff]  ;;  %v1266_v9 = vld [vmem:[%s3256_s3] sm:$0xff] }
  0xa2   :  { %1808 = vmatpush3.msra.mxu1 %v326_v16  ;;  %1776 = vmatprep.subr.mxu0 %v308_v17  ;;  %v1375_v10 = vld [vmem:[%s3258_s5 + $0x78] sm:$0xff]  ;;  %v1374_v11 = vld [vmem:[%s3258_s5 + $0x70] sm:$0xff]  ;;  %v1373_v12 = vld [vmem:[%s3258_s5 + $0x68] sm:$0xff] }
  0xa3   :  { %1809 = vmatprep.subr.mxu1 %v341_v18  ;;  %1777 = vmatpush3.msra.mxu0 %v292_v19  ;;  %v1372_v13 = vld [vmem:[%s3258_s5 + $0x60] sm:$0xff]  ;;  %v1371_v14 = vld [vmem:[%s3258_s5 + $0x58] sm:$0xff]  ;;  %v1370_v15 = vld [vmem:[%s3258_s5 + $0x50] sm:$0xff] }
  0xa4   :  { %1810 = vmatpush3.msra.mxu1 %v325_v20  ;;  %1778 = vmatprep.subr.mxu0 %v307_v21  ;;  %v1369_v16 = vld [vmem:[%s3258_s5 + $0x48] sm:$0xff]  ;;  %v1368_v17 = vld [vmem:[%s3258_s5 + $0x40] sm:$0xff]  ;;  %v1367_v18 = vld [vmem:[%s3258_s5 + $0x38] sm:$0xff] }
  0xa5   :  { %1811 = vmatprep.subr.mxu1 %v340_v23  ;;  %1779 = vmatpush3.msra.mxu0 %v291_v24  ;;  %v1366_v19 = vld [vmem:[%s3258_s5 + $0x30] sm:$0xff]  ;;  %v1365_v20 = vld [vmem:[%s3258_s5 + $0x28] sm:$0xff]  ;;  %v1364_v21 = vld [vmem:[%s3258_s5 + $0x20] sm:$0xff] }
  0xa6   :  { %1812 = vmatpush3.msra.mxu1 %v324_v26  ;;  %1780 = vmatprep.subr.mxu0 %v306_v27  ;;  %v1363_v22 = vld [vmem:[%s3258_s5 + $0x18] sm:$0xff] }
  0xa7   :  { %1813 = vmatprep.subr.mxu1 %v339_v28  ;;  %1781 = vmatpush3.msra.mxu0 %v290_v29  ;;  %v1468_v28 = vld [vmem:[%s3255_s2] ss:$0 sm:$0xff] }
  0xa8   :  { %1814 = vmatpush3.msra.mxu1 %v323_v30  ;;  %1782 = vmatprep.subr.mxu0 %v305_v31 }
  0xa9   :  { %1815 = vmatprep.subr.mxu1 %v338_v33  ;;  %1783 = vmatpush3.msra.mxu0 %v289_v34 }
  0xaa   :  { %1119 = vmatprep.mubr.f32.mxu0 %v465_v35  ;;  %1816 = vmatpush3.msra.mxu1 %v322_v36 }
  0xab   :  { %1120 = vmatmul.mubr.f32.vlgmr.msra.gmra.mxu0 %v457_v25  ;;  %1817 = vmatprep.subr.mxu1 %v337_v48 }
  0xac   :  { %1873 = vmatprep.subr.mxu0 %v2010_v40  ;;  %1818 = vmatpush3.msra.mxu1 %v321_v37 }
  0xad   :  { %1189 = vmatprep.mubr.f32.mxu1 %v466_v38  ;;  %1874 = vmatpush3.msra.mxu0 %v368_v39 }
  0xae   :  { %1190 = vmatmul.mubr.f32.vlgmr.msra.gmra.mxu1 %v464_v32  ;;  %1875 = vmatprep.subr.mxu0 %v2010_v40 }
  0xaf   :  { %1876 = vmatpush3.msra.mxu0 %v367_v41  ;;  %1905 = vmatprep.mubr.msk.f32.mxu0 %vm2011_vm0, %v2010_v40 }
  0xb0   :  { %1877 = vmatprep.subr.mxu0 %v2010_v40  ;;  %1908 = vmatprep.subr.mxu1 %v2010_v40 }
  0xb1   :  { %1878 = vmatpush3.msra.mxu0 %v366_v42  ;;  %1940 = vmatprep.mubr.msk.f32.mxu1 %vm2011_vm0, %v2010_v40 }
  0xb2   :  { %1879 = vmatprep.subr.mxu0 %v2010_v40  ;;  %1909 = vmatpush3.msra.mxu1 %v1281_v58 }
  0xb3   :  { %1880 = vmatpush3.msra.mxu0 %v365_v43  ;;  %1910 = vmatprep.subr.mxu1 %v2010_v40 }
  0xb4   :  { %1881 = vmatprep.subr.mxu0 %v2010_v40  ;;  %1911 = vmatpush3.msra.mxu1 %v1280_v59 }
  0xb5   :  { %1882 = vmatpush3.msra.mxu0 %v364_v44  ;;  %1912 = vmatprep.subr.mxu1 %v2010_v40 }
  0xb6   :  { %1883 = vmatprep.subr.mxu0 %v2010_v40  ;;  %1913 = vmatpush3.msra.mxu1 %v1279_v60 }
  0xb7   :  { %1884 = vmatpush3.msra.mxu0 %v363_v45  ;;  %1914 = vmatprep.subr.mxu1 %v2010_v40 }
  0xb8   :  { %1885 = vmatprep.subr.mxu0 %v2010_v40  ;;  %1915 = vmatpush3.msra.mxu1 %v1278_v61 }
  0xb9   :  { %1886 = vmatpush3.msra.mxu0 %v362_v46  ;;  %1916 = vmatprep.subr.mxu1 %v2010_v40 }
  0xba   :  { %1887 = vmatprep.subr.mxu0 %v2010_v40  ;;  %1917 = vmatpush3.msra.mxu1 %v1277_v62 }
  0xbb   :  { %1888 = vmatpush3.msra.mxu0 %v361_v47  ;;  %1918 = vmatprep.subr.mxu1 %v2010_v40 }
  0xbc   :  { %1889 = vmatprep.subr.mxu0 %v2010_v40  ;;  %1919 = vmatpush3.msra.mxu1 %v1276_v63 }
  0xbd   :  { %1890 = vmatpush3.msra.mxu0 %v360_v49  ;;  %1920 = vmatprep.subr.mxu1 %v2010_v40 }
  0xbe   :  { %1891 = vmatprep.subr.mxu0 %v2010_v40  ;;  %1921 = vmatpush3.msra.mxu1 %v1275_v0 }
  0xbf   :  { %1892 = vmatpush3.msra.mxu0 %v359_v50  ;;  %1922 = vmatprep.subr.mxu1 %v2010_v40 }
  0xc0   :  { %1893 = vmatprep.subr.mxu0 %v2010_v40  ;;  %1923 = vmatpush3.msra.mxu1 %v1274_v1 }
  0xc1   :  { %1894 = vmatpush3.msra.mxu0 %v358_v51  ;;  %1924 = vmatprep.subr.mxu1 %v2010_v40 }
  0xc2   :  { %1895 = vmatprep.subr.mxu0 %v2010_v40  ;;  %1925 = vmatpush3.msra.mxu1 %v1273_v2 }
  0xc3   :  { %1896 = vmatpush3.msra.mxu0 %v357_v52  ;;  %1926 = vmatprep.subr.mxu1 %v2010_v40 }
  0xc4   :  { %1897 = vmatprep.subr.mxu0 %v2010_v40  ;;  %1927 = vmatpush3.msra.mxu1 %v1272_v3 }
  0xc5   :  { %1898 = vmatpush3.msra.mxu0 %v356_v53  ;;  %1928 = vmatprep.subr.mxu1 %v2010_v40 }
  0xc6   :  { %1899 = vmatprep.subr.mxu0 %v2010_v40  ;;  %1929 = vmatpush3.msra.mxu1 %v1271_v4 }
  0xc7   :  { %1900 = vmatpush3.msra.mxu0 %v355_v54  ;;  %1930 = vmatprep.subr.mxu1 %v2010_v40 }
  0xc8   :  { %1901 = vmatprep.subr.mxu0 %v2010_v40  ;;  %1931 = vmatpush3.msra.mxu1 %v1270_v5  ;;  %v1362_v5 = vld [vmem:[%s3258_s5 + $0x10] sm:$0xff] }
  0xc9   :  { %1902 = vmatpush3.msra.mxu0 %v354_v55  ;;  %1932 = vmatprep.subr.mxu1 %v2010_v40 }
  0xca   :  { %1903 = vmatprep.subr.mxu0 %v2010_v40  ;;  %1933 = vmatpush3.msra.mxu1 %v1269_v6  ;;  %v1361_v6 = vld [vmem:[%s3258_s5 + $0x8] sm:$0xff] }
  0xcb   :  { %1904 = vmatpush3.msra.mxu0 %v353_v56  ;;  %1934 = vmatprep.subr.mxu1 %v2010_v40 }
  0xcc   :  { %1906 = vmatmul.mubr.f32.vlgmr.msra.gmra.mxu0 %v1469_v57  ;;  %1943 = vmatprep.subr.mxu0 %v2010_v40 }
  0xcd   :  { %1975 = vmatprep.mubr.msk.f32.mxu0 %vm2011_vm0, %v2010_v40  ;;  %1935 = vmatpush3.msra.mxu1 %v1268_v7  ;;  %v1360_v7 = vld [vmem:[%s3258_s5] sm:$0xff]  ;;  %s1987_s5 = scalar_lea.vmem %s1461_s11, 32 }
  0xce   :  { %1936 = vmatprep.subr.mxu1 %v2010_v40  ;;  %1944 = vmatpush3.msra.mxu0 %v1375_v10  ;;  %p1988_p0 = scmp.ne.s32.totalorder %s1461_s11, %s1987_s5  ;;  %p1993_p2 = scmp.lt.s32.totalorder %s1987_s5, %s1987_s5 }
  0xcf   :  { %1937 = vmatpush3.msra.mxu1 %v1267_v8  ;;  %1945 = vmatprep.subr.mxu0 %v2010_v40  ;;  %v1470_v8 = vld [vmem:[%s3257_s4] ss:$0 sm:$0xff] }
  0xd0   :  { %1938 = vmatprep.subr.mxu1 %v2010_v40  ;;  %1946 = vmatpush3.msra.mxu0 %v1374_v11  ;;  %p1994_p3 = por %p1993_p2, %p1992_p1 }
  0xd1   :  { %1939 = vmatpush3.msra.mxu1 %v1266_v9  ;;  %1947 = vmatprep.subr.mxu0 %v2010_v40 }
  0xd2   :  { %1948 = vmatpush3.msra.mxu0 %v1373_v12  ;;  %p1995_p4 = pnand %p1994_p3, %p1988_p0 }
  0xd3   :  { %1949 = vmatprep.subr.mxu0 %v2010_v40 }
  0xd4   :  { %1950 = vmatpush3.msra.mxu0 %v1372_v13  ;;  %v1471_v13 = vld [vmem:[%s3259_s6] ss:$0 sm:$0xff] }
  0xd5   :  { %1951 = vmatprep.subr.mxu0 %v2010_v40 }
  0xd6   :  { %1952 = vmatpush3.msra.mxu0 %v1371_v14 }
  0xd7   :  { %1953 = vmatprep.subr.mxu0 %v2010_v40 }
  0xd8   :  { %1954 = vmatpush3.msra.mxu0 %v1370_v15 }
  0xd9   :  { %1955 = vmatprep.subr.mxu0 %v2010_v40 }
  0xda   :  { %1956 = vmatpush3.msra.mxu0 %v1369_v16 }
  0xdb   :  { %1957 = vmatprep.subr.mxu0 %v2010_v40 }
  0xdc   :  { %1958 = vmatpush3.msra.mxu0 %v1368_v17 }
  0xdd   :  { %1959 = vmatprep.subr.mxu0 %v2010_v40 }
  0xde   :  { %1960 = vmatpush3.msra.mxu0 %v1367_v18 }
  0xdf   :  { %1961 = vmatprep.subr.mxu0 %v2010_v40 }
  0xe0   :  { %1962 = vmatpush3.msra.mxu0 %v1366_v19 }
  0xe1   :  { %1963 = vmatprep.subr.mxu0 %v2010_v40 }
  0xe2   :  { %1964 = vmatpush3.msra.mxu0 %v1365_v20  ;;  %v1504_v23 = vpop.f32.mrf.mxu0 }
  0xe3   :  { %1965 = vmatprep.subr.mxu0 %v2010_v40 }
  0xe4   :  { %1966 = vmatpush3.msra.mxu0 %v1364_v21  ;;  %v1505_v24 = vpop.f32.mrf.mxu0 }
  0xe5   :  { %1967 = vmatprep.subr.mxu0 %v2010_v40  ;;  %v1539_v25 = vpop.f32.mrf.mxu1  ;;  %v1506_v27 = vadd.f32 %v1505_v24, %v1504_v23 }
  0xe6   :  { %1968 = vmatpush3.msra.mxu0 %v1363_v22 }
  0xe7   :  { %1969 = vmatprep.subr.mxu0 %v2010_v40  ;;  %v1540_v29 = vpop.f32.mrf.mxu1  ;;  %v562_v32 = vadd.f32 %v1506_v27, %v1468_v28 }
  0xe8   :  { %v1541_v33 = vadd.f32 %v1540_v29, %v1539_v25  ;;  %1970 = vmatpush3.msra.mxu0 %v1362_v5 }
  0xe9   :  { %1971 = vmatprep.subr.mxu0 %v2010_v40 }
  0xea   :  { %v632_v48 = vadd.f32 %v1541_v33, %v562_v32  ;;  %1972 = vmatpush3.msra.mxu0 %v1361_v6 }
  0xeb   :  { %1973 = vmatprep.subr.mxu0 %v2010_v40 }
  0xec   :  { %1974 = vmatpush3.msra.mxu0 %v1360_v7 }
 0x104   :  { %v1574_v26 = vpop.f32.mrf.mxu0 }
 0x106   :  { %v1575_v30 = vpop.f32.mrf.mxu0 }
 0x107   :  { %v1609_v31 = vpop.f32.mrf.mxu1  ;;  %v1576_v35 = vadd.f32 %v1575_v30, %v1574_v26 }
 0x109   :  { %v1610_v36 = vpop.f32.mrf.mxu1  ;;  %v702_v39 = vadd.f32 %v1576_v35, %v632_v48 }
 0x10a   :  { %v1611_v41 = vadd.f32 %v1610_v36, %v1609_v31 }
 0x10c   :  { %v772_v45 = vadd.f32 %v1611_v41, %v702_v39 }
 0x126   :  { %v1644_v34 = vpop.f32.mrf.mxu0 }
 0x128   :  { %v1645_v37 = vpop.f32.mrf.mxu0 }
 0x129   :  { %v1679_v38 = vpop.f32.mrf.mxu1  ;;  %v1646_v43 = vadd.f32 %v1645_v37, %v1644_v34 }
 0x12b   :  { %v1680_v44 = vpop.f32.mrf.mxu1  ;;  %v842_v49 = vadd.f32 %v1646_v43, %v772_v45 }
 0x12c   :  { %v1681_v50 = vadd.f32 %v1680_v44, %v1679_v38 }
 0x12e   :  { %v912_v54 = vadd.f32 %v1681_v50, %v842_v49 }
 0x149   :  { %v1714_v42 = vpop.f32.mrf.mxu0 }
 0x14b   :  { %v1715_v46 = vpop.f32.mrf.mxu0 }
 0x14c   :  { %v1749_v47 = vpop.f32.mrf.mxu1  ;;  %v1716_v52 = vadd.f32 %v1715_v46, %v1714_v42 }
 0x14e   :  { %v1750_v53 = vpop.f32.mrf.mxu1  ;;  %v982_v57 = vadd.f32 %v1716_v52, %v912_v54 }
 0x14f   :  { %v1751_v58 = vadd.f32 %v1750_v53, %v1749_v47 }
 0x151   :  { %v1052_v61 = vadd.f32 %v1751_v58, %v982_v57 }
 0x16b   :  { %v1784_v51 = vpop.f32.mrf.mxu0 }
 0x16d   :  { %v1785_v55 = vpop.f32.mrf.mxu0 }
 0x16e   :  { %v1819_v56 = vpop.f32.mrf.mxu1  ;;  %v1786_v59 = vadd.f32 %v1785_v55, %v1784_v51 }
 0x170   :  { %v1820_v60 = vpop.f32.mrf.mxu1  ;;  %v1122_v62 = vadd.f32 %v1786_v59, %v1052_v61 }
 0x171   :  { %v1821_v63 = vadd.f32 %v1820_v60, %v1819_v56 }
 0x173   :  { %v1192_v0 = vadd.f32 %v1821_v63, %v1122_v62 }
 0x18c   :  { %v1261_v1 = vpop.f32.mrf.mxu0 }
 0x18d   :  { %v1262_v2 = vadd.f32 %v1261_v1, %v1192_v0 }
 0x18e   :  { %v1907_v3 = vpop.f32.mrf.mxu0 }
 0x18f   :  { %v1265_v4 = vmax.f32 %v1262_v2, 0.0 }
 0x191   :  { %1941 = vmatmul.mubr.f32.vlgmr.msra.gmra.mxu1 %v1265_v4 }
 0x251   :  { %v1355_v9 = vpop.f32.mrf.mxu1 }
 0x252   :  { %v1356_v10 = vadd.f32 %v1470_v8, %v1355_v9 }
 0x253   :  { %v1942_v11 = vpop.f32.mrf.mxu1 }
 0x254   :  { %v1359_v12 = vmax.f32 %v1356_v10, 0.0 }
 0x256   :  { %1976 = vmatmul.mubr.f32.vlgmr.msra.gmra.mxu0 %v1359_v12 }
 0x316   :  { %v1449_v40 = vpop.f32.mrf.mxu0 }
 0x317   :  { %v1450_v14 = vadd.f32 %v1471_v13, %v1449_v40 }
 0x318   :  { %v1977_v15 = vpop.f32.mrf.mxu0 }
 0x319   :  { %1453 = vst [vmem:[#allocation2] sm:$0x3] %v1450_v14 }
 0x31a   :  { %1998 = shalt.err (!%p1995_p4)
}
 0x31b   :  { %1463 = dma.vmem_to_hbm [thread:$0]  %s1461_s11, 32, %s3260_s7, [#allocation3]  }
 0x31c   :  { %2007 = dma.done.wait [#allocation3], 32  }
 0x31d   :  { %2008 = vsyncadd [#allocation3], 4294967264 }
 0x31e   :  { %1467 = vsyncpa [#allocation3], 1 }

</bundles_post_ra>
